<compile_context>
chip_gen: v5e
topology: v5e:2x2
jax: 0.10.0
libtpu: 0.0.40
codegen_flags: <defaults>
</compile_context>

<pallas_src>
import numpy as np
import jax
import jax.numpy as jnp
from jax.experimental import pallas as pl
from jax.experimental.pallas import tpu as pltpu

K = 3            # both convs are 3x3, stride 1, VALID
LANE = 128       # TPU lane width; all kernel lane dims are zero-padded to this
NPIX2 = 25       # conv2 pooled output pixels per sample (5x5)
PIX2_PAD = 32    # per-sample pixel rows padded to a multiple of 8 (clean tile regroup)
C2 = 16          # real conv2 output channels
N_LM = 42        # landmark features
FEAT = 512       # 400 conv features + 42 landmarks, zero-padded to 512


# ---------------------------------------------------------------------------
# Pallas kernels
# ---------------------------------------------------------------------------
def _conv_pool_compute(a, w, b):
    """im2col conv matmul + bias + ReLU + 2x2 max-pool (max over 4 offset slabs).

    a: (4*R, Kp) bf16 patches, rows ordered (pool_offset, n, pooled_pixel[, pad])
    w: (Kp, Cp)  bf16 conv weights in column form (zero-padded)
    b: (1, Cp)   f32 bias (zero-padded)
    returns (R, Cp) f32 pooled activations, channel-last.
    """
    z = jnp.dot(a, w, preferred_element_type=jnp.float32)
    z = jnp.maximum(z + b, 0.0)
    r = z.shape[0] // 4
    return jnp.max(z.reshape(4, r, z.shape[1]), axis=0)


def _conv1_kernel(a_ref, w_ref, b_ref, y_ref):
    y = _conv_pool_compute(a_ref[...], w_ref[...], b_ref[...])
    y_ref[...] = y.astype(y_ref.dtype)


def _conv2_mlp_kernel(a2_ref, lm_ref, w2_ref, b2_ref,
                      fw1_ref, fb1_ref, fw2_ref, fb2_ref, fw3_ref, fb3_ref,
                      o_ref, feat_ref):
    n = o_ref.shape[0]
    # conv2 + relu + pool -> (n*PIX2_PAD, 128) f32, channel-last
    y2 = _conv_pool_compute(a2_ref[...], w2_ref[...], b2_ref[...])
    y2 = y2.reshape(n, PIX2_PAD, y2.shape[1])

    # flatten (h, w, c) + concat landmarks into a lane-dense 512-wide feature slab
    feat_ref[...] = jnp.zeros(feat_ref.shape, feat_ref.dtype)
    for j in range(NPIX2):
        feat_ref[:, j * C2:(j + 1) * C2] = y2[:, j, :C2]
    feat_ref[:, NPIX2 * C2:NPIX2 * C2 + N_LM] = lm_ref[...]

    # fc1 -> relu -> fc2 -> relu -> fc3  (bf16 weights, f32 MXU accumulation)
    h = jnp.dot(feat_ref[...].astype(jnp.bfloat16), fw1_ref[...],
                preferred_element_type=jnp.float32)
    h = jnp.maximum(h + fb1_ref[...], 0.0)
    h = jnp.dot(h.astype(jnp.bfloat16), fw2_ref[...],
                preferred_element_type=jnp.float32)
    h = jnp.maximum(h + fb2_ref[...], 0.0)
    o_ref[...] = jnp.dot(h.astype(jnp.bfloat16), fw3_ref[...],
                         preferred_element_type=jnp.float32) + fb3_ref[...]


_VMEM = pl.BlockSpec(memory_space=pltpu.MemorySpace.VMEM)


def conv1_pool(a1, w1, b1):
    rows = a1.shape[0] // 4
    return pl.pallas_call(
        _conv1_kernel,
        out_shape=jax.ShapeDtypeStruct((rows, w1.shape[1]), jnp.bfloat16),
        in_specs=[_VMEM, _VMEM, _VMEM],
        out_specs=_VMEM,
    )(a1, w1, b1)


def conv2_mlp(a2, lm, p):
    n = lm.shape[0]
    return pl.pallas_call(
        _conv2_mlp_kernel,
        out_shape=jax.ShapeDtypeStruct((n, p["fc3_w"].shape[1]), jnp.float32),
        in_specs=[_VMEM] * 10,
        out_specs=_VMEM,
        scratch_shapes=[pltpu.VMEM((n, FEAT), jnp.float32)],
    )(a2, lm, p["w2"], p["b2"], p["fc1_w"], p["fc1_b"],
      p["fc2_w"], p["fc2_b"], p["fc3_w"], p["fc3_b"])


# ---------------------------------------------------------------------------
# Plain-JAX glue: im2col patch gather (channel-last), zero padding
# ---------------------------------------------------------------------------
def _pad_to(a, shape):
    return jnp.pad(a, [(0, t - s) for s, t in zip(a.shape, shape)])


def _pool_patches_nhwc(x, pix_pad):
    """x: (N, H, W, C) channel-last.  Returns (4*N*pix_pad, 9*C) im2col patches for
    3x3 VALID conv + 2x2/2 max-pool.  Rows ordered (pool_offset, n, pooled_pixel
    [, zero pad]); cols ordered (tap ky*3+kx, channel)."""
    n, h, w, c = x.shape
    p, q = (h - K + 1) // 2, (w - K + 1) // 2
    per_off = []
    for dy in range(2):
        for dx in range(2):
            taps = [x[:, dy + ky:dy + ky + 2 * p:2, dx + kx:dx + kx + 2 * q:2, :]
                    for ky in range(K) for kx in range(K)]
            t = jnp.concatenate(taps, axis=-1).reshape(n, p * q, K * K * c)
            if pix_pad > p * q:
                t = jnp.pad(t, ((0, 0), (0, pix_pad - p * q), (0, 0)))
            per_off.append(t.reshape(n * pix_pad, K * K * c))
    return jnp.concatenate(per_off, axis=0)


def net_forward(params, x, lm):
    n = x.shape[0]
    x_nhwc = jnp.transpose(x, (0, 2, 3, 1))                      # NCHW -> NHWC once
    # conv1 + relu + pool : (n,26,26,3) -> (n*144, 128)  [channels 0..5 real]
    a1 = _pool_patches_nhwc(x_nhwc, 144)                         # (4*n*144, 27)
    a1 = _pad_to(a1, (a1.shape[0], LANE)).astype(jnp.bfloat16)
    y1 = conv1_pool(a1, params["w1"], params["b1"])              # (n*144, 128) bf16
    y1 = y1.reshape(n, 12, 12, LANE)[..., :6]                    # strip channel pad
    # conv2 + relu + pool + flatten + concat(lm) + fc1/fc2/fc3, fused in one kernel
    a2 = _pool_patches_nhwc(y1, PIX2_PAD)                        # (4*n*32, 54)
    a2 = _pad_to(a2, (a2.shape[0], LANE)).astype(jnp.bfloat16)
    out = conv2_mlp(a2, lm, params)                              # (n, 128)
    return out[:, :8]                                            # strip fc3 lane pad


# ---------------------------------------------------------------------------
# Deterministic parameter init (PyTorch-style uniform(-1/sqrt(fan_in), +))
# ---------------------------------------------------------------------------
def _uinit(key, shape, fan_in):
    k = 1.0 / np.sqrt(fan_in)
    return jax.random.uniform(key, shape, jnp.float32, -k, k)


def make_params(key):
    ks = jax.random.split(key, 10)
    raw = {
        "conv1_w": _uinit(ks[0], (6, 3, 3, 3), 27),
        "conv1_b": _uinit(ks[1], (6,), 27),
        "conv2_w": _uinit(ks[2], (16, 6, 3, 3), 54),
        "conv2_b": _uinit(ks[3], (16,), 54),
        "fc1_w": _uinit(ks[4], (1024, 442), 442),
        "fc1_b": _uinit(ks[5], (1024,), 442),
        "fc2_w": _uinit(ks[6], (512, 1024), 1024),
        "fc2_b": _uinit(ks[7], (512,), 1024),
        "fc3_w": _uinit(ks[8], (8, 512), 512),
        "fc3_b": _uinit(ks[9], (8,), 512),
    }
    # conv weights in column form: rows ordered (ky, kx, ci) to match patch layout
    w1 = jnp.transpose(raw["conv1_w"], (2, 3, 1, 0)).reshape(27, 6)
    w2 = jnp.transpose(raw["conv2_w"], (2, 3, 1, 0)).reshape(54, 16)
    # fc1: permute conv-feature rows from torch (c,h,w) flatten order to NHWC (h,w,c)
    W1 = raw["fc1_w"].T                                             # (442, 1024)
    conv_rows = jnp.transpose(W1[:400].reshape(16, 5, 5, 1024),
                              (1, 2, 0, 3)).reshape(400, 1024)
    W1p = jnp.concatenate(
        [conv_rows, W1[400:], jnp.zeros((FEAT - 442, 1024), jnp.float32)], axis=0)
    params = {
        "w1": _pad_to(w1, (LANE, LANE)).astype(jnp.bfloat16),
        "b1": _pad_to(raw["conv1_b"][None, :], (1, LANE)),          # f32
        "w2": _pad_to(w2, (LANE, LANE)).astype(jnp.bfloat16),
        "b2": _pad_to(raw["conv2_b"][None, :], (1, LANE)),          # f32
        "fc1_w": W1p.astype(jnp.bfloat16),                          # (512, 1024)
        "fc1_b": raw["fc1_b"][None, :],                             # (1, 1024) f32
        "fc2_w": raw["fc2_w"].T.astype(jnp.bfloat16),               # (1024, 512)
        "fc2_b": raw["fc2_b"][None, :],                             # (1, 512) f32
        "fc3_w": _pad_to(raw["fc3_w"].T, (512, LANE)).astype(jnp.bfloat16),
        "fc3_b": _pad_to(raw["fc3_b"][None, :], (1, LANE)),         # f32
    }
    return params, raw


# ---------------------------------------------------------------------------
# Pure-JAX reference (mirrors the PyTorch forward; weights bf16-rounded to match
# the kernel's bf16 weight storage, everything else f32)
# ---------------------------------------------------------------------------
def reference_forward(raw, x, lm):
    q = lambda w: w.astype(jnp.bfloat16).astype(jnp.float32)

    def conv(v, w, b):
        y = jax.lax.conv_general_dilated(
            v, w, (1, 1), "VALID", dimension_numbers=("NCHW", "OIHW", "NCHW"))
        return y + b[None, :, None, None]

    def pool(v):
        return jax.lax.reduce_window(v, -jnp.inf, jax.lax.max,
                                     (1, 1, 2, 2), (1, 1, 2, 2), "VALID")

    h = pool(jax.nn.relu(conv(x, q(raw["conv1_w"]), raw["conv1_b"])))
    h = pool(jax.nn.relu(conv(h, q(raw["conv2_w"]), raw["conv2_b"])))
    h = h.reshape(h.shape[0], -1)
    h = jnp.concatenate([h, lm], axis=1)
    h = jax.nn.relu(h @ q(raw["fc1_w"]).T + raw["fc1_b"])
    h = jax.nn.relu(h @ q(raw["fc2_w"]).T + raw["fc2_b"])
    return h @ q(raw["fc3_w"]).T + raw["fc3_b"]


if __name__ == "__main__":
    key = jax.random.PRNGKey(0)
    k_param, k_x, k_lm = jax.random.split(key, 3)
    params, raw = make_params(k_param)

    # fc1 expects 442 = 16*5*5 (conv feature) + 42 (landmarks)  =>  x is 26x26 RGB
    x = jax.random.normal(k_x, (2, 3, 26, 26), jnp.float32)
    lm = jax.random.normal(k_lm, (2, 42), jnp.float32)

    fwd = jax.jit(net_forward)
    out = jax.block_until_ready(fwd(params, x, lm))
    assert out.shape == (2, 8)
    assert bool(jnp.all(jnp.isfinite(out)))

    ref = jax.block_until_ready(reference_forward(raw, x, lm))
    assert np.allclose(np.asarray(out), np.asarray(ref), rtol=1e-2, atol=1e-2), (
        float(np.max(np.abs(np.asarray(out) - np.asarray(ref)))))

    print("KERNEL_OK")
</pallas_src>

<mosaic_0001>
module attributes {stable_mosaic.version = 11 : i64} {
  func.func @_conv1_kernel(%arg0: memref<1152x128xbf16, #tpu.memory_space<vmem>>, %arg1: memref<128x128xbf16, #tpu.memory_space<vmem>>, %arg2: memref<1x128xf32, #tpu.memory_space<vmem>>, %arg3: memref<288x128xbf16, #tpu.memory_space<vmem>>) attributes {dimension_semantics = [], scalar_prefetch = 0 : i64, scratch_operands = 0 : i64, tpu.core_type = #tpu.core_type<tc>} {
    %c0 = arith.constant 0 : index
    %c0_0 = arith.constant 0 : index
    %0 = vector.load %arg0[%c0, %c0_0] : memref<1152x128xbf16, #tpu.memory_space<vmem>>, vector<1152x128xbf16>
    %c0_1 = arith.constant 0 : index
    %c0_2 = arith.constant 0 : index
    %1 = vector.load %arg1[%c0_1, %c0_2] : memref<128x128xbf16, #tpu.memory_space<vmem>>, vector<128x128xbf16>
    %c0_3 = arith.constant 0 : index
    %c0_4 = arith.constant 0 : index
    %2 = vector.load %arg2[%c0_3, %c0_4] : memref<1x128xf32, #tpu.memory_space<vmem>>, vector<1x128xf32>
    %cst = arith.constant dense<0.000000e+00> : vector<1152x128xf32>
    %3 = tpu.matmul %0, %1, %cst {dimension_numbers = #tpu.dot_dimension_numbers<[1], [0], [0], [1], [0, 0, 1, 1], [], []>} : vector<1152x128xbf16>, vector<128x128xbf16>, vector<1152x128xf32> -> vector<1152x128xf32>
    %4 = vector.broadcast %2 : vector<1x128xf32> to vector<1152x128xf32>
    %5 = arith.addf %3, %4 : vector<1152x128xf32>
    %cst_5 = arith.constant 0.000000e+00 : f32
    %6 = vector.broadcast %cst_5 : f32 to vector<1152x128xf32>
    %7 = arith.maximumf %5, %6 : vector<1152x128xf32>
    %8 = vector.shape_cast %7 : vector<1152x128xf32> to vector<4x288x128xf32>
    %cst_6 = arith.constant dense<0xFF800000> : vector<288x128xf32>
    %9 = vector.multi_reduction <maximumf>, %8, %cst_6 [0] : vector<4x288x128xf32> to vector<288x128xf32>
    %10 = arith.truncf %9 : vector<288x128xf32> to vector<288x128xbf16>
    %c0_7 = arith.constant 0 : index
    %c0_8 = arith.constant 0 : index
    %11 = vector.load %arg3[%c0_7, %c0_8] : memref<288x128xbf16, #tpu.memory_space<vmem>>, vector<288x128xbf16>
    tpu.vector_store %arg3[%c0_7, %c0_8], %10 {strides = array<i32>} : memref<288x128xbf16, #tpu.memory_space<vmem>>, vector<288x128xbf16>,
    return
  }
}

module attributes {stable_mosaic.version = 11 : i64} {
  func.func @_conv2_mlp_kernel(%arg0: memref<256x128xbf16, #tpu.memory_space<vmem>>, %arg1: memref<2x42xf32, #tpu.memory_space<vmem>>, %arg2: memref<128x128xbf16, #tpu.memory_space<vmem>>, %arg3: memref<1x128xf32, #tpu.memory_space<vmem>>, %arg4: memref<512x1024xbf16, #tpu.memory_space<vmem>>, %arg5: memref<1x1024xf32, #tpu.memory_space<vmem>>, %arg6: memref<1024x512xbf16, #tpu.memory_space<vmem>>, %arg7: memref<1x512xf32, #tpu.memory_space<vmem>>, %arg8: memref<512x128xbf16, #tpu.memory_space<vmem>>, %arg9: memref<1x128xf32, #tpu.memory_space<vmem>>, %arg10: memref<2x128xf32, #tpu.memory_space<vmem>>, %arg11: memref<2x512xf32, #tpu.memory_space<vmem>>) attributes {dimension_semantics = [], scalar_prefetch = 0 : i64, scratch_operands = 1 : i64, tpu.core_type = #tpu.core_type<tc>} {
    %c0 = arith.constant 0 : index
    %c0_0 = arith.constant 0 : index
    %0 = vector.load %arg0[%c0, %c0_0] : memref<256x128xbf16, #tpu.memory_space<vmem>>, vector<256x128xbf16>
    %c0_1 = arith.constant 0 : index
    %c0_2 = arith.constant 0 : index
    %1 = vector.load %arg2[%c0_1, %c0_2] : memref<128x128xbf16, #tpu.memory_space<vmem>>, vector<128x128xbf16>
    %c0_3 = arith.constant 0 : index
    %c0_4 = arith.constant 0 : index
    %2 = vector.load %arg3[%c0_3, %c0_4] : memref<1x128xf32, #tpu.memory_space<vmem>>, vector<1x128xf32>
    %cst = arith.constant dense<0.000000e+00> : vector<256x128xf32>
    %3 = tpu.matmul %0, %1, %cst {dimension_numbers = #tpu.dot_dimension_numbers<[1], [0], [0], [1], [0, 0, 1, 1], [], []>} : vector<256x128xbf16>, vector<128x128xbf16>, vector<256x128xf32> -> vector<256x128xf32>
    %4 = vector.broadcast %2 : vector<1x128xf32> to vector<256x128xf32>
    %5 = arith.addf %3, %4 : vector<256x128xf32>
    %cst_5 = arith.constant 0.000000e+00 : f32
    %6 = vector.broadcast %cst_5 : f32 to vector<256x128xf32>
    %7 = arith.maximumf %5, %6 : vector<256x128xf32>
    %8 = vector.shape_cast %7 : vector<256x128xf32> to vector<4x64x128xf32>
    %cst_6 = arith.constant dense<0xFF800000> : vector<64x128xf32>
    %9 = vector.multi_reduction <maximumf>, %8, %cst_6 [0] : vector<4x64x128xf32> to vector<64x128xf32>
    %10 = vector.shape_cast %9 : vector<64x128xf32> to vector<2x32x128xf32>
    %cst_7 = arith.constant 0.000000e+00 : f32
    %11 = vector.broadcast %cst_7 : f32 to vector<2x512xf32>
    %c0_8 = arith.constant 0 : index
    %c0_9 = arith.constant 0 : index
    %12 = vector.load %arg11[%c0_8, %c0_9] : memref<2x512xf32, #tpu.memory_space<vmem>>, vector<2x512xf32>
    tpu.vector_store %arg11[%c0_8, %c0_9], %11 {strides = array<i32>} : memref<2x512xf32, #tpu.memory_space<vmem>>, vector<2x512xf32>,
    %13 = vector.extract_strided_slice %10 {offsets = [0, 0, 0], sizes = [2, 1, 16], strides = [1, 1, 1]} : vector<2x32x128xf32> to vector<2x1x16xf32>
    %14 = vector.shape_cast %13 : vector<2x1x16xf32> to vector<2x16xf32>
    %c0_10 = arith.constant 0 : index
    %c0_11 = arith.constant 0 : index
    %15 = vector.load %arg11[%c0_10, %c0_11] : memref<2x512xf32, #tpu.memory_space<vmem>>, vector<2x16xf32>
    tpu.vector_store %arg11[%c0_10, %c0_11], %14 {strides = array<i32>} : memref<2x512xf32, #tpu.memory_space<vmem>>, vector<2x16xf32>,
    %16 = vector.extract_strided_slice %10 {offsets = [0, 1, 0], sizes = [2, 1, 16], strides = [1, 1, 1]} : vector<2x32x128xf32> to vector<2x1x16xf32>
    %17 = vector.shape_cast %16 : vector<2x1x16xf32> to vector<2x16xf32>
    %c0_12 = arith.constant 0 : index
    %c16 = arith.constant 16 : index
    %18 = vector.load %arg11[%c0_12, %c16] : memref<2x512xf32, #tpu.memory_space<vmem>>, vector<2x16xf32>
    tpu.vector_store %arg11[%c0_12, %c16], %17 {strides = array<i32>} : memref<2x512xf32, #tpu.memory_space<vmem>>, vector<2x16xf32>,
    %19 = vector.extract_strided_slice %10 {offsets = [0, 2, 0], sizes = [2, 1, 16], strides = [1, 1, 1]} : vector<2x32x128xf32> to vector<2x1x16xf32>
    %20 = vector.shape_cast %19 : vector<2x1x16xf32> to vector<2x16xf32>
    %c0_13 = arith.constant 0 : index
    %c32 = arith.constant 32 : index
    %21 = vector.load %arg11[%c0_13, %c32] : memref<2x512xf32, #tpu.memory_space<vmem>>, vector<2x16xf32>
    tpu.vector_store %arg11[%c0_13, %c32], %20 {strides = array<i32>} : memref<2x512xf32, #tpu.memory_space<vmem>>, vector<2x16xf32>,
    %22 = vector.extract_strided_slice %10 {offsets = [0, 3, 0], sizes = [2, 1, 16], strides = [1, 1, 1]} : vector<2x32x128xf32> to vector<2x1x16xf32>
    %23 = vector.shape_cast %22 : vector<2x1x16xf32> to vector<2x16xf32>
    %c0_14 = arith.constant 0 : index
    %c48 = arith.constant 48 : index
    %24 = vector.load %arg11[%c0_14, %c48] : memref<2x512xf32, #tpu.memory_space<vmem>>, vector<2x16xf32>
    tpu.vector_store %arg11[%c0_14, %c48], %23 {strides = array<i32>} : memref<2x512xf32, #tpu.memory_space<vmem>>, vector<2x16xf32>,
    %25 = vector.extract_strided_slice %10 {offsets = [0, 4, 0], sizes = [2, 1, 16], strides = [1, 1, 1]} : vector<2x32x128xf32> to vector<2x1x16xf32>
    %26 = vector.shape_cast %25 : vector<2x1x16xf32> to vector<2x16xf32>
    %c0_15 = arith.constant 0 : index
    %c64 = arith.constant 64 : index
    %27 = vector.load %arg11[%c0_15, %c64] : memref<2x512xf32, #tpu.memory_space<vmem>>, vector<2x16xf32>
    tpu.vector_store %arg11[%c0_15, %c64], %26 {strides = array<i32>} : memref<2x512xf32, #tpu.memory_space<vmem>>, vector<2x16xf32>,
    %28 = vector.extract_strided_slice %10 {offsets = [0, 5, 0], sizes = [2, 1, 16], strides = [1, 1, 1]} : vector<2x32x128xf32> to vector<2x1x16xf32>
    %29 = vector.shape_cast %28 : vector<2x1x16xf32> to vector<2x16xf32>
    %c0_16 = arith.constant 0 : index
    %c80 = arith.constant 80 : index
    %30 = vector.load %arg11[%c0_16, %c80] : memref<2x512xf32, #tpu.memory_space<vmem>>, vector<2x16xf32>
    tpu.vector_store %arg11[%c0_16, %c80], %29 {strides = array<i32>} : memref<2x512xf32, #tpu.memory_space<vmem>>, vector<2x16xf32>,
    %31 = vector.extract_strided_slice %10 {offsets = [0, 6, 0], sizes = [2, 1, 16], strides = [1, 1, 1]} : vector<2x32x128xf32> to vector<2x1x16xf32>
    %32 = vector.shape_cast %31 : vector<2x1x16xf32> to vector<2x16xf32>
    %c0_17 = arith.constant 0 : index
    %c96 = arith.constant 96 : index
    %33 = vector.load %arg11[%c0_17, %c96] : memref<2x512xf32, #tpu.memory_space<vmem>>, vector<2x16xf32>
    tpu.vector_store %arg11[%c0_17, %c96], %32 {strides = array<i32>} : memref<2x512xf32, #tpu.memory_space<vmem>>, vector<2x16xf32>,
    %34 = vector.extract_strided_slice %10 {offsets = [0, 7, 0], sizes = [2, 1, 16], strides = [1, 1, 1]} : vector<2x32x128xf32> to vector<2x1x16xf32>
    %35 = vector.shape_cast %34 : vector<2x1x16xf32> to vector<2x16xf32>
    %c0_18 = arith.constant 0 : index
    %c112 = arith.constant 112 : index
    %36 = vector.load %arg11[%c0_18, %c112] : memref<2x512xf32, #tpu.memory_space<vmem>>, vector<2x16xf32>
    tpu.vector_store %arg11[%c0_18, %c112], %35 {strides = array<i32>} : memref<2x512xf32, #tpu.memory_space<vmem>>, vector<2x16xf32>,
    %37 = vector.extract_strided_slice %10 {offsets = [0, 8, 0], sizes = [2, 1, 16], strides = [1, 1, 1]} : vector<2x32x128xf32> to vector<2x1x16xf32>
    %38 = vector.shape_cast %37 : vector<2x1x16xf32> to vector<2x16xf32>
    %c0_19 = arith.constant 0 : index
    %c128 = arith.constant 128 : index
    %39 = vector.load %arg11[%c0_19, %c128] : memref<2x512xf32, #tpu.memory_space<vmem>>, vector<2x16xf32>
    tpu.vector_store %arg11[%c0_19, %c128], %38 {strides = array<i32>} : memref<2x512xf32, #tpu.memory_space<vmem>>, vector<2x16xf32>,
    %40 = vector.extract_strided_slice %10 {offsets = [0, 9, 0], sizes = [2, 1, 16], strides = [1, 1, 1]} : vector<2x32x128xf32> to vector<2x1x16xf32>
    %41 = vector.shape_cast %40 : vector<2x1x16xf32> to vector<2x16xf32>
    %c0_20 = arith.constant 0 : index
    %c144 = arith.constant 144 : index
    %42 = vector.load %arg11[%c0_20, %c144] : memref<2x512xf32, #tpu.memory_space<vmem>>, vector<2x16xf32>
    tpu.vector_store %arg11[%c0_20, %c144], %41 {strides = array<i32>} : memref<2x512xf32, #tpu.memory_space<vmem>>, vector<2x16xf32>,
    %43 = vector.extract_strided_slice %10 {offsets = [0, 10, 0], sizes = [2, 1, 16], strides = [1, 1, 1]} : vector<2x32x128xf32> to vector<2x1x16xf32>
    %44 = vector.shape_cast %43 : vector<2x1x16xf32> to vector<2x16xf32>
    %c0_21 = arith.constant 0 : index
    %c160 = arith.constant 160 : index
    %45 = vector.load %arg11[%c0_21, %c160] : memref<2x512xf32, #tpu.memory_space<vmem>>, vector<2x16xf32>
    tpu.vector_store %arg11[%c0_21, %c160], %44 {strides = array<i32>} : memref<2x512xf32, #tpu.memory_space<vmem>>, vector<2x16xf32>,
    %46 = vector.extract_strided_slice %10 {offsets = [0, 11, 0], sizes = [2, 1, 16], strides = [1, 1, 1]} : vector<2x32x128xf32> to vector<2x1x16xf32>
    %47 = vector.shape_cast %46 : vector<2x1x16xf32> to vector<2x16xf32>
    %c0_22 = arith.constant 0 : index
    %c176 = arith.constant 176 : index
    %48 = vector.load %arg11[%c0_22, %c176] : memref<2x512xf32, #tpu.memory_space<vmem>>, vector<2x16xf32>
    tpu.vector_store %arg11[%c0_22, %c176], %47 {strides = array<i32>} : memref<2x512xf32, #tpu.memory_space<vmem>>, vector<2x16xf32>,
    %49 = vector.extract_strided_slice %10 {offsets = [0, 12, 0], sizes = [2, 1, 16], strides = [1, 1, 1]} : vector<2x32x128xf32> to vector<2x1x16xf32>
    %50 = vector.shape_cast %49 : vector<2x1x16xf32> to vector<2x16xf32>
    %c0_23 = arith.constant 0 : index
    %c192 = arith.constant 192 : index
    %51 = vector.load %arg11[%c0_23, %c192] : memref<2x512xf32, #tpu.memory_space<vmem>>, vector<2x16xf32>
    tpu.vector_store %arg11[%c0_23, %c192], %50 {strides = array<i32>} : memref<2x512xf32, #tpu.memory_space<vmem>>, vector<2x16xf32>,
    %52 = vector.extract_strided_slice %10 {offsets = [0, 13, 0], sizes = [2, 1, 16], strides = [1, 1, 1]} : vector<2x32x128xf32> to vector<2x1x16xf32>
    %53 = vector.shape_cast %52 : vector<2x1x16xf32> to vector<2x16xf32>
    %c0_24 = arith.constant 0 : index
    %c208 = arith.constant 208 : index
    %54 = vector.load %arg11[%c0_24, %c208] : memref<2x512xf32, #tpu.memory_space<vmem>>, vector<2x16xf32>
    tpu.vector_store %arg11[%c0_24, %c208], %53 {strides = array<i32>} : memref<2x512xf32, #tpu.memory_space<vmem>>, vector<2x16xf32>,
    %55 = vector.extract_strided_slice %10 {offsets = [0, 14, 0], sizes = [2, 1, 16], strides = [1, 1, 1]} : vector<2x32x128xf32> to vector<2x1x16xf32>
    %56 = vector.shape_cast %55 : vector<2x1x16xf32> to vector<2x16xf32>
    %c0_25 = arith.constant 0 : index
    %c224 = arith.constant 224 : index
    %57 = vector.load %arg11[%c0_25, %c224] : memref<2x512xf32, #tpu.memory_space<vmem>>, vector<2x16xf32>
    tpu.vector_store %arg11[%c0_25, %c224], %56 {strides = array<i32>} : memref<2x512xf32, #tpu.memory_space<vmem>>, vector<2x16xf32>,
    %58 = vector.extract_strided_slice %10 {offsets = [0, 15, 0], sizes = [2, 1, 16], strides = [1, 1, 1]} : vector<2x32x128xf32> to vector<2x1x16xf32>
    %59 = vector.shape_cast %58 : vector<2x1x16xf32> to vector<2x16xf32>
    %c0_26 = arith.constant 0 : index
    %c240 = arith.constant 240 : index
    %60 = vector.load %arg11[%c0_26, %c240] : memref<2x512xf32, #tpu.memory_space<vmem>>, vector<2x16xf32>
    tpu.vector_store %arg11[%c0_26, %c240], %59 {strides = array<i32>} : memref<2x512xf32, #tpu.memory_space<vmem>>, vector<2x16xf32>,
    %61 = vector.extract_strided_slice %10 {offsets = [0, 16, 0], sizes = [2, 1, 16], strides = [1, 1, 1]} : vector<2x32x128xf32> to vector<2x1x16xf32>
    %62 = vector.shape_cast %61 : vector<2x1x16xf32> to vector<2x16xf32>
    %c0_27 = arith.constant 0 : index
    %c256 = arith.constant 256 : index
    %63 = vector.load %arg11[%c0_27, %c256] : memref<2x512xf32, #tpu.memory_space<vmem>>, vector<2x16xf32>
    tpu.vector_store %arg11[%c0_27, %c256], %62 {strides = array<i32>} : memref<2x512xf32, #tpu.memory_space<vmem>>, vector<2x16xf32>,
    %64 = vector.extract_strided_slice %10 {offsets = [0, 17, 0], sizes = [2, 1, 16], strides = [1, 1, 1]} : vector<2x32x128xf32> to vector<2x1x16xf32>
    %65 = vector.shape_cast %64 : vector<2x1x16xf32> to vector<2x16xf32>
    %c0_28 = arith.constant 0 : index
    %c272 = arith.constant 272 : index
    %66 = vector.load %arg11[%c0_28, %c272] : memref<2x512xf32, #tpu.memory_space<vmem>>, vector<2x16xf32>
    tpu.vector_store %arg11[%c0_28, %c272], %65 {strides = array<i32>} : memref<2x512xf32, #tpu.memory_space<vmem>>, vector<2x16xf32>,
    %67 = vector.extract_strided_slice %10 {offsets = [0, 18, 0], sizes = [2, 1, 16], strides = [1, 1, 1]} : vector<2x32x128xf32> to vector<2x1x16xf32>
    %68 = vector.shape_cast %67 : vector<2x1x16xf32> to vector<2x16xf32>
    %c0_29 = arith.constant 0 : index
    %c288 = arith.constant 288 : index
    %69 = vector.load %arg11[%c0_29, %c288] : memref<2x512xf32, #tpu.memory_space<vmem>>, vector<2x16xf32>
    tpu.vector_store %arg11[%c0_29, %c288], %68 {strides = array<i32>} : memref<2x512xf32, #tpu.memory_space<vmem>>, vector<2x16xf32>,
    %70 = vector.extract_strided_slice %10 {offsets = [0, 19, 0], sizes = [2, 1, 16], strides = [1, 1, 1]} : vector<2x32x128xf32> to vector<2x1x16xf32>
    %71 = vector.shape_cast %70 : vector<2x1x16xf32> to vector<2x16xf32>
    %c0_30 = arith.constant 0 : index
    %c304 = arith.constant 304 : index
    %72 = vector.load %arg11[%c0_30, %c304] : memref<2x512xf32, #tpu.memory_space<vmem>>, vector<2x16xf32>
    tpu.vector_store %arg11[%c0_30, %c304], %71 {strides = array<i32>} : memref<2x512xf32, #tpu.memory_space<vmem>>, vector<2x16xf32>,
    %73 = vector.extract_strided_slice %10 {offsets = [0, 20, 0], sizes = [2, 1, 16], strides = [1, 1, 1]} : vector<2x32x128xf32> to vector<2x1x16xf32>
    %74 = vector.shape_cast %73 : vector<2x1x16xf32> to vector<2x16xf32>
    %c0_31 = arith.constant 0 : index
    %c320 = arith.constant 320 : index
    %75 = vector.load %arg11[%c0_31, %c320] : memref<2x512xf32, #tpu.memory_space<vmem>>, vector<2x16xf32>
    tpu.vector_store %arg11[%c0_31, %c320], %74 {strides = array<i32>} : memref<2x512xf32, #tpu.memory_space<vmem>>, vector<2x16xf32>,
    %76 = vector.extract_strided_slice %10 {offsets = [0, 21, 0], sizes = [2, 1, 16], strides = [1, 1, 1]} : vector<2x32x128xf32> to vector<2x1x16xf32>
    %77 = vector.shape_cast %76 : vector<2x1x16xf32> to vector<2x16xf32>
    %c0_32 = arith.constant 0 : index
    %c336 = arith.constant 336 : index
    %78 = vector.load %arg11[%c0_32, %c336] : memref<2x512xf32, #tpu.memory_space<vmem>>, vector<2x16xf32>
    tpu.vector_store %arg11[%c0_32, %c336], %77 {strides = array<i32>} : memref<2x512xf32, #tpu.memory_space<vmem>>, vector<2x16xf32>,
    %79 = vector.extract_strided_slice %10 {offsets = [0, 22, 0], sizes = [2, 1, 16], strides = [1, 1, 1]} : vector<2x32x128xf32> to vector<2x1x16xf32>
    %80 = vector.shape_cast %79 : vector<2x1x16xf32> to vector<2x16xf32>
    %c0_33 = arith.constant 0 : index
    %c352 = arith.constant 352 : index
    %81 = vector.load %arg11[%c0_33, %c352] : memref<2x512xf32, #tpu.memory_space<vmem>>, vector<2x16xf32>
    tpu.vector_store %arg11[%c0_33, %c352], %80 {strides = array<i32>} : memref<2x512xf32, #tpu.memory_space<vmem>>, vector<2x16xf32>,
    %82 = vector.extract_strided_slice %10 {offsets = [0, 23, 0], sizes = [2, 1, 16], strides = [1, 1, 1]} : vector<2x32x128xf32> to vector<2x1x16xf32>
    %83 = vector.shape_cast %82 : vector<2x1x16xf32> to vector<2x16xf32>
    %c0_34 = arith.constant 0 : index
    %c368 = arith.constant 368 : index
    %84 = vector.load %arg11[%c0_34, %c368] : memref<2x512xf32, #tpu.memory_space<vmem>>, vector<2x16xf32>
    tpu.vector_store %arg11[%c0_34, %c368], %83 {strides = array<i32>} : memref<2x512xf32, #tpu.memory_space<vmem>>, vector<2x16xf32>,
    %85 = vector.extract_strided_slice %10 {offsets = [0, 24, 0], sizes = [2, 1, 16], strides = [1, 1, 1]} : vector<2x32x128xf32> to vector<2x1x16xf32>
    %86 = vector.shape_cast %85 : vector<2x1x16xf32> to vector<2x16xf32>
    %c0_35 = arith.constant 0 : index
    %c384 = arith.constant 384 : index
    %87 = vector.load %arg11[%c0_35, %c384] : memref<2x512xf32, #tpu.memory_space<vmem>>, vector<2x16xf32>
    tpu.vector_store %arg11[%c0_35, %c384], %86 {strides = array<i32>} : memref<2x512xf32, #tpu.memory_space<vmem>>, vector<2x16xf32>,
    %c0_36 = arith.constant 0 : index
    %c0_37 = arith.constant 0 : index
    %88 = vector.load %arg1[%c0_36, %c0_37] : memref<2x42xf32, #tpu.memory_space<vmem>>, vector<2x42xf32>
    %c0_38 = arith.constant 0 : index
    %c400 = arith.constant 400 : index
    %89 = vector.load %arg11[%c0_38, %c400] : memref<2x512xf32, #tpu.memory_space<vmem>>, vector<2x42xf32>
    tpu.vector_store %arg11[%c0_38, %c400], %88 {strides = array<i32>} : memref<2x512xf32, #tpu.memory_space<vmem>>, vector<2x42xf32>,
    %c0_39 = arith.constant 0 : index
    %c0_40 = arith.constant 0 : index
    %90 = vector.load %arg11[%c0_39, %c0_40] : memref<2x512xf32, #tpu.memory_space<vmem>>, vector<2x512xf32>
    %91 = arith.truncf %90 : vector<2x512xf32> to vector<2x512xbf16>
    %c0_41 = arith.constant 0 : index
    %c0_42 = arith.constant 0 : index
    %92 = vector.load %arg4[%c0_41, %c0_42] : memref<512x1024xbf16, #tpu.memory_space<vmem>>, vector<512x1024xbf16>
    %cst_43 = arith.constant dense<0.000000e+00> : vector<2x1024xf32>
    %93 = tpu.matmul %91, %92, %cst_43 {dimension_numbers = #tpu.dot_dimension_numbers<[1], [0], [0], [1], [0, 0, 1, 1], [], []>} : vector<2x512xbf16>, vector<512x1024xbf16>, vector<2x1024xf32> -> vector<2x1024xf32>
    %c0_44 = arith.constant 0 : index
    %c0_45 = arith.constant 0 : index
    %94 = vector.load %arg5[%c0_44, %c0_45] : memref<1x1024xf32, #tpu.memory_space<vmem>>, vector<1x1024xf32>
    %95 = vector.broadcast %94 : vector<1x1024xf32> to vector<2x1024xf32>
    %96 = arith.addf %93, %95 : vector<2x1024xf32>
    %cst_46 = arith.constant 0.000000e+00 : f32
    %97 = vector.broadcast %cst_46 : f32 to vector<2x1024xf32>
    %98 = arith.maximumf %96, %97 : vector<2x1024xf32>
    %99 = arith.truncf %98 : vector<2x1024xf32> to vector<2x1024xbf16>
    %c0_47 = arith.constant 0 : index
    %c0_48 = arith.constant 0 : index
    %100 = vector.load %arg6[%c0_47, %c0_48] : memref<1024x512xbf16, #tpu.memory_space<vmem>>, vector<1024x512xbf16>
    %cst_49 = arith.constant dense<0.000000e+00> : vector<2x512xf32>
    %101 = tpu.matmul %99, %100, %cst_49 {dimension_numbers = #tpu.dot_dimension_numbers<[1], [0], [0], [1], [0, 0, 1, 1], [], []>} : vector<2x1024xbf16>, vector<1024x512xbf16>, vector<2x512xf32> -> vector<2x512xf32>
    %c0_50 = arith.constant 0 : index
    %c0_51 = arith.constant 0 : index
    %102 = vector.load %arg7[%c0_50, %c0_51] : memref<1x512xf32, #tpu.memory_space<vmem>>, vector<1x512xf32>
    %103 = vector.broadcast %102 : vector<1x512xf32> to vector<2x512xf32>
    %104 = arith.addf %101, %103 : vector<2x512xf32>
    %cst_52 = arith.constant 0.000000e+00 : f32
    %105 = vector.broadcast %cst_52 : f32 to vector<2x512xf32>
    %106 = arith.maximumf %104, %105 : vector<2x512xf32>
    %107 = arith.truncf %106 : vector<2x512xf32> to vector<2x512xbf16>
    %c0_53 = arith.constant 0 : index
    %c0_54 = arith.constant 0 : index
    %108 = vector.load %arg8[%c0_53, %c0_54] : memref<512x128xbf16, #tpu.memory_space<vmem>>, vector<512x128xbf16>
    %cst_55 = arith.constant dense<0.000000e+00> : vector<2x128xf32>
    %109 = tpu.matmul %107, %108, %cst_55 {dimension_numbers = #tpu.dot_dimension_numbers<[1], [0], [0], [1], [0, 0, 1, 1], [], []>} : vector<2x512xbf16>, vector<512x128xbf16>, vector<2x128xf32> -> vector<2x128xf32>
    %c0_56 = arith.constant 0 : index
    %c0_57 = arith.constant 0 : index
    %110 = vector.load %arg9[%c0_56, %c0_57] : memref<1x128xf32, #tpu.memory_space<vmem>>, vector<1x128xf32>
    %111 = vector.broadcast %110 : vector<1x128xf32> to vector<2x128xf32>
    %112 = arith.addf %109, %111 : vector<2x128xf32>
    %c0_58 = arith.constant 0 : index
    %c0_59 = arith.constant 0 : index
    %113 = vector.load %arg10[%c0_58, %c0_59] : memref<2x128xf32, #tpu.memory_space<vmem>>, vector<2x128xf32>
    tpu.vector_store %arg10[%c0_58, %c0_59], %112 {strides = array<i32>} : memref<2x128xf32, #tpu.memory_space<vmem>>, vector<2x128xf32>,
    return
  }
}

</mosaic_0001>

<bundles_post_ra>
// kernel: net_forward.2
= control target key start
LH: loop header
LB: loop body
LE: loop exit
PB: predicated region body
PF: predicated region fallthrough
CT: control target
= control target key end

     0   :  { %s2356_s1 = inlined_call_operand.vmem [shape: bf16[128,128], index: 1, kind: input, shape index: {}]   ;;  %s2357_s2 = inlined_call_operand.vmem [shape: f32[1,128], index: 2, kind: input, shape index: {}]   ;;  %s2358_s0 = inlined_call_operand.vmem [shape: bf16[1152,128], index: 0, kind: input, shape index: {}]   ;;  %s2359_s3 = inlined_call_operand.vmem [shape: bf16[288,128], index: 3, kind: output, shape index: {}]  }
   0x1   :  { %v1754_v0 = vld [vmem:[%s2356_s1 + $0x38] sm:$0xff]  ;;  %v1753_v1 = vld [vmem:[%s2356_s1 + $0x30] sm:$0xff]  ;;  %v1752_v2 = vld [vmem:[%s2356_s1 + $0x28] sm:$0xff] }
   0x2   :  { %658 = vmatpush.bf16.msra.mxu0 %v1754_v0  ;;  %1862 = vmatpush.bf16.msra.mxu1 %v1754_v0  ;;  %v1751_v3 = vld [vmem:[%s2356_s1 + $0x20] sm:$0xff]  ;;  %v1750_v4 = vld [vmem:[%s2356_s1 + $0x18] sm:$0xff]  ;;  %v1749_v5 = vld [vmem:[%s2356_s1 + $0x10] sm:$0xff] }
   0x3   :  { %1863 = vmatpush.bf16.msra.mxu2 %v1754_v0  ;;  %1864 = vmatpush.bf16.msra.mxu3 %v1754_v0  ;;  %v1748_v6 = vld [vmem:[%s2356_s1 + $0x8] sm:$0xff]  ;;  %v1747_v7 = vld [vmem:[%s2356_s1] sm:$0xff]  ;;  %v1693_v9 = vld [vmem:[%s2358_s0 + $0x90] sm:$0xff] }
   0x4   :  { %v1675_v8 = vld [vmem:[%s2358_s0] sm:$0xff]  ;;  %v1729_v11 = vld [vmem:[%s2358_s0 + $0x1b0] sm:$0xff]  ;;  %v1676_v12 = vld [vmem:[%s2358_s0 + $0x8] sm:$0xff] }
   0x5   :  { %v1711_v10 = vld [vmem:[%s2358_s0 + $0x120] sm:$0xff]  ;;  %v1694_v13 = vld [vmem:[%s2358_s0 + $0x98] sm:$0xff]  ;;  %v1712_v14 = vld [vmem:[%s2358_s0 + $0x128] sm:$0xff] }
   0x6   :  { %659 = vmatpush.bf16.msra.mxu0 %v1753_v1  ;;  %1865 = vmatpush.bf16.msra.mxu1 %v1753_v1  ;;  %v1730_v15 = vld [vmem:[%s2358_s0 + $0x1b8] sm:$0xff]  ;;  %v1677_v16 = vld [vmem:[%s2358_s0 + $0x10] sm:$0xff]  ;;  %v1695_v17 = vld [vmem:[%s2358_s0 + $0xa0] sm:$0xff] }
   0x7   :  { %1866 = vmatpush.bf16.msra.mxu2 %v1753_v1  ;;  %1867 = vmatpush.bf16.msra.mxu3 %v1753_v1  ;;  %v1713_v18 = vld [vmem:[%s2358_s0 + $0x130] sm:$0xff]  ;;  %v1731_v19 = vld [vmem:[%s2358_s0 + $0x1c0] sm:$0xff]  ;;  %v1678_v20 = vld [vmem:[%s2358_s0 + $0x18] sm:$0xff] }
   0x8   :  { %v1696_v21 = vld [vmem:[%s2358_s0 + $0xa8] sm:$0xff]  ;;  %v1714_v22 = vld [vmem:[%s2358_s0 + $0x138] sm:$0xff]  ;;  %v1679_v24 = vld [vmem:[%s2358_s0 + $0x20] sm:$0xff] }
   0x9   :  { %v1732_v23 = vld [vmem:[%s2358_s0 + $0x1c8] sm:$0xff]  ;;  %v1697_v25 = vld [vmem:[%s2358_s0 + $0xb0] sm:$0xff]  ;;  %v1715_v26 = vld [vmem:[%s2358_s0 + $0x140] sm:$0xff] }
   0xa   :  { %660 = vmatpush.bf16.msra.mxu0 %v1752_v2  ;;  %1868 = vmatpush.bf16.msra.mxu1 %v1752_v2  ;;  %v1733_v27 = vld [vmem:[%s2358_s0 + $0x1d0] sm:$0xff]  ;;  %v1680_v28 = vld [vmem:[%s2358_s0 + $0x28] sm:$0xff]  ;;  %v1698_v29 = vld [vmem:[%s2358_s0 + $0xb8] sm:$0xff] }
   0xb   :  { %1869 = vmatpush.bf16.msra.mxu2 %v1752_v2  ;;  %1870 = vmatpush.bf16.msra.mxu3 %v1752_v2  ;;  %v1716_v30 = vld [vmem:[%s2358_s0 + $0x148] sm:$0xff]  ;;  %v1734_v31 = vld [vmem:[%s2358_s0 + $0x1d8] sm:$0xff]  ;;  %v1681_v32 = vld [vmem:[%s2358_s0 + $0x30] sm:$0xff] }
   0xc   :  { %v1699_v33 = vld [vmem:[%s2358_s0 + $0xc0] sm:$0xff]  ;;  %v1717_v34 = vld [vmem:[%s2358_s0 + $0x150] sm:$0xff]  ;;  %v1682_v36 = vld [vmem:[%s2358_s0 + $0x38] sm:$0xff] }
   0xd   :  { %v1735_v35 = vld [vmem:[%s2358_s0 + $0x1e0] sm:$0xff]  ;;  %v1700_v37 = vld [vmem:[%s2358_s0 + $0xc8] sm:$0xff]  ;;  %v1718_v38 = vld [vmem:[%s2358_s0 + $0x158] sm:$0xff] }
   0xe   :  { %661 = vmatpush.bf16.msra.mxu0 %v1751_v3  ;;  %1871 = vmatpush.bf16.msra.mxu1 %v1751_v3  ;;  %v1736_v39 = vld [vmem:[%s2358_s0 + $0x1e8] sm:$0xff]  ;;  %v1683_v40 = vld [vmem:[%s2358_s0 + $0x40] sm:$0xff]  ;;  %v1701_v41 = vld [vmem:[%s2358_s0 + $0xd0] sm:$0xff] }
   0xf   :  { %1872 = vmatpush.bf16.msra.mxu2 %v1751_v3  ;;  %1873 = vmatpush.bf16.msra.mxu3 %v1751_v3  ;;  %v1719_v44 = vld [vmem:[%s2358_s0 + $0x160] sm:$0xff]  ;;  %v1737_v45 = vld [vmem:[%s2358_s0 + $0x1f0] sm:$0xff]  ;;  %v1684_v1 = vld [vmem:[%s2358_s0 + $0x48] sm:$0xff] }
  0x10   :  { %v2043_v46 = vld [vmem:[%s2357_s2] ss:$0 sm:$0xff]  ;;  %v1702_v2 = vld [vmem:[%s2358_s0 + $0xd8] sm:$0xff] }
  0x12   :  { %662 = vmatpush.bf16.msra.mxu0 %v1750_v4  ;;  %1874 = vmatpush.bf16.msra.mxu1 %v1750_v4 }
  0x13   :  { %1875 = vmatpush.bf16.msra.mxu2 %v1750_v4  ;;  %1876 = vmatpush.bf16.msra.mxu3 %v1750_v4 }
  0x16   :  { %663 = vmatpush.bf16.msra.mxu0 %v1749_v5  ;;  %1877 = vmatpush.bf16.msra.mxu1 %v1749_v5 }
  0x17   :  { %1878 = vmatpush.bf16.msra.mxu2 %v1749_v5  ;;  %1879 = vmatpush.bf16.msra.mxu3 %v1749_v5 }
  0x1a   :  { %664 = vmatpush.bf16.msra.mxu0 %v1748_v6  ;;  %1880 = vmatpush.bf16.msra.mxu1 %v1748_v6 }
  0x1b   :  { %1881 = vmatpush.bf16.msra.mxu2 %v1748_v6  ;;  %1882 = vmatpush.bf16.msra.mxu3 %v1748_v6 }
  0x1e   :  { %665 = vmatpush.bf16.msra.mxu0 %v1747_v7  ;;  %1883 = vmatpush.bf16.msra.mxu1 %v1747_v7 }
  0x1f   :  { %1884 = vmatpush.bf16.msra.mxu2 %v1747_v7  ;;  %1885 = vmatpush.bf16.msra.mxu3 %v1747_v7  ;;  %v1720_v7 = vld [vmem:[%s2358_s0 + $0x168] sm:$0xff] }
  0x21   :  { %666 = vmatmul.bf16.vlgmr.msra.gmra.mxu0 %v1675_v8  ;;  %756 = vmatmul.bf16.vlgmr.msra.gmra.mxu1 %v1693_v9  ;;  %v1738_v8 = vld [vmem:[%s2358_s0 + $0x1f8] sm:$0xff] }
  0x22   :  { %846 = vmatmul.bf16.vlgmr.msra.gmra.mxu2 %v1711_v10  ;;  %936 = vmatmul.bf16.vlgmr.msra.gmra.mxu3 %v1729_v11 }
  0x31   :  { %671 = vmatmul.bf16.gmra.mxu0 %v1676_v12  ;;  %761 = vmatmul.bf16.gmra.mxu1 %v1694_v13 }
  0x32   :  { %851 = vmatmul.bf16.gmra.mxu2 %v1712_v14  ;;  %941 = vmatmul.bf16.gmra.mxu3 %v1730_v15 }
  0x41   :  { %676 = vmatmul.bf16.gmra.mxu0 %v1677_v16  ;;  %766 = vmatmul.bf16.gmra.mxu1 %v1695_v17 }
  0x42   :  { %856 = vmatmul.bf16.gmra.mxu2 %v1713_v18  ;;  %946 = vmatmul.bf16.gmra.mxu3 %v1731_v19 }
  0x51   :  { %681 = vmatmul.bf16.gmra.mxu0 %v1678_v20  ;;  %771 = vmatmul.bf16.gmra.mxu1 %v1696_v21 }
  0x52   :  { %861 = vmatmul.bf16.gmra.mxu2 %v1714_v22  ;;  %951 = vmatmul.bf16.gmra.mxu3 %v1732_v23 }
  0x61   :  { %686 = vmatmul.bf16.gmra.mxu0 %v1679_v24  ;;  %776 = vmatmul.bf16.gmra.mxu1 %v1697_v25 }
  0x62   :  { %866 = vmatmul.bf16.gmra.mxu2 %v1715_v26  ;;  %956 = vmatmul.bf16.gmra.mxu3 %v1733_v27 }
  0x71   :  { %691 = vmatmul.bf16.gmra.mxu0 %v1680_v28  ;;  %781 = vmatmul.bf16.gmra.mxu1 %v1698_v29 }
  0x72   :  { %871 = vmatmul.bf16.gmra.mxu2 %v1716_v30  ;;  %961 = vmatmul.bf16.gmra.mxu3 %v1734_v31 }
  0x81   :  { %696 = vmatmul.bf16.gmra.mxu0 %v1681_v32  ;;  %786 = vmatmul.bf16.gmra.mxu1 %v1699_v33 }
  0x82   :  { %876 = vmatmul.bf16.gmra.mxu2 %v1717_v34  ;;  %966 = vmatmul.bf16.gmra.mxu3 %v1735_v35 }
  0x91   :  { %701 = vmatmul.bf16.gmra.mxu0 %v1682_v36  ;;  %791 = vmatmul.bf16.gmra.mxu1 %v1700_v37  ;;  %v1685_v36 = vld [vmem:[%s2358_s0 + $0x50] sm:$0xff]  ;;  %v1703_v37 = vld [vmem:[%s2358_s0 + $0xe0] sm:$0xff] }
  0x92   :  { %881 = vmatmul.bf16.gmra.mxu2 %v1718_v38  ;;  %971 = vmatmul.bf16.gmra.mxu3 %v1736_v39 }
  0x9e   :  { %v667_v42 = vpop.f32.mrf.mxu0  ;;  %v757_v43 = vpop.f32.mrf.mxu1 }
  0x9f   :  { %v668_v47 = vadd.f32 %v2043_v46, %v667_v42  ;;  %v758_v48 = vadd.f32 %v2043_v46, %v757_v43  ;;  %v1721_v42 = vld [vmem:[%s2358_s0 + $0x170] sm:$0xff]  ;;  %v1739_v43 = vld [vmem:[%s2358_s0 + $0x200] sm:$0xff] }
  0xa1   :  { %706 = vmatmul.bf16.gmra.mxu0 %v1683_v40  ;;  %796 = vmatmul.bf16.gmra.mxu1 %v1701_v41  ;;  %v1027_v53 = vmax.f32 %v668_v47, 0.0  ;;  %v1063_v54 = vmax.f32 %v758_v48, 0.0 }
  0xa2   :  { %886 = vmatmul.bf16.gmra.mxu2 %v1719_v44  ;;  %976 = vmatmul.bf16.gmra.mxu3 %v1737_v45 }
  0xa3   :  { %v1171_v58 = vmax.f32 %v1027_v53, %v1063_v54 }
  0xa5   :  { %v847_v49 = vpop.f32.mrf.mxu2  ;;  %v937_v50 = vpop.f32.mrf.mxu3 }
  0xa6   :  { %v669_v51 = vpop.f32.mrf.mxu0  ;;  %v759_v52 = vpop.f32.mrf.mxu1  ;;  %v848_v55 = vadd.f32 %v2043_v46, %v847_v49  ;;  %v938_v60 = vadd.f32 %v2043_v46, %v937_v50 }
  0xa7   :  { %v670_v56 = vadd.f32 %v2043_v46, %v669_v51  ;;  %v760_v57 = vadd.f32 %v2043_v46, %v759_v52 }
  0xa8   :  { %v1099_v59 = vmax.f32 %v848_v55, 0.0  ;;  %v1135_v10 = vmax.f32 %v938_v60, 0.0 }
  0xa9   :  { %v1028_v61 = vmax.f32 %v670_v56, 0.0  ;;  %v1064_v62 = vmax.f32 %v760_v57, 0.0 }
  0xaa   :  { %v1172_v9 = vmax.f32 %v1171_v58, %v1099_v59 }
  0xab   :  { %v1174_v11 = vmax.f32 %v1028_v61, %v1064_v62 }
  0xac   :  { %v1173_v17 = vmax.f32 %v1172_v9, %v1135_v10  ;;  %v1704_v9 = vld [vmem:[%s2358_s0 + $0xe8] sm:$0xff] }
  0xad   :  { %v849_v63 = vpop.f32.mrf.mxu2  ;;  %v939_v0 = vpop.f32.mrf.mxu3 }
  0xae   :  { %v850_v3 = vadd.f32 %v2043_v46, %v849_v63  ;;  %v940_v4 = vadd.f32 %v2043_v46, %v939_v0  ;;  %v672_v5 = vpop.f32.mrf.mxu0  ;;  %v762_v6 = vpop.f32.mrf.mxu1 }
  0xaf   :  { %v673_v15 = vadd.f32 %v2043_v46, %v672_v5  ;;  %v763_v16 = vadd.f32 %v2043_v46, %v762_v6 }
  0xb0   :  { %v1100_v12 = vmax.f32 %v850_v3, 0.0  ;;  %v1136_v14 = vmax.f32 %v940_v4, 0.0 }
  0xb1   :  { %711 = vmatmul.bf16.gmra.mxu0 %v1684_v1  ;;  %801 = vmatmul.bf16.gmra.mxu1 %v1702_v2  ;;  %v1029_v24 = vmax.f32 %v673_v15, 0.0  ;;  %v1065_v25 = vmax.f32 %v763_v16, 0.0  ;;  %v1740_v15 = vld [vmem:[%s2358_s0 + $0x208] sm:$0xff] }
  0xb2   :  { %v1175_v13 = vmax.f32 %v1174_v11, %v1100_v12  ;;  %891 = vmatmul.bf16.gmra.mxu2 %v1720_v7  ;;  %981 = vmatmul.bf16.gmra.mxu3 %v1738_v8  ;;  %v1686_v8 = vld [vmem:[%s2358_s0 + $0x58] sm:$0xff] }
  0xb3   :  { %v1177_v29 = vmax.f32 %v1029_v24, %v1065_v25 }
  0xb4   :  { %v1176_v18 = vmax.f32 %v1175_v13, %v1136_v14  ;;  %v1722_v14 = vld [vmem:[%s2358_s0 + $0x178] sm:$0xff] }
  0xb5   :  { %v852_v19 = vpop.f32.mrf.mxu2  ;;  %v942_v20 = vpop.f32.mrf.mxu3 }
  0xb6   :  { %v1758_v21 = vpack.c.bf16 %v1176_v18, %v1173_v17  ;;  %v674_v22 = vpop.f32.mrf.mxu0  ;;  %v764_v23 = vpop.f32.mrf.mxu1  ;;  %v853_v26 = vadd.f32 %v2043_v46, %v852_v19  ;;  %v943_v31 = vadd.f32 %v2043_v46, %v942_v20 }
  0xb7   :  { %v675_v27 = vadd.f32 %v2043_v46, %v674_v22  ;;  %v765_v28 = vadd.f32 %v2043_v46, %v764_v23 }
  0xb8   :  { %1759 = vst [vmem:[%s2359_s3] sm:$0xff] %v1758_v21   ;;  %v1101_v30 = vmax.f32 %v853_v26, 0.0  ;;  %v1137_v45 = vmax.f32 %v943_v31, 0.0 }
  0xb9   :  { %v1030_v32 = vmax.f32 %v675_v27, 0.0  ;;  %v1066_v33 = vmax.f32 %v765_v28, 0.0 }
  0xba   :  { %v1178_v44 = vmax.f32 %v1177_v29, %v1101_v30 }
  0xbb   :  { %v1180_v47 = vmax.f32 %v1030_v32, %v1066_v33 }
  0xbc   :  { %v1179_v53 = vmax.f32 %v1178_v44, %v1137_v45  ;;  %v1705_v44 = vld [vmem:[%s2358_s0 + $0xf0] sm:$0xff] }
  0xbd   :  { %v854_v34 = vpop.f32.mrf.mxu2  ;;  %v944_v35 = vpop.f32.mrf.mxu3 }
  0xbe   :  { %v855_v38 = vadd.f32 %v2043_v46, %v854_v34  ;;  %v945_v39 = vadd.f32 %v2043_v46, %v944_v35  ;;  %v677_v40 = vpop.f32.mrf.mxu0  ;;  %v767_v41 = vpop.f32.mrf.mxu1 }
  0xbf   :  { %v678_v51 = vadd.f32 %v2043_v46, %v677_v40  ;;  %v768_v52 = vadd.f32 %v2043_v46, %v767_v41 }
  0xc0   :  { %v1102_v48 = vmax.f32 %v855_v38, 0.0  ;;  %v1138_v50 = vmax.f32 %v945_v39, 0.0 }
  0xc1   :  { %716 = vmatmul.bf16.gmra.mxu0 %v1685_v36  ;;  %806 = vmatmul.bf16.gmra.mxu1 %v1703_v37  ;;  %v1031_v60 = vmax.f32 %v678_v51, 0.0  ;;  %v1067_v61 = vmax.f32 %v768_v52, 0.0  ;;  %v1741_v51 = vld [vmem:[%s2358_s0 + $0x210] sm:$0xff] }
  0xc2   :  { %v1181_v49 = vmax.f32 %v1180_v47, %v1102_v48  ;;  %896 = vmatmul.bf16.gmra.mxu2 %v1721_v42  ;;  %986 = vmatmul.bf16.gmra.mxu3 %v1739_v43  ;;  %v1687_v43 = vld [vmem:[%s2358_s0 + $0x60] sm:$0xff] }
  0xc3   :  { %v1183_v1 = vmax.f32 %v1031_v60, %v1067_v61 }
  0xc4   :  { %v1182_v54 = vmax.f32 %v1181_v49, %v1138_v50  ;;  %v1723_v50 = vld [vmem:[%s2358_s0 + $0x180] sm:$0xff] }
  0xc5   :  { %v857_v55 = vpop.f32.mrf.mxu2  ;;  %v947_v56 = vpop.f32.mrf.mxu3 }
  0xc6   :  { %v1763_v57 = vpack.c.bf16 %v1182_v54, %v1179_v53  ;;  %v679_v58 = vpop.f32.mrf.mxu0  ;;  %v769_v59 = vpop.f32.mrf.mxu1  ;;  %v858_v62 = vadd.f32 %v2043_v46, %v857_v55  ;;  %v948_v3 = vadd.f32 %v2043_v46, %v947_v56 }
  0xc7   :  { %v680_v63 = vadd.f32 %v2043_v46, %v679_v58  ;;  %v770_v0 = vadd.f32 %v2043_v46, %v769_v59 }
  0xc8   :  { %1845 = vst [vmem:[%s2359_s3 + $0x8] sm:$0xff] %v1763_v57   ;;  %v1103_v2 = vmax.f32 %v858_v62, 0.0  ;;  %v1139_v17 = vmax.f32 %v948_v3, 0.0 }
  0xc9   :  { %v1032_v4 = vmax.f32 %v680_v63, 0.0  ;;  %v1068_v5 = vmax.f32 %v770_v0, 0.0 }
  0xca   :  { %v1184_v16 = vmax.f32 %v1183_v1, %v1103_v2 }
  0xcb   :  { %v1186_v18 = vmax.f32 %v1032_v4, %v1068_v5 }
  0xcc   :  { %v1185_v24 = vmax.f32 %v1184_v16, %v1139_v17  ;;  %v1706_v16 = vld [vmem:[%s2358_s0 + $0xf8] sm:$0xff] }
  0xcd   :  { %v859_v6 = vpop.f32.mrf.mxu2  ;;  %v949_v7 = vpop.f32.mrf.mxu3 }
  0xce   :  { %v860_v10 = vadd.f32 %v2043_v46, %v859_v6  ;;  %v950_v11 = vadd.f32 %v2043_v46, %v949_v7  ;;  %v682_v12 = vpop.f32.mrf.mxu0  ;;  %v772_v13 = vpop.f32.mrf.mxu1 }
  0xcf   :  { %v683_v22 = vadd.f32 %v2043_v46, %v682_v12  ;;  %v773_v23 = vadd.f32 %v2043_v46, %v772_v13 }
  0xd0   :  { %v1104_v19 = vmax.f32 %v860_v10, 0.0  ;;  %v1140_v21 = vmax.f32 %v950_v11, 0.0 }
  0xd1   :  { %721 = vmatmul.bf16.gmra.mxu0 %v1686_v8  ;;  %811 = vmatmul.bf16.gmra.mxu1 %v1704_v9  ;;  %v1033_v31 = vmax.f32 %v683_v22, 0.0  ;;  %v1069_v32 = vmax.f32 %v773_v23, 0.0  ;;  %v1742_v22 = vld [vmem:[%s2358_s0 + $0x218] sm:$0xff] }
  0xd2   :  { %v1187_v20 = vmax.f32 %v1186_v18, %v1104_v19  ;;  %901 = vmatmul.bf16.gmra.mxu2 %v1722_v14  ;;  %991 = vmatmul.bf16.gmra.mxu3 %v1740_v15  ;;  %v1688_v15 = vld [vmem:[%s2358_s0 + $0x68] sm:$0xff] }
  0xd3   :  { %v1189_v36 = vmax.f32 %v1033_v31, %v1069_v32 }
  0xd4   :  { %v1188_v25 = vmax.f32 %v1187_v20, %v1140_v21  ;;  %v1724_v21 = vld [vmem:[%s2358_s0 + $0x188] sm:$0xff] }
  0xd5   :  { %v862_v26 = vpop.f32.mrf.mxu2  ;;  %v952_v27 = vpop.f32.mrf.mxu3 }
  0xd6   :  { %v1768_v28 = vpack.c.bf16 %v1188_v25, %v1185_v24  ;;  %v684_v29 = vpop.f32.mrf.mxu0  ;;  %v774_v30 = vpop.f32.mrf.mxu1  ;;  %v863_v33 = vadd.f32 %v2043_v46, %v862_v26  ;;  %v953_v38 = vadd.f32 %v2043_v46, %v952_v27 }
  0xd7   :  { %v685_v34 = vadd.f32 %v2043_v46, %v684_v29  ;;  %v775_v35 = vadd.f32 %v2043_v46, %v774_v30 }
  0xd8   :  { %1846 = vst [vmem:[%s2359_s3 + $0x10] sm:$0xff] %v1768_v28   ;;  %v1105_v37 = vmax.f32 %v863_v33, 0.0  ;;  %v1141_v53 = vmax.f32 %v953_v38, 0.0 }
  0xd9   :  { %v1034_v39 = vmax.f32 %v685_v34, 0.0  ;;  %v1070_v40 = vmax.f32 %v775_v35, 0.0 }
  0xda   :  { %v1190_v52 = vmax.f32 %v1189_v36, %v1105_v37 }
  0xdb   :  { %v1192_v54 = vmax.f32 %v1034_v39, %v1070_v40 }
  0xdc   :  { %v1191_v60 = vmax.f32 %v1190_v52, %v1141_v53  ;;  %v1707_v52 = vld [vmem:[%s2358_s0 + $0x100] sm:$0xff] }
  0xdd   :  { %v864_v41 = vpop.f32.mrf.mxu2  ;;  %v954_v42 = vpop.f32.mrf.mxu3 }
  0xde   :  { %v865_v45 = vadd.f32 %v2043_v46, %v864_v41  ;;  %v955_v47 = vadd.f32 %v2043_v46, %v954_v42  ;;  %v687_v48 = vpop.f32.mrf.mxu0  ;;  %v777_v49 = vpop.f32.mrf.mxu1 }
  0xdf   :  { %v688_v58 = vadd.f32 %v2043_v46, %v687_v48  ;;  %v778_v59 = vadd.f32 %v2043_v46, %v777_v49 }
  0xe0   :  { %v1106_v55 = vmax.f32 %v865_v45, 0.0  ;;  %v1142_v57 = vmax.f32 %v955_v47, 0.0 }
  0xe1   :  { %726 = vmatmul.bf16.gmra.mxu0 %v1687_v43  ;;  %816 = vmatmul.bf16.gmra.mxu1 %v1705_v44  ;;  %v1035_v3 = vmax.f32 %v688_v58, 0.0  ;;  %v1071_v4 = vmax.f32 %v778_v59, 0.0  ;;  %v1743_v58 = vld [vmem:[%s2358_s0 + $0x220] sm:$0xff] }
  0xe2   :  { %v1193_v56 = vmax.f32 %v1192_v54, %v1106_v55  ;;  %906 = vmatmul.bf16.gmra.mxu2 %v1723_v50  ;;  %996 = vmatmul.bf16.gmra.mxu3 %v1741_v51  ;;  %v1689_v51 = vld [vmem:[%s2358_s0 + $0x70] sm:$0xff] }
  0xe3   :  { %v1195_v8 = vmax.f32 %v1035_v3, %v1071_v4 }
  0xe4   :  { %v1194_v61 = vmax.f32 %v1193_v56, %v1142_v57  ;;  %v1725_v57 = vld [vmem:[%s2358_s0 + $0x190] sm:$0xff] }
  0xe5   :  { %v867_v62 = vpop.f32.mrf.mxu2  ;;  %v957_v63 = vpop.f32.mrf.mxu3 }
  0xe6   :  { %v1773_v0 = vpack.c.bf16 %v1194_v61, %v1191_v60  ;;  %v689_v1 = vpop.f32.mrf.mxu0  ;;  %v779_v2 = vpop.f32.mrf.mxu1  ;;  %v868_v5 = vadd.f32 %v2043_v46, %v867_v62  ;;  %v958_v10 = vadd.f32 %v2043_v46, %v957_v63 }
  0xe7   :  { %v690_v6 = vadd.f32 %v2043_v46, %v689_v1  ;;  %v780_v7 = vadd.f32 %v2043_v46, %v779_v2 }
  0xe8   :  { %1847 = vst [vmem:[%s2359_s3 + $0x18] sm:$0xff] %v1773_v0   ;;  %v1107_v9 = vmax.f32 %v868_v5, 0.0  ;;  %v1143_v24 = vmax.f32 %v958_v10, 0.0 }
  0xe9   :  { %v1036_v11 = vmax.f32 %v690_v6, 0.0  ;;  %v1072_v12 = vmax.f32 %v780_v7, 0.0 }
  0xea   :  { %v1196_v23 = vmax.f32 %v1195_v8, %v1107_v9 }
  0xeb   :  { %v1198_v25 = vmax.f32 %v1036_v11, %v1072_v12 }
  0xec   :  { %v1197_v31 = vmax.f32 %v1196_v23, %v1143_v24  ;;  %v1708_v23 = vld [vmem:[%s2358_s0 + $0x108] sm:$0xff] }
  0xed   :  { %v869_v13 = vpop.f32.mrf.mxu2  ;;  %v959_v14 = vpop.f32.mrf.mxu3 }
  0xee   :  { %v870_v17 = vadd.f32 %v2043_v46, %v869_v13  ;;  %v960_v18 = vadd.f32 %v2043_v46, %v959_v14  ;;  %v692_v19 = vpop.f32.mrf.mxu0  ;;  %v782_v20 = vpop.f32.mrf.mxu1 }
  0xef   :  { %v693_v29 = vadd.f32 %v2043_v46, %v692_v19  ;;  %v783_v30 = vadd.f32 %v2043_v46, %v782_v20 }
  0xf0   :  { %v1108_v26 = vmax.f32 %v870_v17, 0.0  ;;  %v1144_v28 = vmax.f32 %v960_v18, 0.0 }
  0xf1   :  { %731 = vmatmul.bf16.gmra.mxu0 %v1688_v15  ;;  %821 = vmatmul.bf16.gmra.mxu1 %v1706_v16  ;;  %v1037_v38 = vmax.f32 %v693_v29, 0.0  ;;  %v1073_v39 = vmax.f32 %v783_v30, 0.0  ;;  %v1744_v29 = vld [vmem:[%s2358_s0 + $0x228] sm:$0xff] }
  0xf2   :  { %v1199_v27 = vmax.f32 %v1198_v25, %v1108_v26  ;;  %911 = vmatmul.bf16.gmra.mxu2 %v1724_v21  ;;  %1001 = vmatmul.bf16.gmra.mxu3 %v1742_v22  ;;  %v1690_v22 = vld [vmem:[%s2358_s0 + $0x78] sm:$0xff] }
  0xf3   :  { %v1201_v43 = vmax.f32 %v1037_v38, %v1073_v39 }
  0xf4   :  { %v1200_v32 = vmax.f32 %v1199_v27, %v1144_v28  ;;  %v1726_v28 = vld [vmem:[%s2358_s0 + $0x198] sm:$0xff] }
  0xf5   :  { %v872_v33 = vpop.f32.mrf.mxu2  ;;  %v962_v34 = vpop.f32.mrf.mxu3 }
  0xf6   :  { %v1778_v35 = vpack.c.bf16 %v1200_v32, %v1197_v31  ;;  %v694_v36 = vpop.f32.mrf.mxu0  ;;  %v784_v37 = vpop.f32.mrf.mxu1  ;;  %v873_v40 = vadd.f32 %v2043_v46, %v872_v33  ;;  %v963_v45 = vadd.f32 %v2043_v46, %v962_v34 }
  0xf7   :  { %v695_v41 = vadd.f32 %v2043_v46, %v694_v36  ;;  %v785_v42 = vadd.f32 %v2043_v46, %v784_v37 }
  0xf8   :  { %1848 = vst [vmem:[%s2359_s3 + $0x20] sm:$0xff] %v1778_v35   ;;  %v1109_v44 = vmax.f32 %v873_v40, 0.0  ;;  %v1145_v60 = vmax.f32 %v963_v45, 0.0 }
  0xf9   :  { %v1038_v47 = vmax.f32 %v695_v41, 0.0  ;;  %v1074_v48 = vmax.f32 %v785_v42, 0.0 }
  0xfa   :  { %v1202_v59 = vmax.f32 %v1201_v43, %v1109_v44 }
  0xfb   :  { %v1204_v61 = vmax.f32 %v1038_v47, %v1074_v48 }
  0xfc   :  { %v1203_v3 = vmax.f32 %v1202_v59, %v1145_v60  ;;  %v1709_v59 = vld [vmem:[%s2358_s0 + $0x110] sm:$0xff] }
  0xfd   :  { %v874_v49 = vpop.f32.mrf.mxu2  ;;  %v964_v50 = vpop.f32.mrf.mxu3 }
  0xfe   :  { %v875_v53 = vadd.f32 %v2043_v46, %v874_v49  ;;  %v965_v54 = vadd.f32 %v2043_v46, %v964_v50  ;;  %v697_v55 = vpop.f32.mrf.mxu0  ;;  %v787_v56 = vpop.f32.mrf.mxu1 }
  0xff   :  { %v698_v1 = vadd.f32 %v2043_v46, %v697_v55  ;;  %v788_v2 = vadd.f32 %v2043_v46, %v787_v56 }
 0x100   :  { %v1110_v62 = vmax.f32 %v875_v53, 0.0  ;;  %v1146_v0 = vmax.f32 %v965_v54, 0.0 }
 0x101   :  { %736 = vmatmul.bf16.gmra.mxu0 %v1689_v51  ;;  %826 = vmatmul.bf16.gmra.mxu1 %v1707_v52  ;;  %v1039_v10 = vmax.f32 %v698_v1, 0.0  ;;  %v1075_v11 = vmax.f32 %v788_v2, 0.0  ;;  %v1745_v1 = vld [vmem:[%s2358_s0 + $0x230] sm:$0xff] }
 0x102   :  { %v1205_v63 = vmax.f32 %v1204_v61, %v1110_v62  ;;  %916 = vmatmul.bf16.gmra.mxu2 %v1725_v57  ;;  %1006 = vmatmul.bf16.gmra.mxu3 %v1743_v58  ;;  %v1691_v58 = vld [vmem:[%s2358_s0 + $0x80] sm:$0xff] }
 0x103   :  { %v1207_v15 = vmax.f32 %v1039_v10, %v1075_v11 }
 0x104   :  { %v1206_v4 = vmax.f32 %v1205_v63, %v1146_v0  ;;  %v1727_v0 = vld [vmem:[%s2358_s0 + $0x1a0] sm:$0xff] }
 0x105   :  { %v877_v5 = vpop.f32.mrf.mxu2  ;;  %v967_v6 = vpop.f32.mrf.mxu3 }
 0x106   :  { %v1783_v7 = vpack.c.bf16 %v1206_v4, %v1203_v3  ;;  %v699_v8 = vpop.f32.mrf.mxu0  ;;  %v789_v9 = vpop.f32.mrf.mxu1  ;;  %v878_v12 = vadd.f32 %v2043_v46, %v877_v5  ;;  %v968_v17 = vadd.f32 %v2043_v46, %v967_v6 }
 0x107   :  { %v700_v13 = vadd.f32 %v2043_v46, %v699_v8  ;;  %v790_v14 = vadd.f32 %v2043_v46, %v789_v9 }
 0x108   :  { %1849 = vst [vmem:[%s2359_s3 + $0x28] sm:$0xff] %v1783_v7   ;;  %v1111_v16 = vmax.f32 %v878_v12, 0.0  ;;  %v1147_v31 = vmax.f32 %v968_v17, 0.0 }
 0x109   :  { %v1040_v18 = vmax.f32 %v700_v13, 0.0  ;;  %v1076_v19 = vmax.f32 %v790_v14, 0.0 }
 0x10a   :  { %v1208_v30 = vmax.f32 %v1207_v15, %v1111_v16 }
 0x10b   :  { %v1210_v32 = vmax.f32 %v1040_v18, %v1076_v19 }
 0x10c   :  { %v1209_v38 = vmax.f32 %v1208_v30, %v1147_v31  ;;  %v1710_v30 = vld [vmem:[%s2358_s0 + $0x118] sm:$0xff] }
 0x10d   :  { %v879_v20 = vpop.f32.mrf.mxu2  ;;  %v969_v21 = vpop.f32.mrf.mxu3 }
 0x10e   :  { %v880_v24 = vadd.f32 %v2043_v46, %v879_v20  ;;  %v970_v25 = vadd.f32 %v2043_v46, %v969_v21  ;;  %v702_v26 = vpop.f32.mrf.mxu0  ;;  %v792_v27 = vpop.f32.mrf.mxu1 }
 0x10f   :  { %v703_v36 = vadd.f32 %v2043_v46, %v702_v26  ;;  %v793_v37 = vadd.f32 %v2043_v46, %v792_v27 }
 0x110   :  { %v1112_v33 = vmax.f32 %v880_v24, 0.0  ;;  %v1148_v35 = vmax.f32 %v970_v25, 0.0 }
 0x111   :  { %741 = vmatmul.bf16.gmra.mxu0 %v1690_v22  ;;  %831 = vmatmul.bf16.gmra.mxu1 %v1708_v23  ;;  %v1041_v45 = vmax.f32 %v703_v36, 0.0  ;;  %v1077_v47 = vmax.f32 %v793_v37, 0.0  ;;  %v1746_v36 = vld [vmem:[%s2358_s0 + $0x238] sm:$0xff] }
 0x112   :  { %v1211_v34 = vmax.f32 %v1210_v32, %v1112_v33  ;;  %921 = vmatmul.bf16.gmra.mxu2 %v1726_v28  ;;  %1011 = vmatmul.bf16.gmra.mxu3 %v1744_v29  ;;  %v1692_v29 = vld [vmem:[%s2358_s0 + $0x88] sm:$0xff] }
 0x113   :  { %v1213_v51 = vmax.f32 %v1041_v45, %v1077_v47 }
 0x114   :  { %v1212_v39 = vmax.f32 %v1211_v34, %v1148_v35  ;;  %v1728_v35 = vld [vmem:[%s2358_s0 + $0x1a8] sm:$0xff] }
 0x115   :  { %v882_v40 = vpop.f32.mrf.mxu2  ;;  %v972_v41 = vpop.f32.mrf.mxu3 }
 0x116   :  { %v1788_v42 = vpack.c.bf16 %v1212_v39, %v1209_v38  ;;  %v704_v43 = vpop.f32.mrf.mxu0  ;;  %v794_v44 = vpop.f32.mrf.mxu1  ;;  %v883_v48 = vadd.f32 %v2043_v46, %v882_v40  ;;  %v973_v53 = vadd.f32 %v2043_v46, %v972_v41 }
 0x117   :  { %v705_v49 = vadd.f32 %v2043_v46, %v704_v43  ;;  %v795_v50 = vadd.f32 %v2043_v46, %v794_v44 }
 0x118   :  { %1850 = vst [vmem:[%s2359_s3 + $0x30] sm:$0xff] %v1788_v42   ;;  %v1113_v52 = vmax.f32 %v883_v48, 0.0  ;;  %v1149_v3 = vmax.f32 %v973_v53, 0.0 }
 0x119   :  { %v1042_v54 = vmax.f32 %v705_v49, 0.0  ;;  %v1078_v55 = vmax.f32 %v795_v50, 0.0 }
 0x11a   :  { %v1214_v2 = vmax.f32 %v1213_v51, %v1113_v52 }
 0x11b   :  { %v1216_v4 = vmax.f32 %v1042_v54, %v1078_v55 }
 0x11c   :  { %v1215_v10 = vmax.f32 %v1214_v2, %v1149_v3 }
 0x11d   :  { %v884_v56 = vpop.f32.mrf.mxu2  ;;  %v974_v57 = vpop.f32.mrf.mxu3 }
 0x11e   :  { %v885_v60 = vadd.f32 %v2043_v46, %v884_v56  ;;  %v975_v61 = vadd.f32 %v2043_v46, %v974_v57  ;;  %v707_v62 = vpop.f32.mrf.mxu0  ;;  %v797_v63 = vpop.f32.mrf.mxu1 }
 0x11f   :  { %v708_v8 = vadd.f32 %v2043_v46, %v707_v62  ;;  %v798_v9 = vadd.f32 %v2043_v46, %v797_v63 }
 0x120   :  { %v1114_v5 = vmax.f32 %v885_v60, 0.0  ;;  %v1150_v7 = vmax.f32 %v975_v61, 0.0 }
 0x121   :  { %746 = vmatmul.bf16.gmra.mxu0 %v1691_v58  ;;  %836 = vmatmul.bf16.gmra.mxu1 %v1709_v59  ;;  %v1043_v17 = vmax.f32 %v708_v8, 0.0  ;;  %v1079_v18 = vmax.f32 %v798_v9, 0.0 }
 0x122   :  { %v1217_v6 = vmax.f32 %v1216_v4, %v1114_v5  ;;  %926 = vmatmul.bf16.gmra.mxu2 %v1727_v0  ;;  %1016 = vmatmul.bf16.gmra.mxu3 %v1745_v1 }
 0x123   :  { %v1219_v22 = vmax.f32 %v1043_v17, %v1079_v18 }
 0x124   :  { %v1218_v11 = vmax.f32 %v1217_v6, %v1150_v7 }
 0x125   :  { %v887_v12 = vpop.f32.mrf.mxu2  ;;  %v977_v13 = vpop.f32.mrf.mxu3 }
 0x126   :  { %v1793_v14 = vpack.c.bf16 %v1218_v11, %v1215_v10  ;;  %v709_v15 = vpop.f32.mrf.mxu0  ;;  %v799_v16 = vpop.f32.mrf.mxu1  ;;  %v888_v19 = vadd.f32 %v2043_v46, %v887_v12  ;;  %v978_v24 = vadd.f32 %v2043_v46, %v977_v13 }
 0x127   :  { %v710_v20 = vadd.f32 %v2043_v46, %v709_v15  ;;  %v800_v21 = vadd.f32 %v2043_v46, %v799_v16 }
 0x128   :  { %1851 = vst [vmem:[%s2359_s3 + $0x38] sm:$0xff] %v1793_v14   ;;  %v1115_v23 = vmax.f32 %v888_v19, 0.0  ;;  %v1151_v38 = vmax.f32 %v978_v24, 0.0 }
 0x129   :  { %v1044_v25 = vmax.f32 %v710_v20, 0.0  ;;  %v1080_v26 = vmax.f32 %v800_v21, 0.0 }
 0x12a   :  { %v1220_v37 = vmax.f32 %v1219_v22, %v1115_v23 }
 0x12b   :  { %v1222_v39 = vmax.f32 %v1044_v25, %v1080_v26 }
 0x12c   :  { %v1221_v45 = vmax.f32 %v1220_v37, %v1151_v38 }
 0x12d   :  { %v889_v27 = vpop.f32.mrf.mxu2  ;;  %v979_v28 = vpop.f32.mrf.mxu3 }
 0x12e   :  { %v890_v31 = vadd.f32 %v2043_v46, %v889_v27  ;;  %v980_v32 = vadd.f32 %v2043_v46, %v979_v28  ;;  %v712_v33 = vpop.f32.mrf.mxu0  ;;  %v802_v34 = vpop.f32.mrf.mxu1 }
 0x12f   :  { %v713_v43 = vadd.f32 %v2043_v46, %v712_v33  ;;  %v803_v44 = vadd.f32 %v2043_v46, %v802_v34 }
 0x130   :  { %v1116_v40 = vmax.f32 %v890_v31, 0.0  ;;  %v1152_v42 = vmax.f32 %v980_v32, 0.0 }
 0x131   :  { %751 = vmatmul.bf16.gmra.mxu0 %v1692_v29  ;;  %841 = vmatmul.bf16.gmra.mxu1 %v1710_v30  ;;  %v1045_v53 = vmax.f32 %v713_v43, 0.0  ;;  %v1081_v54 = vmax.f32 %v803_v44, 0.0 }
 0x132   :  { %v1223_v41 = vmax.f32 %v1222_v39, %v1116_v40  ;;  %931 = vmatmul.bf16.gmra.mxu2 %v1728_v35  ;;  %1021 = vmatmul.bf16.gmra.mxu3 %v1746_v36 }
 0x133   :  { %v1225_v58 = vmax.f32 %v1045_v53, %v1081_v54 }
 0x134   :  { %v1224_v47 = vmax.f32 %v1223_v41, %v1152_v42 }
 0x135   :  { %v892_v48 = vpop.f32.mrf.mxu2  ;;  %v982_v49 = vpop.f32.mrf.mxu3 }
 0x136   :  { %v1798_v50 = vpack.c.bf16 %v1224_v47, %v1221_v45  ;;  %v714_v51 = vpop.f32.mrf.mxu0  ;;  %v804_v52 = vpop.f32.mrf.mxu1  ;;  %v893_v55 = vadd.f32 %v2043_v46, %v892_v48  ;;  %v983_v60 = vadd.f32 %v2043_v46, %v982_v49 }
 0x137   :  { %v715_v56 = vadd.f32 %v2043_v46, %v714_v51  ;;  %v805_v57 = vadd.f32 %v2043_v46, %v804_v52 }
 0x138   :  { %1852 = vst [vmem:[%s2359_s3 + $0x40] sm:$0xff] %v1798_v50   ;;  %v1117_v59 = vmax.f32 %v893_v55, 0.0  ;;  %v1153_v6 = vmax.f32 %v983_v60, 0.0 }
 0x139   :  { %v1046_v61 = vmax.f32 %v715_v56, 0.0  ;;  %v1082_v62 = vmax.f32 %v805_v57, 0.0 }
 0x13a   :  { %v1226_v5 = vmax.f32 %v1225_v58, %v1117_v59 }
 0x13b   :  { %v1228_v7 = vmax.f32 %v1046_v61, %v1082_v62 }
 0x13c   :  { %v1227_v13 = vmax.f32 %v1226_v5, %v1153_v6 }
 0x13d   :  { %v894_v63 = vpop.f32.mrf.mxu2  ;;  %v984_v0 = vpop.f32.mrf.mxu3 }
 0x13e   :  { %v895_v1 = vadd.f32 %v2043_v46, %v894_v63  ;;  %v985_v2 = vadd.f32 %v2043_v46, %v984_v0  ;;  %v717_v3 = vpop.f32.mrf.mxu0  ;;  %v807_v4 = vpop.f32.mrf.mxu1 }
 0x13f   :  { %v718_v11 = vadd.f32 %v2043_v46, %v717_v3  ;;  %v808_v12 = vadd.f32 %v2043_v46, %v807_v4 }
 0x140   :  { %v1118_v8 = vmax.f32 %v895_v1, 0.0  ;;  %v1154_v10 = vmax.f32 %v985_v2, 0.0 }
 0x141   :  { %v1047_v20 = vmax.f32 %v718_v11, 0.0  ;;  %v1083_v21 = vmax.f32 %v808_v12, 0.0 }
 0x142   :  { %v1229_v9 = vmax.f32 %v1228_v7, %v1118_v8 }
 0x143   :  { %v1231_v25 = vmax.f32 %v1047_v20, %v1083_v21 }
 0x144   :  { %v1230_v14 = vmax.f32 %v1229_v9, %v1154_v10 }
 0x145   :  { %v897_v15 = vpop.f32.mrf.mxu2  ;;  %v987_v16 = vpop.f32.mrf.mxu3 }
 0x146   :  { %v1803_v17 = vpack.c.bf16 %v1230_v14, %v1227_v13  ;;  %v719_v18 = vpop.f32.mrf.mxu0  ;;  %v809_v19 = vpop.f32.mrf.mxu1  ;;  %v898_v22 = vadd.f32 %v2043_v46, %v897_v15  ;;  %v988_v27 = vadd.f32 %v2043_v46, %v987_v16 }
 0x147   :  { %v720_v23 = vadd.f32 %v2043_v46, %v719_v18  ;;  %v810_v24 = vadd.f32 %v2043_v46, %v809_v19 }
 0x148   :  { %1853 = vst [vmem:[%s2359_s3 + $0x48] sm:$0xff] %v1803_v17   ;;  %v1119_v26 = vmax.f32 %v898_v22, 0.0  ;;  %v1155_v37 = vmax.f32 %v988_v27, 0.0 }
 0x149   :  { %v1048_v28 = vmax.f32 %v720_v23, 0.0  ;;  %v1084_v29 = vmax.f32 %v810_v24, 0.0 }
 0x14a   :  { %v1232_v36 = vmax.f32 %v1231_v25, %v1119_v26 }
 0x14b   :  { %v1234_v38 = vmax.f32 %v1048_v28, %v1084_v29 }
 0x14c   :  { %v1233_v44 = vmax.f32 %v1232_v36, %v1155_v37 }
 0x14d   :  { %v899_v30 = vpop.f32.mrf.mxu2  ;;  %v989_v31 = vpop.f32.mrf.mxu3 }
 0x14e   :  { %v900_v32 = vadd.f32 %v2043_v46, %v899_v30  ;;  %v990_v33 = vadd.f32 %v2043_v46, %v989_v31  ;;  %v722_v34 = vpop.f32.mrf.mxu0  ;;  %v812_v35 = vpop.f32.mrf.mxu1 }
 0x14f   :  { %v723_v42 = vadd.f32 %v2043_v46, %v722_v34  ;;  %v813_v43 = vadd.f32 %v2043_v46, %v812_v35 }
 0x150   :  { %v1120_v39 = vmax.f32 %v900_v32, 0.0  ;;  %v1156_v41 = vmax.f32 %v990_v33, 0.0 }
 0x151   :  { %v1049_v52 = vmax.f32 %v723_v42, 0.0  ;;  %v1085_v53 = vmax.f32 %v813_v43, 0.0 }
 0x152   :  { %v1235_v40 = vmax.f32 %v1234_v38, %v1120_v39 }
 0x153   :  { %v1237_v57 = vmax.f32 %v1049_v52, %v1085_v53 }
 0x154   :  { %v1236_v45 = vmax.f32 %v1235_v40, %v1156_v41 }
 0x155   :  { %v902_v47 = vpop.f32.mrf.mxu2  ;;  %v992_v48 = vpop.f32.mrf.mxu3 }
 0x156   :  { %v1808_v49 = vpack.c.bf16 %v1236_v45, %v1233_v44  ;;  %v724_v50 = vpop.f32.mrf.mxu0  ;;  %v814_v51 = vpop.f32.mrf.mxu1  ;;  %v903_v54 = vadd.f32 %v2043_v46, %v902_v47  ;;  %v993_v59 = vadd.f32 %v2043_v46, %v992_v48 }
 0x157   :  { %v725_v55 = vadd.f32 %v2043_v46, %v724_v50  ;;  %v815_v56 = vadd.f32 %v2043_v46, %v814_v51 }
 0x158   :  { %1854 = vst [vmem:[%s2359_s3 + $0x50] sm:$0xff] %v1808_v49   ;;  %v1121_v58 = vmax.f32 %v903_v54, 0.0  ;;  %v1157_v5 = vmax.f32 %v993_v59, 0.0 }
 0x159   :  { %v1050_v60 = vmax.f32 %v725_v55, 0.0  ;;  %v1086_v61 = vmax.f32 %v815_v56, 0.0 }
 0x15a   :  { %v1238_v4 = vmax.f32 %v1237_v57, %v1121_v58 }
 0x15b   :  { %v1240_v6 = vmax.f32 %v1050_v60, %v1086_v61 }
 0x15c   :  { %v1239_v12 = vmax.f32 %v1238_v4, %v1157_v5 }
 0x15d   :  { %v904_v62 = vpop.f32.mrf.mxu2  ;;  %v994_v63 = vpop.f32.mrf.mxu3 }
 0x15e   :  { %v905_v0 = vadd.f32 %v2043_v46, %v904_v62  ;;  %v995_v1 = vadd.f32 %v2043_v46, %v994_v63  ;;  %v727_v2 = vpop.f32.mrf.mxu0  ;;  %v817_v3 = vpop.f32.mrf.mxu1  ;;  %v2305_v63 = vld [vmem:[%s2357_s2] ss:$0 sm:$0xff] }
 0x15f   :  { %v728_v10 = vadd.f32 %v2043_v46, %v727_v2  ;;  %v818_v11 = vadd.f32 %v2043_v46, %v817_v3 }
 0x160   :  { %v1122_v7 = vmax.f32 %v905_v0, 0.0  ;;  %v1158_v9 = vmax.f32 %v995_v1, 0.0 }
 0x161   :  { %v1051_v19 = vmax.f32 %v728_v10, 0.0  ;;  %v1087_v20 = vmax.f32 %v818_v11, 0.0 }
 0x162   :  { %v1241_v8 = vmax.f32 %v1240_v6, %v1122_v7 }
 0x163   :  { %v1243_v24 = vmax.f32 %v1051_v19, %v1087_v20 }
 0x164   :  { %v1242_v13 = vmax.f32 %v1241_v8, %v1158_v9 }
 0x165   :  { %v907_v14 = vpop.f32.mrf.mxu2  ;;  %v997_v15 = vpop.f32.mrf.mxu3 }
 0x166   :  { %v1813_v16 = vpack.c.bf16 %v1242_v13, %v1239_v12  ;;  %v729_v17 = vpop.f32.mrf.mxu0  ;;  %v819_v18 = vpop.f32.mrf.mxu1  ;;  %v908_v21 = vadd.f32 %v2043_v46, %v907_v14  ;;  %v998_v26 = vadd.f32 %v2043_v46, %v997_v15 }
 0x167   :  { %v730_v22 = vadd.f32 %v2043_v46, %v729_v17  ;;  %v820_v23 = vadd.f32 %v2043_v46, %v819_v18 }
 0x168   :  { %1855 = vst [vmem:[%s2359_s3 + $0x58] sm:$0xff] %v1813_v16   ;;  %v1123_v25 = vmax.f32 %v908_v21, 0.0  ;;  %v1159_v36 = vmax.f32 %v998_v26, 0.0 }
 0x169   :  { %v1052_v27 = vmax.f32 %v730_v22, 0.0  ;;  %v1088_v28 = vmax.f32 %v820_v23, 0.0 }
 0x16a   :  { %v1244_v35 = vmax.f32 %v1243_v24, %v1123_v25 }
 0x16b   :  { %v1246_v37 = vmax.f32 %v1052_v27, %v1088_v28 }
 0x16c   :  { %v1245_v43 = vmax.f32 %v1244_v35, %v1159_v36 }
 0x16d   :  { %v909_v29 = vpop.f32.mrf.mxu2  ;;  %v999_v30 = vpop.f32.mrf.mxu3 }
 0x16e   :  { %v910_v31 = vadd.f32 %v2043_v46, %v909_v29  ;;  %v1000_v32 = vadd.f32 %v2043_v46, %v999_v30  ;;  %v732_v33 = vpop.f32.mrf.mxu0  ;;  %v822_v34 = vpop.f32.mrf.mxu1 }
 0x16f   :  { %v733_v41 = vadd.f32 %v2043_v46, %v732_v33  ;;  %v823_v42 = vadd.f32 %v2043_v46, %v822_v34 }
 0x170   :  { %v1124_v38 = vmax.f32 %v910_v31, 0.0  ;;  %v1160_v40 = vmax.f32 %v1000_v32, 0.0 }
 0x171   :  { %v1053_v51 = vmax.f32 %v733_v41, 0.0  ;;  %v1089_v52 = vmax.f32 %v823_v42, 0.0 }
 0x172   :  { %v1247_v39 = vmax.f32 %v1246_v37, %v1124_v38 }
 0x173   :  { %v1249_v56 = vmax.f32 %v1053_v51, %v1089_v52 }
 0x174   :  { %v1248_v44 = vmax.f32 %v1247_v39, %v1160_v40 }
 0x175   :  { %v912_v45 = vpop.f32.mrf.mxu2  ;;  %v1002_v47 = vpop.f32.mrf.mxu3 }
 0x176   :  { %v1818_v48 = vpack.c.bf16 %v1248_v44, %v1245_v43  ;;  %v734_v49 = vpop.f32.mrf.mxu0  ;;  %v824_v50 = vpop.f32.mrf.mxu1  ;;  %v913_v53 = vadd.f32 %v2043_v46, %v912_v45  ;;  %v1003_v58 = vadd.f32 %v2043_v46, %v1002_v47 }
 0x177   :  { %v735_v54 = vadd.f32 %v2043_v46, %v734_v49  ;;  %v825_v55 = vadd.f32 %v2043_v46, %v824_v50 }
 0x178   :  { %1856 = vst [vmem:[%s2359_s3 + $0x60] sm:$0xff] %v1818_v48   ;;  %v1125_v57 = vmax.f32 %v913_v53, 0.0  ;;  %v1161_v5 = vmax.f32 %v1003_v58, 0.0 }
 0x179   :  { %v1054_v59 = vmax.f32 %v735_v54, 0.0  ;;  %v1090_v60 = vmax.f32 %v825_v55, 0.0 }
 0x17a   :  { %v1250_v4 = vmax.f32 %v1249_v56, %v1125_v57 }
 0x17b   :  { %v1252_v6 = vmax.f32 %v1054_v59, %v1090_v60 }
 0x17c   :  { %v1251_v11 = vmax.f32 %v1250_v4, %v1161_v5 }
 0x17d   :  { %v914_v61 = vpop.f32.mrf.mxu2  ;;  %v1004_v62 = vpop.f32.mrf.mxu3 }
 0x17e   :  { %v915_v0 = vadd.f32 %v2305_v63, %v914_v61  ;;  %v1005_v1 = vadd.f32 %v2305_v63, %v1004_v62  ;;  %v737_v2 = vpop.f32.mrf.mxu0  ;;  %v827_v3 = vpop.f32.mrf.mxu1 }
 0x17f   :  { %v738_v9 = vadd.f32 %v2305_v63, %v737_v2  ;;  %v828_v10 = vadd.f32 %v2305_v63, %v827_v3 }
 0x180   :  { %v1126_v7 = vmax.f32 %v915_v0, 0.0  ;;  %v1162_v8 = vmax.f32 %v1005_v1, 0.0 }
 0x181   :  { %v1055_v18 = vmax.f32 %v738_v9, 0.0  ;;  %v1091_v19 = vmax.f32 %v828_v10, 0.0 }
 0x182   :  { %v1253_v46 = vmax.f32 %v1252_v6, %v1126_v7 }
 0x183   :  { %v1255_v23 = vmax.f32 %v1055_v18, %v1091_v19 }
 0x184   :  { %v1254_v12 = vmax.f32 %v1253_v46, %v1162_v8 }
 0x185   :  { %v917_v13 = vpop.f32.mrf.mxu2  ;;  %v1007_v14 = vpop.f32.mrf.mxu3 }
 0x186   :  { %v1823_v15 = vpack.c.bf16 %v1254_v12, %v1251_v11  ;;  %v739_v16 = vpop.f32.mrf.mxu0  ;;  %v829_v17 = vpop.f32.mrf.mxu1  ;;  %v918_v20 = vadd.f32 %v2305_v63, %v917_v13  ;;  %v1008_v25 = vadd.f32 %v2305_v63, %v1007_v14 }
 0x187   :  { %v740_v21 = vadd.f32 %v2305_v63, %v739_v16  ;;  %v830_v22 = vadd.f32 %v2305_v63, %v829_v17 }
 0x188   :  { %1857 = vst [vmem:[%s2359_s3 + $0x68] sm:$0xff] %v1823_v15   ;;  %v1127_v24 = vmax.f32 %v918_v20, 0.0  ;;  %v1163_v35 = vmax.f32 %v1008_v25, 0.0 }
 0x189   :  { %v1056_v26 = vmax.f32 %v740_v21, 0.0  ;;  %v1092_v27 = vmax.f32 %v830_v22, 0.0 }
 0x18a   :  { %v1256_v34 = vmax.f32 %v1255_v23, %v1127_v24 }
 0x18b   :  { %v1258_v36 = vmax.f32 %v1056_v26, %v1092_v27 }
 0x18c   :  { %v1257_v42 = vmax.f32 %v1256_v34, %v1163_v35 }
 0x18d   :  { %v919_v28 = vpop.f32.mrf.mxu2  ;;  %v1009_v29 = vpop.f32.mrf.mxu3 }
 0x18e   :  { %v920_v30 = vadd.f32 %v2305_v63, %v919_v28  ;;  %v1010_v31 = vadd.f32 %v2305_v63, %v1009_v29  ;;  %v742_v32 = vpop.f32.mrf.mxu0  ;;  %v832_v33 = vpop.f32.mrf.mxu1 }
 0x18f   :  { %v743_v40 = vadd.f32 %v2305_v63, %v742_v32  ;;  %v833_v41 = vadd.f32 %v2305_v63, %v832_v33 }
 0x190   :  { %v1128_v37 = vmax.f32 %v920_v30, 0.0  ;;  %v1164_v39 = vmax.f32 %v1010_v31, 0.0 }
 0x191   :  { %v1057_v50 = vmax.f32 %v743_v40, 0.0  ;;  %v1093_v51 = vmax.f32 %v833_v41, 0.0 }
 0x192   :  { %v1259_v38 = vmax.f32 %v1258_v36, %v1128_v37 }
 0x193   :  { %v1261_v55 = vmax.f32 %v1057_v50, %v1093_v51 }
 0x194   :  { %v1260_v43 = vmax.f32 %v1259_v38, %v1164_v39 }
 0x195   :  { %v922_v44 = vpop.f32.mrf.mxu2  ;;  %v1012_v45 = vpop.f32.mrf.mxu3 }
 0x196   :  { %v1828_v47 = vpack.c.bf16 %v1260_v43, %v1257_v42  ;;  %v744_v48 = vpop.f32.mrf.mxu0  ;;  %v834_v49 = vpop.f32.mrf.mxu1  ;;  %v923_v52 = vadd.f32 %v2305_v63, %v922_v44  ;;  %v1013_v57 = vadd.f32 %v2305_v63, %v1012_v45 }
 0x197   :  { %v745_v53 = vadd.f32 %v2305_v63, %v744_v48  ;;  %v835_v54 = vadd.f32 %v2305_v63, %v834_v49 }
 0x198   :  { %1858 = vst [vmem:[%s2359_s3 + $0x70] sm:$0xff] %v1828_v47   ;;  %v1129_v56 = vmax.f32 %v923_v52, 0.0  ;;  %v1165_v4 = vmax.f32 %v1013_v57, 0.0 }
 0x199   :  { %v1058_v58 = vmax.f32 %v745_v53, 0.0  ;;  %v1094_v59 = vmax.f32 %v835_v54, 0.0 }
 0x19a   :  { %v1262_v3 = vmax.f32 %v1261_v55, %v1129_v56 }
 0x19b   :  { %v1264_v5 = vmax.f32 %v1058_v58, %v1094_v59 }
 0x19c   :  { %v1263_v10 = vmax.f32 %v1262_v3, %v1165_v4 }
 0x19d   :  { %v924_v60 = vpop.f32.mrf.mxu2  ;;  %v1014_v61 = vpop.f32.mrf.mxu3 }
 0x19e   :  { %v925_v62 = vadd.f32 %v2305_v63, %v924_v60  ;;  %v1015_v0 = vadd.f32 %v2305_v63, %v1014_v61  ;;  %v747_v1 = vpop.f32.mrf.mxu0  ;;  %v837_v2 = vpop.f32.mrf.mxu1 }
 0x19f   :  { %v748_v8 = vadd.f32 %v2305_v63, %v747_v1  ;;  %v838_v9 = vadd.f32 %v2305_v63, %v837_v2 }
 0x1a0   :  { %v1130_v6 = vmax.f32 %v925_v62, 0.0  ;;  %v1166_v46 = vmax.f32 %v1015_v0, 0.0 }
 0x1a1   :  { %v1059_v17 = vmax.f32 %v748_v8, 0.0  ;;  %v1095_v18 = vmax.f32 %v838_v9, 0.0 }
 0x1a2   :  { %v1265_v7 = vmax.f32 %v1264_v5, %v1130_v6 }
 0x1a3   :  { %v1267_v22 = vmax.f32 %v1059_v17, %v1095_v18 }
 0x1a4   :  { %v1266_v11 = vmax.f32 %v1265_v7, %v1166_v46 }
 0x1a5   :  { %v927_v12 = vpop.f32.mrf.mxu2  ;;  %v1017_v13 = vpop.f32.mrf.mxu3 }
 0x1a6   :  { %v1833_v14 = vpack.c.bf16 %v1266_v11, %v1263_v10  ;;  %v749_v15 = vpop.f32.mrf.mxu0  ;;  %v839_v16 = vpop.f32.mrf.mxu1  ;;  %v928_v19 = vadd.f32 %v2305_v63, %v927_v12  ;;  %v1018_v24 = vadd.f32 %v2305_v63, %v1017_v13 }
 0x1a7   :  { %v750_v20 = vadd.f32 %v2305_v63, %v749_v15  ;;  %v840_v21 = vadd.f32 %v2305_v63, %v839_v16 }
 0x1a8   :  { %1859 = vst [vmem:[%s2359_s3 + $0x78] sm:$0xff] %v1833_v14   ;;  %v1131_v23 = vmax.f32 %v928_v19, 0.0  ;;  %v1167_v34 = vmax.f32 %v1018_v24, 0.0 }
 0x1a9   :  { %v1060_v25 = vmax.f32 %v750_v20, 0.0  ;;  %v1096_v26 = vmax.f32 %v840_v21, 0.0 }
 0x1aa   :  { %v1268_v33 = vmax.f32 %v1267_v22, %v1131_v23 }
 0x1ab   :  { %v1270_v35 = vmax.f32 %v1060_v25, %v1096_v26 }
 0x1ac   :  { %v1269_v41 = vmax.f32 %v1268_v33, %v1167_v34 }
 0x1ad   :  { %v929_v27 = vpop.f32.mrf.mxu2  ;;  %v1019_v28 = vpop.f32.mrf.mxu3 }
 0x1ae   :  { %v930_v29 = vadd.f32 %v2305_v63, %v929_v27  ;;  %v1020_v30 = vadd.f32 %v2305_v63, %v1019_v28  ;;  %v752_v31 = vpop.f32.mrf.mxu0  ;;  %v842_v32 = vpop.f32.mrf.mxu1 }
 0x1af   :  { %v753_v39 = vadd.f32 %v2305_v63, %v752_v31  ;;  %v843_v40 = vadd.f32 %v2305_v63, %v842_v32 }
 0x1b0   :  { %v1132_v36 = vmax.f32 %v930_v29, 0.0  ;;  %v1168_v38 = vmax.f32 %v1020_v30, 0.0 }
 0x1b1   :  { %v1061_v49 = vmax.f32 %v753_v39, 0.0  ;;  %v1097_v50 = vmax.f32 %v843_v40, 0.0 }
 0x1b2   :  { %v1271_v37 = vmax.f32 %v1270_v35, %v1132_v36 }
 0x1b3   :  { %v1273_v54 = vmax.f32 %v1061_v49, %v1097_v50 }
 0x1b4   :  { %v1272_v42 = vmax.f32 %v1271_v37, %v1168_v38 }
 0x1b5   :  { %v932_v43 = vpop.f32.mrf.mxu2  ;;  %v1022_v44 = vpop.f32.mrf.mxu3 }
 0x1b6   :  { %v1838_v45 = vpack.c.bf16 %v1272_v42, %v1269_v41  ;;  %v754_v47 = vpop.f32.mrf.mxu0  ;;  %v844_v48 = vpop.f32.mrf.mxu1  ;;  %v933_v51 = vadd.f32 %v2305_v63, %v932_v43  ;;  %v1023_v56 = vadd.f32 %v2305_v63, %v1022_v44 }
 0x1b7   :  { %v755_v52 = vadd.f32 %v2305_v63, %v754_v47  ;;  %v845_v53 = vadd.f32 %v2305_v63, %v844_v48 }
 0x1b8   :  { %1860 = vst [vmem:[%s2359_s3 + $0x80] sm:$0xff] %v1838_v45   ;;  %v1133_v55 = vmax.f32 %v933_v51, 0.0  ;;  %v1169_v1 = vmax.f32 %v1023_v56, 0.0 }
 0x1b9   :  { %v1062_v57 = vmax.f32 %v755_v52, 0.0  ;;  %v1098_v58 = vmax.f32 %v845_v53, 0.0 }
 0x1ba   :  { %v1274_v0 = vmax.f32 %v1273_v54, %v1133_v55 }
 0x1bb   :  { %v1276_v2 = vmax.f32 %v1062_v57, %v1098_v58 }
 0x1bc   :  { %v1275_v6 = vmax.f32 %v1274_v0, %v1169_v1 }
 0x1bd   :  { %v934_v59 = vpop.f32.mrf.mxu2  ;;  %v1024_v60 = vpop.f32.mrf.mxu3 }
 0x1be   :  { %v935_v61 = vadd.f32 %v2305_v63, %v934_v59  ;;  %v1025_v62 = vadd.f32 %v2305_v63, %v1024_v60 }
 0x1c0   :  { %v1134_v3 = vmax.f32 %v935_v61, 0.0  ;;  %v1170_v5 = vmax.f32 %v1025_v62, 0.0 }
 0x1c2   :  { %v1277_v4 = vmax.f32 %v1276_v2, %v1134_v3 }
 0x1c4   :  { %v1278_v7 = vmax.f32 %v1277_v4, %v1170_v5 }
 0x1c6   :  { %v1843_v46 = vpack.c.bf16 %v1278_v7, %v1275_v6 }
 0x1c8   :  { %1861 = vst [vmem:[%s2359_s3 + $0x88] sm:$0xff] %v1843_v46  }

// kernel: net_forward.3
= control target key start
LH: loop header
LB: loop body
LE: loop exit
PB: predicated region body
PF: predicated region fallthrough
CT: control target
= control target key end

     0   :  { %s11764_s0 = inlined_call_operand.vmem [shape: bf16[256,128], index: 0, kind: input, shape index: {}]   ;;  %s11765_s1 = inlined_call_operand.vmem [shape: f32[2,42], index: 1, kind: input, shape index: {}]   ;;  %s11766_s2 = inlined_call_operand.vmem [shape: bf16[128,128], index: 2, kind: input, shape index: {}]   ;;  %s11767_s3 = inlined_call_operand.vmem [shape: f32[1,128], index: 3, kind: input, shape index: {}]   ;;  %s11768_s4 = inlined_call_operand.vmem [shape: bf16[512,1024], index: 4, kind: input, shape index: {}]   ;;  %s11769_s5 = inlined_call_operand.vmem [shape: f32[1,1024], index: 5, kind: input, shape index: {}]   ;;  %s11770_s6 = inlined_call_operand.vmem [shape: bf16[1024,512], index: 6, kind: input, shape index: {}]   ;;  %s11771_s7 = inlined_call_operand.vmem [shape: f32[1,512], index: 7, kind: input, shape index: {}]   ;;  %s11772_s8 = inlined_call_operand.vmem [shape: bf16[512,128], index: 8, kind: input, shape index: {}]   ;;  %s11773_s9 = inlined_call_operand.vmem [shape: f32[1,128], index: 9, kind: input, shape index: {}]   ;;  %s11774_s10 = inlined_call_operand.hbm [shape: f32[2,128], index: 10, kind: output, shape index: {}]  }
   0x1   :  { %v7377_v0 = vld [vmem:[%s11766_s2 + $0x38] sm:$0xff]  ;;  %v7376_v1 = vld [vmem:[%s11766_s2 + $0x30] sm:$0xff] }
   0x2   :  { %232 = vmatpush.bf16.msra.mxu0 %v7377_v0 }
   0x3   :  { %15 = vsyncpa [#allocation4], 0  ;;  %v7375_v2 = vld [vmem:[%s11766_s2 + $0x28] sm:$0xff]  ;;  %v7374_v3 = vld [vmem:[%s11766_s2 + $0x20] sm:$0xff]  ;;  %vm385_vm0 = vcmask 1041409   ;;  %vm387_vm1 = vcmask 1043459  }
   0x4   :  { %v7373_v4 = vld [vmem:[%s11766_s2 + $0x18] sm:$0xff]  ;;  %v7372_v5 = vld [vmem:[%s11766_s2 + $0x10] sm:$0xff]  ;;  %v7371_v6 = vld [vmem:[%s11766_s2 + $0x8] sm:$0xff]  ;;  %vm389_vm2 = vcmask 1045509   ;;  %vm391_vm3 = vcmask 1047559   ;;  %vm394_vm4 = vcmask 123904  }
   0x5   :  { %v7370_v7 = vld [vmem:[%s11766_s2] sm:$0xff]  ;;  %v7355_v9 = vld [vmem:[%s11764_s0 + $0x8] sm:$0xff]  ;;  %v7356_v10 = vld [vmem:[%s11764_s0 + $0x10] sm:$0xff]  ;;  %s7963_s20 = smov 32   ;;  %s7964_s21 = smov 48   ;;  %vm406_vm5 = vcmask 255104  }
   0x6   :  { %233 = vmatpush.bf16.msra.mxu0 %v7376_v1  ;;  %v7354_v8 = vld [vmem:[%s11764_s0] sm:$0xff]  ;;  %v7357_v11 = vld [vmem:[%s11764_s0 + $0x18] sm:$0xff]  ;;  %v7359_v13 = vld [vmem:[%s11764_s0 + $0x28] sm:$0xff]  ;;  %s7965_s22 = smov 64   ;;  %s7966_s23 = smov 80   ;;  %vm424_vm6 = vcmask 386304  }
   0x7   :  { %v7358_v12 = vld [vmem:[%s11764_s0 + $0x20] sm:$0xff]  ;;  %v7360_v14 = vld [vmem:[%s11764_s0 + $0x30] sm:$0xff]  ;;  %v7361_v15 = vld [vmem:[%s11764_s0 + $0x38] sm:$0xff]  ;;  %s7967_s24 = smov 96   ;;  %s7968_s25 = smov 112   ;;  %vm442_vm7 = vcmask 517504  }
   0x8   :  { %v7362_v16 = vld [vmem:[%s11764_s0 + $0x40] sm:$0xff]  ;;  %v7363_v19 = vld [vmem:[%s11764_s0 + $0x48] sm:$0xff]  ;;  %v7364_v22 = vld [vmem:[%s11764_s0 + $0x50] sm:$0xff]  ;;  %vm460_vm8 = vcmask 648704   ;;  %vm478_vm9 = vcmask 779904   ;;  %vm496_vm10 = vcmask 911104  }
   0x9   :  { %v7365_v25 = vld [vmem:[%s11764_s0 + $0x58] sm:$0xff]  ;;  %v8096_v28 = vld [vmem:[%s11767_s3] ss:$0 sm:$0xff]  ;;  %v7367_v38 = vld [vmem:[%s11764_s0 + $0x68] sm:$0xff]  ;;  %vm514_vm11 = vcmask 1042304   ;;  %vm780_vm12 = vcmask 468096  }
   0xa   :  { %234 = vmatpush.bf16.msra.mxu0 %v7375_v2  ;;  %v7366_v30 = vld [vmem:[%s11764_s0 + $0x60] sm:$0xff]  ;;  %v7368_v46 = vld [vmem:[%s11764_s0 + $0x70] sm:$0xff]  ;;  %v7369_v54 = vld [vmem:[%s11764_s0 + $0x78] sm:$0xff]  ;;  %s7962_s0 = smov 16   ;;  %s5073_s15 = sshll.u32 %s11774_s10, 4  ;;  %s5074_s15 = int_to_ptr.hbm [resolvable:$true] %s5073_s15 }
   0xe   :  { %235 = vmatpush.bf16.msra.mxu0 %v7374_v3 }
  0x12   :  { %236 = vmatpush.bf16.msra.mxu0 %v7373_v4 }
  0x16   :  { %237 = vmatpush.bf16.msra.mxu0 %v7372_v5 }
  0x1a   :  { %238 = vmatpush.bf16.msra.mxu0 %v7371_v6 }
  0x1e   :  { %239 = vmatpush.bf16.msra.mxu0 %v7370_v7 }
  0x21   :  { %240 = vmatmul.bf16.vlgmr.msra.gmra.mxu0 %v7354_v8 }
  0x31   :  { %245 = vmatmul.bf16.gmra.mxu0 %v7355_v9 }
  0x41   :  { %250 = vmatmul.bf16.gmra.mxu0 %v7356_v10 }
  0x51   :  { %255 = vmatmul.bf16.gmra.mxu0 %v7357_v11 }
  0x61   :  { %260 = vmatmul.bf16.gmra.mxu0 %v7358_v12 }
  0x71   :  { %265 = vmatmul.bf16.gmra.mxu0 %v7359_v13 }
  0x81   :  { %270 = vmatmul.bf16.gmra.mxu0 %v7360_v14 }
  0x91   :  { %275 = vmatmul.bf16.gmra.mxu0 %v7361_v15 }
  0x9e   :  { %v241_v17 = vpop.f32.mrf.mxu0 }
  0x9f   :  { %v242_v29 = vadd.f32 %v8096_v28, %v241_v17 }
  0xa1   :  { %280 = vmatmul.bf16.gmra.mxu0 %v7362_v16  ;;  %v321_v33 = vmax.f32 %v242_v29, 0.0  ;;  %v7961_v16 = vmov 0.0  }
  0xa2   :  { %377 = vst [vmem:[#allocation2] sm:$0xff] %v7961_v16 }
  0xa6   :  { %v8076_v18 = vpop.f32.mrf.mxu0 }
  0xae   :  { %v246_v20 = vpop.f32.mrf.mxu0 }
  0xaf   :  { %v247_v37 = vadd.f32 %v8096_v28, %v246_v20 }
  0xb1   :  { %285 = vmatmul.bf16.gmra.mxu0 %v7363_v19  ;;  %v323_v41 = vmax.f32 %v247_v37, 0.0 }
  0xb6   :  { %v8081_v21 = vpop.f32.mrf.mxu0 }
  0xbe   :  { %v251_v23 = vpop.f32.mrf.mxu0 }
  0xbf   :  { %v252_v45 = vadd.f32 %v8096_v28, %v251_v23 }
  0xc1   :  { %290 = vmatmul.bf16.gmra.mxu0 %v7364_v22  ;;  %v325_v49 = vmax.f32 %v252_v45, 0.0 }
  0xc6   :  { %v8086_v24 = vpop.f32.mrf.mxu0 }
  0xce   :  { %v256_v26 = vpop.f32.mrf.mxu0 }
  0xcf   :  { %v257_v53 = vadd.f32 %v8096_v28, %v256_v26  ;;  %v244_v26 = vadd.f32 %v8096_v28, %v8076_v18 }
  0xd1   :  { %295 = vmatmul.bf16.gmra.mxu0 %v7365_v25  ;;  %v327_v57 = vmax.f32 %v257_v53, 0.0 }
  0xd6   :  { %v8091_v27 = vpop.f32.mrf.mxu0 }
  0xd7   :  { %v259_v16 = vadd.f32 %v8096_v28, %v8091_v27 }
  0xde   :  { %v261_v31 = vpop.f32.mrf.mxu0 }
  0xdf   :  { %v262_v32 = vadd.f32 %v8096_v28, %v261_v31 }
  0xe1   :  { %v329_v34 = vmax.f32 %v262_v32, 0.0  ;;  %300 = vmatmul.bf16.gmra.mxu0 %v7366_v30 }
  0xe3   :  { %v353_v35 = vmax.f32 %v321_v33, %v329_v34 }
  0xe6   :  { %v263_v36 = vpop.f32.mrf.mxu0 }
  0xe7   :  { %v264_v25 = vadd.f32 %v8096_v28, %v263_v36  ;;  %v254_v36 = vadd.f32 %v8096_v28, %v8086_v24 }
  0xe9   :  { %v330_v32 = vmax.f32 %v264_v25, 0.0 }
  0xee   :  { %v266_v39 = vpop.f32.mrf.mxu0 }
  0xef   :  { %v267_v40 = vadd.f32 %v8096_v28, %v266_v39 }
  0xf1   :  { %v331_v42 = vmax.f32 %v267_v40, 0.0  ;;  %305 = vmatmul.bf16.gmra.mxu0 %v7367_v38  ;;  %v322_v38 = vmax.f32 %v244_v26, 0.0 }
  0xf3   :  { %v359_v43 = vmax.f32 %v323_v41, %v331_v42  ;;  %v356_v42 = vmax.f32 %v322_v38, %v330_v32 }
  0xf6   :  { %v8108_v44 = vpop.f32.mrf.mxu0 }
  0xf7   :  { %v269_v26 = vadd.f32 %v8096_v28, %v8108_v44 }
  0xfe   :  { %v271_v47 = vpop.f32.mrf.mxu0 }
  0xff   :  { %v272_v48 = vadd.f32 %v8096_v28, %v271_v47 }
 0x101   :  { %v333_v50 = vmax.f32 %v272_v48, 0.0  ;;  %310 = vmatmul.bf16.gmra.mxu0 %v7368_v46  ;;  %v326_v48 = vmax.f32 %v254_v36, 0.0 }
 0x103   :  { %v365_v51 = vmax.f32 %v325_v49, %v333_v50 }
 0x106   :  { %v273_v52 = vpop.f32.mrf.mxu0 }
 0x107   :  { %v274_v33 = vadd.f32 %v8096_v28, %v273_v52 }
 0x10e   :  { %v276_v55 = vpop.f32.mrf.mxu0 }
 0x10f   :  { %v277_v56 = vadd.f32 %v8096_v28, %v276_v55 }
 0x111   :  { %v335_v58 = vmax.f32 %v277_v56, 0.0  ;;  %315 = vmatmul.bf16.gmra.mxu0 %v7369_v54 }
 0x113   :  { %v8120_v59 = vmax.f32 %v327_v57, %v335_v58 }
 0x116   :  { %v8122_v60 = vpop.f32.mrf.mxu0 }
 0x11e   :  { %v281_v61 = vpop.f32.mrf.mxu0 }
 0x11f   :  { %v282_v8 = vadd.f32 %v8096_v28, %v281_v61 }
 0x121   :  { %v337_v9 = vmax.f32 %v282_v8, 0.0 }
 0x123   :  { %v354_v12 = vmax.f32 %v353_v35, %v337_v9 }
 0x126   :  { %v283_v62 = vpop.f32.mrf.mxu0 }
 0x127   :  { %v284_v29 = vadd.f32 %v8096_v28, %v283_v62 }
 0x129   :  { %v338_v18 = vmax.f32 %v284_v29, 0.0  ;;  %v279_v29 = vadd.f32 %v8096_v28, %v8122_v60 }
 0x12b   :  { %v357_v49 = vmax.f32 %v356_v42, %v338_v18 }
 0x12e   :  { %v286_v63 = vpop.f32.mrf.mxu0 }
 0x12f   :  { %v287_v0 = vadd.f32 %v8096_v28, %v286_v63 }
 0x131   :  { %v339_v1 = vmax.f32 %v287_v0, 0.0 }
 0x133   :  { %v8125_v2 = vmax.f32 %v359_v43, %v339_v1  ;;  %v334_v43 = vmax.f32 %v274_v33, 0.0 }
 0x135   :  { %v368_v53 = vmax.f32 %v326_v48, %v334_v43 }
 0x136   :  { %v8127_v3 = vpop.f32.mrf.mxu0 }
 0x13e   :  { %v291_v4 = vpop.f32.mrf.mxu0 }
 0x13f   :  { %v292_v23 = vadd.f32 %v8096_v28, %v291_v4 }
 0x141   :  { %v341_v31 = vmax.f32 %v292_v23, 0.0 }
 0x143   :  { %v366_v39 = vmax.f32 %v365_v51, %v341_v31 }
 0x146   :  { %v293_v5 = vpop.f32.mrf.mxu0 }
 0x147   :  { %v294_v40 = vadd.f32 %v8096_v28, %v293_v5 }
 0x149   :  { %v342_v24 = vmax.f32 %v294_v40, 0.0  ;;  %v336_v40 = vmax.f32 %v279_v29, 0.0 }
 0x14b   :  { %v369_v4 = vmax.f32 %v368_v53, %v342_v24 }
 0x14e   :  { %v8129_v6 = vpop.f32.mrf.mxu0 }
 0x14f   :  { %v297_v63 = vadd.f32 %v8096_v28, %v8129_v6 }
 0x156   :  { %v8131_v7 = vpop.f32.mrf.mxu0 }
 0x157   :  { %v299_v60 = vadd.f32 %v8096_v28, %v8131_v7 }
 0x15e   :  { %v301_v10 = vpop.f32.mrf.mxu0 }
 0x15f   :  { %v302_v11 = vadd.f32 %v8096_v28, %v301_v10 }
 0x161   :  { %v345_v13 = vmax.f32 %v302_v11, 0.0 }
 0x163   :  { %v8135_v14 = vmax.f32 %v354_v12, %v345_v13  ;;  %v343_v12 = vmax.f32 %v297_v63, 0.0 }
 0x165   :  { %408 = vst.sshfl [vmem:[#allocation1] sm:$0xff pattern:$0x73625140] %v8135_v14  ;;  %v396_v47 = vrot.slane %v8135_v14, 1 }
 0x166   :  { %v303_v15 = vpop.f32.mrf.mxu0 }
 0x167   :  { %v304_v34 = vadd.f32 %v8096_v28, %v303_v15  ;;  %v249_v15 = vadd.f32 %v8096_v28, %v8081_v21 }
 0x169   :  { %v346_v45 = vmax.f32 %v304_v34, 0.0  ;;  %v324_v24 = vmax.f32 %v249_v15, 0.0 }
 0x16b   :  { %v8169_v54 = vmax.f32 %v357_v49, %v346_v45  ;;  %v328_v45 = vmax.f32 %v259_v16, 0.0 }
 0x16c   :  { %v8138_v17 = vld [vmem:[#allocation1 + $0x1] ss:$4 sm:$0xff] }
 0x16d   :  { %426 = vst.sshfl [vmem:[#allocation1] sm:$0xff pattern:$0x73625140] %v8135_v14  ;;  %v527_v6 = vrot.slane %v8169_v54, 1  ;;  %v374_v53 = vmax.f32 %v328_v45, %v336_v40 }
 0x16e   :  { %v306_v19 = vpop.f32.mrf.mxu0 }
 0x16f   :  { %v307_v57 = vadd.f32 %v8096_v28, %v306_v19 }
 0x171   :  { %v347_v10 = vmax.f32 %v307_v57, 0.0 }
 0x174   :  { %v8141_v20 = vld [vmem:[#allocation1 + $0x1] ss:$4 sm:$0xff] }
 0x175   :  { %444 = vst.sshfl [vmem:[#allocation1] sm:$0xff pattern:$0x73625140] %v8135_v14  ;;  %v432_v49 = vrot.slane %v8141_v20, 1 }
 0x176   :  { %v8144_v22 = vpop.f32.mrf.mxu0 }
 0x17c   :  { %v8151_v30 = vld [vmem:[#allocation1 + $0x2] ss:$4 sm:$0xff] }
 0x17d   :  { %462 = vst.sshfl [vmem:[#allocation1] sm:$0xff pattern:$0x73625140] %v8135_v14 }
 0x17e   :  { %v311_v35 = vpop.f32.mrf.mxu0 }
 0x17f   :  { %v312_v37 = vadd.f32 %v8096_v28, %v311_v35 }
 0x181   :  { %v349_v41 = vmax.f32 %v312_v37, 0.0  ;;  %v372_v37 = vmax.f32 %v8120_v59, %v343_v12 }
 0x183   :  { %v8160_v46 = vmax.f32 %v366_v39, %v349_v41  ;;  %v332_v39 = vmax.f32 %v269_v26, 0.0 }
 0x184   :  { %v8163_v50 = vld [vmem:[#allocation1 + $0x2] ss:$4 sm:$0xff] }
 0x185   :  { %480 = vst.sshfl [vmem:[#allocation1] sm:$0xff pattern:$0x73625140] %v8135_v14  ;;  %v399_v51 = vsel %vm385_vm0, %v8160_v46, %v396_v47  ;;  %v384_v52 = vrot.slane %v8160_v46, 7  ;;  %v344_v47 = vmax.f32 %v299_v60, 0.0 }
 0x186   :  { %411 = vst.sshfl [vmem:[#allocation1 + $0x20] sm:$0xff pattern:$0x73625140] %v8160_v46  ;;  %v313_v55 = vpop.f32.mrf.mxu0  ;;  %v400_v56 = vsel %vm387_vm1, %v8160_v46, %v399_v51 }
 0x187   :  { %v314_v58 = vadd.f32 %v8096_v28, %v313_v55  ;;  %v401_v61 = vsel %vm389_vm2, %v8160_v46, %v400_v56  ;;  %v386_v62 = vsel %vm385_vm0, %v384_v52, %v8135_v14  ;;  %v375_v63 = vmax.f32 %v374_v53, %v344_v47 }
 0x188   :  { %v402_v0 = vsel %vm391_vm3, %v8160_v46, %v401_v61  ;;  %v388_v1 = vsel %vm387_vm1, %v384_v52, %v386_v62 }
 0x189   :  { %v350_v5 = vmax.f32 %v314_v58, 0.0  ;;  %403 = vrot.lane.b32.xlu0 %v402_v0, %s7962_s0  ;;  %v390_v8 = vsel %vm389_vm2, %v384_v52, %v388_v1  ;;  %v362_v58 = vmax.f32 %v324_v24, %v332_v39 }
 0x18a   :  { %v392_v9 = vsel %vm391_vm3, %v384_v52, %v390_v8 }
 0x18b   :  { %v8188_v11 = vmax.f32 %v369_v4, %v350_v5  ;;  %395 = vst.msk [vmem:[#allocation2] sm:$0x3] %vm394_vm4, %v392_v9 }
 0x18c   :  { %v8192_v13 = vld [vmem:[#allocation1 + $0x3] ss:$4 sm:$0xff] }
 0x18d   :  { %498 = vst.sshfl [vmem:[#allocation1] sm:$0xff pattern:$0x73625140] %v8135_v14  ;;  %v413_v19 = vld [vmem:[#allocation1 + $0x21] ss:$4 sm:$0xff]  ;;  %v530_v23 = vsel %vm385_vm0, %v8188_v11, %v527_v6  ;;  %v520_v25 = vrot.slane %v8188_v11, 7  ;;  %v8210_v14 = vmax.f32 %v8125_v2, %v347_v10 }
 0x18e   :  { %429 = vst.sshfl [vmem:[#allocation1 + $0x20] sm:$0xff pattern:$0x73625140] %v8160_v46  ;;  %v316_v21 = vpop.f32.mrf.mxu0  ;;  %v531_v27 = vsel %vm387_vm1, %v8188_v11, %v530_v23  ;;  %v416_v31 = vrot.slane %v413_v19, 7 }
 0x18f   :  { %v317_v32 = vadd.f32 %v8096_v28, %v316_v21  ;;  %v532_v33 = vsel %vm389_vm2, %v8188_v11, %v531_v27  ;;  %v521_v44 = vsel %vm385_vm0, %v520_v25, %v8169_v54  ;;  %v651_v43 = vrot.slane %v8210_v14, 1 }
 0x190   :  { %v533_v34 = vsel %vm391_vm3, %v8188_v11, %v532_v33  ;;  %v417_v35 = vsel %vm385_vm0, %v416_v31, %v8138_v17  ;;  %v522_v2 = vsel %vm387_vm1, %v520_v25, %v521_v44  ;;  %v289_v17 = vadd.f32 %v8096_v28, %v8127_v3 }
 0x191   :  { %v351_v38 = vmax.f32 %v317_v32, 0.0  ;;  %534 = vrot.lane.b32.xlu0 %v533_v34, %s7962_s0  ;;  %v418_v36 = vsel %vm387_vm1, %v416_v31, %v417_v35  ;;  %v523_v18 = vsel %vm389_vm2, %v520_v25, %v522_v2  ;;  %v309_v3 = vadd.f32 %v8096_v28, %v8144_v22 }
 0x192   :  { %v419_v7 = vsel %vm389_vm2, %v416_v31, %v418_v36  ;;  %v524_v41 = vsel %vm391_vm3, %v520_v25, %v523_v18  ;;  %v340_v61 = vmax.f32 %v289_v17, 0.0  ;;  %v468_v35 = vrot.slane %v8163_v50, 1 }
 0x193   :  { %v8232_v42 = vmax.f32 %v372_v37, %v351_v38  ;;  %v420_v59 = vsel %vm391_vm3, %v416_v31, %v419_v7  ;;  %526 = vst.msk [vmem:[#allocation2 + $0x2] sm:$0x3] %vm394_vm4, %v524_v41  ;;  %v348_v5 = vmax.f32 %v309_v3, 0.0 }
 0x194   :  { %v8237_v48 = vld [vmem:[#allocation1 + $0x3] ss:$4 sm:$0xff]  ;;  %421 = vrot.lane.b32.xlu1 %v420_v59, %s7963_s20  ;;  %v363_v6 = vmax.f32 %v362_v58, %v340_v61 }
 0x195   :  { %538 = vst.sshfl [vmem:[#allocation1] sm:$0xff pattern:$0x73625140] %v8169_v54  ;;  %v431_v51 = vld [vmem:[#allocation1 + $0x21] ss:$4 sm:$0xff]  ;;  %v654_v52 = vsel %vm385_vm0, %v8232_v42, %v651_v43  ;;  %v644_v20 = vrot.slane %v8232_v42, 7 }
 0x196   :  { %447 = vst.sshfl [vmem:[#allocation1 + $0x20] sm:$0xff pattern:$0x73625140] %v8160_v46  ;;  %v318_v55 = vpop.f32.mrf.mxu0  ;;  %v435_v56 = vsel %vm385_vm0, %v431_v51, %v432_v49  ;;  %v655_v57 = vsel %vm387_vm1, %v8232_v42, %v654_v52  ;;  %v364_v23 = vmax.f32 %v363_v6, %v348_v5  ;;  %v504_v43 = vrot.slane %v8237_v48, 1 }
 0x197   :  { %v319_v62 = vadd.f32 %v8096_v28, %v318_v55  ;;  %v436_v22 = vsel %vm387_vm1, %v431_v51, %v435_v56  ;;  %v656_v1 = vsel %vm389_vm2, %v8232_v42, %v655_v57  ;;  %v645_v4 = vsel %vm385_vm0, %v644_v20, %v8210_v14 }
 0x198   :  { %v437_v0 = vsel %vm389_vm2, %v431_v51, %v436_v22  ;;  %v646_v10 = vsel %vm387_vm1, %v644_v20, %v645_v4  ;;  %v657_v15 = vsel %vm391_vm3, %v8232_v42, %v656_v1 }
 0x199   :  { %v352_v8 = vmax.f32 %v319_v62, 0.0  ;;  %v438_v9 = vsel %vm391_vm3, %v431_v51, %v437_v0  ;;  %v647_v28 = vsel %vm389_vm2, %v644_v20, %v646_v10 }
 0x19a   :  { %439 = vrot.lane.b32.xlu0 %v438_v9, %s7964_s21  ;;  %v648_v16 = vsel %vm391_vm3, %v644_v20, %v647_v28 }
 0x19b   :  { %v376_v12 = vmax.f32 %v375_v63, %v352_v8  ;;  %650 = vst.msk [vmem:[#allocation2 + $0x4] sm:$0x3] %vm394_vm4, %v648_v16 }
 0x19c   :  { %658 = vrot.lane.b32.xlu1 %v657_v15, %s7962_s0  ;;  %v540_v19 = vld [vmem:[#allocation1 + $0x1] ss:$4 sm:$0xff] }
 0x19d   :  { %v449_v25 = vld [vmem:[#allocation1 + $0x22] ss:$4 sm:$0xff]  ;;  %v768_v26 = vrot.slane %v376_v12, 7  ;;  %555 = vst.sshfl [vmem:[#allocation1] sm:$0xff pattern:$0x73625140] %v8169_v54 }
 0x19e   :  { %465 = vst.sshfl [vmem:[#allocation1 + $0x20] sm:$0xff pattern:$0x73625140] %v8160_v46  ;;  %v452_v29 = vrot.slane %v449_v25, 7 }
 0x19f   :  { %v769_v21 = vsel %vm385_vm0, %v768_v26, %v364_v23 }
 0x1a0   :  { %v453_v27 = vsel %vm385_vm0, %v452_v29, %v8151_v30  ;;  %v770_v31 = vsel %vm387_vm1, %v768_v26, %v769_v21 }
 0x1a1   :  { %v454_v32 = vsel %vm387_vm1, %v452_v29, %v453_v27  ;;  %v771_v33 = vsel %vm389_vm2, %v768_v26, %v770_v31 }
 0x1a2   :  { %v455_v44 = vsel %vm389_vm2, %v452_v29, %v454_v32  ;;  %v772_v60 = vsel %vm391_vm3, %v768_v26, %v771_v33  ;;  %v775_v32 = vld [vmem:[%s11765_s1] sm:$0x3] }
 0x1a3   :  { %v456_v34 = vsel %vm391_vm3, %v452_v29, %v455_v44  ;;  %774 = vst.msk [vmem:[#allocation2 + $0x6] sm:$0x3] %vm394_vm4, %v772_v60 }
 0x1a4   :  { %457 = vrot.lane.b32.xlu0 %v456_v34, %s7965_s22  ;;  %v557_v30 = vld [vmem:[#allocation1 + $0x1] ss:$4 sm:$0xff] }
 0x1a5   :  { %v467_v2 = vld [vmem:[#allocation1 + $0x22] ss:$4 sm:$0xff]  ;;  %572 = vst.sshfl [vmem:[#allocation1] sm:$0xff pattern:$0x73625140] %v8169_v54  ;;  %v561_v57 = vrot.slane %v557_v30, 1 }
 0x1a6   :  { %483 = vst.sshfl [vmem:[#allocation1 + $0x20] sm:$0xff pattern:$0x73625140] %v8160_v46  ;;  %v471_v37 = vsel %vm385_vm0, %v467_v2, %v468_v35 }
 0x1a7   :  { %v472_v38 = vsel %vm387_vm1, %v467_v2, %v471_v37 }
 0x1a8   :  { %v473_v36 = vsel %vm389_vm2, %v467_v2, %v472_v38 }
 0x1a9   :  { %v474_v18 = vsel %vm391_vm3, %v467_v2, %v473_v36 }
 0x1ac   :  { %475 = vrot.lane.b32.xlu0 %v474_v18, %s7966_s23  ;;  %v574_v39 = vld [vmem:[#allocation1 + $0x2] ss:$4 sm:$0xff] }
 0x1ad   :  { %v485_v40 = vld [vmem:[#allocation1 + $0x23] ss:$4 sm:$0xff]  ;;  %589 = vst.sshfl [vmem:[#allocation1] sm:$0xff pattern:$0x73625140] %v8169_v54 }
 0x1ae   :  { %v488_v50 = vrot.slane %v485_v40, 7  ;;  %501 = vst.sshfl [vmem:[#allocation1 + $0x20] sm:$0xff pattern:$0x73625140] %v8160_v46 }
 0x1b0   :  { %v489_v7 = vsel %vm385_vm0, %v488_v50, %v8192_v13 }
 0x1b1   :  { %v490_v41 = vsel %vm387_vm1, %v488_v50, %v489_v7 }
 0x1b2   :  { %v491_v17 = vsel %vm389_vm2, %v488_v50, %v490_v41 }
 0x1b3   :  { %v492_v59 = vsel %vm391_vm3, %v488_v50, %v491_v17 }
 0x1b4   :  { %493 = vrot.lane.b32.xlu0 %v492_v59, %s7967_s24  ;;  %v591_v45 = vld [vmem:[#allocation1 + $0x2] ss:$4 sm:$0xff] }
 0x1b5   :  { %v503_v47 = vld [vmem:[#allocation1 + $0x23] ss:$4 sm:$0xff]  ;;  %606 = vst.sshfl [vmem:[#allocation1] sm:$0xff pattern:$0x73625140] %v8169_v54  ;;  %v595_v10 = vrot.slane %v591_v45, 1 }
 0x1b6   :  { %v507_v46 = vsel %vm385_vm0, %v503_v47, %v504_v43  ;;  %541 = vst.sshfl [vmem:[#allocation1 + $0x20] sm:$0xff pattern:$0x73625140] %v8188_v11 }
 0x1b7   :  { %v508_v13 = vsel %vm387_vm1, %v503_v47, %v507_v46 }
 0x1b8   :  { %v509_v49 = vsel %vm389_vm2, %v503_v47, %v508_v13 }
 0x1b9   :  { %v510_v24 = vsel %vm391_vm3, %v503_v47, %v509_v49 }
 0x1bc   :  { %511 = vrot.lane.b32.xlu0 %v510_v24, %s7968_s25  ;;  %v608_v3 = vld [vmem:[#allocation1 + $0x3] ss:$4 sm:$0xff] }
 0x1bd   :  { %v543_v51 = vld [vmem:[#allocation1 + $0x21] ss:$4 sm:$0xff]  ;;  %623 = vst.sshfl [vmem:[#allocation1] sm:$0xff pattern:$0x73625140] %v8169_v54 }
 0x1be   :  { %v546_v48 = vrot.slane %v543_v51, 7  ;;  %558 = vst.sshfl [vmem:[#allocation1 + $0x20] sm:$0xff pattern:$0x73625140] %v8188_v11 }
 0x1c0   :  { %v547_v52 = vsel %vm385_vm0, %v546_v48, %v540_v19 }
 0x1c1   :  { %v548_v53 = vsel %vm387_vm1, %v546_v48, %v547_v52 }
 0x1c2   :  { %v549_v55 = vsel %vm389_vm2, %v546_v48, %v548_v53 }
 0x1c3   :  { %v550_v56 = vsel %vm391_vm3, %v546_v48, %v549_v55 }
 0x1c4   :  { %551 = vrot.lane.b32.xlu2 %v550_v56, %s7963_s20  ;;  %v625_v20 = vld [vmem:[#allocation1 + $0x3] ss:$4 sm:$0xff]  ;;  %777 = vrot.lane.b32.xlu0 %v775_v32, %s7962_s0 }
 0x1c5   :  { %v560_v58 = vld [vmem:[#allocation1 + $0x21] ss:$4 sm:$0xff]  ;;  %662 = vst.sshfl [vmem:[#allocation1] sm:$0xff pattern:$0x73625140] %v8210_v14  ;;  %v629_v33 = vrot.slane %v625_v20, 1 }
 0x1c6   :  { %v564_v54 = vsel %vm385_vm0, %v560_v58, %v561_v57  ;;  %575 = vst.sshfl [vmem:[#allocation1 + $0x20] sm:$0xff pattern:$0x73625140] %v8188_v11 }
 0x1c7   :  { %v565_v61 = vsel %vm387_vm1, %v560_v58, %v564_v54 }
 0x1c8   :  { %v566_v62 = vsel %vm389_vm2, %v560_v58, %v565_v61 }
 0x1c9   :  { %v567_v22 = vsel %vm391_vm3, %v560_v58, %v566_v62 }
 0x1ca   :  { %568 = vrot.lane.b32.xlu1 %v567_v22, %s7964_s21 }
 0x1cc   :  { %v664_v63 = vld [vmem:[#allocation1 + $0x1] ss:$4 sm:$0xff] }
 0x1cd   :  { %v577_v0 = vld [vmem:[#allocation1 + $0x22] ss:$4 sm:$0xff]  ;;  %679 = vst.sshfl [vmem:[#allocation1] sm:$0xff pattern:$0x73625140] %v8210_v14 }
 0x1ce   :  { %v580_v1 = vrot.slane %v577_v0, 7  ;;  %592 = vst.sshfl [vmem:[#allocation1 + $0x20] sm:$0xff pattern:$0x73625140] %v8188_v11 }
 0x1d0   :  { %v581_v4 = vsel %vm385_vm0, %v580_v1, %v574_v39 }
 0x1d1   :  { %v582_v5 = vsel %vm387_vm1, %v580_v1, %v581_v4 }
 0x1d2   :  { %v583_v8 = vsel %vm389_vm2, %v580_v1, %v582_v5 }
 0x1d3   :  { %v584_v9 = vsel %vm391_vm3, %v580_v1, %v583_v8 }
 0x1d4   :  { %585 = vrot.lane.b32.xlu1 %v584_v9, %s7965_s22  ;;  %v681_v28 = vld [vmem:[#allocation1 + $0x1] ss:$4 sm:$0xff] }
 0x1d5   :  { %v594_v6 = vld [vmem:[#allocation1 + $0x22] ss:$4 sm:$0xff]  ;;  %696 = vst.sshfl [vmem:[#allocation1] sm:$0xff pattern:$0x73625140] %v8210_v14  ;;  %v685_v50 = vrot.slane %v681_v28, 1 }
 0x1d6   :  { %v598_v12 = vsel %vm385_vm0, %v594_v6, %v595_v10  ;;  %609 = vst.sshfl [vmem:[#allocation1 + $0x20] sm:$0xff pattern:$0x73625140] %v8188_v11 }
 0x1d7   :  { %v599_v15 = vsel %vm387_vm1, %v594_v6, %v598_v12 }
 0x1d8   :  { %v600_v16 = vsel %vm389_vm2, %v594_v6, %v599_v15 }
 0x1d9   :  { %v601_v19 = vsel %vm391_vm3, %v594_v6, %v600_v16  ;;  %v5404_v16 = vld [vmem:[%s11768_s4 + $0x1c0] sm:$0xf] }
 0x1dc   :  { %602 = vrot.lane.b32.xlu1 %v601_v19, %s7966_s23  ;;  %v698_v23 = vld [vmem:[#allocation1 + $0x2] ss:$4 sm:$0xff] }
 0x1dd   :  { %v611_v25 = vld [vmem:[#allocation1 + $0x23] ss:$4 sm:$0xff]  ;;  %713 = vst.sshfl [vmem:[#allocation1] sm:$0xff pattern:$0x73625140] %v8210_v14 }
 0x1de   :  { %v614_v26 = vrot.slane %v611_v25, 7  ;;  %626 = vst.sshfl [vmem:[#allocation1 + $0x20] sm:$0xff pattern:$0x73625140] %v8188_v11  ;;  %v7438_v19 = vld [vmem:[%s11768_s4 + $0x1dc] sm:$0xf0] }
 0x1e0   :  { %v615_v29 = vsel %vm385_vm0, %v614_v26, %v608_v3 }
 0x1e1   :  { %v616_v21 = vsel %vm387_vm1, %v614_v26, %v615_v29  ;;  %v7502_v29 = vld [vmem:[%s11768_s4 + $0x3dc] sm:$0xf0] }
 0x1e2   :  { %v617_v27 = vsel %vm389_vm2, %v614_v26, %v616_v21  ;;  %v5916_v21 = vld [vmem:[%s11768_s4 + $0x5c0] sm:$0xf] }
 0x1e3   :  { %v618_v31 = vsel %vm391_vm3, %v614_v26, %v617_v27  ;;  %v5405_v26 = vor.u32 %v7438_v19, %v5404_v16  ;;  %v7566_v27 = vld [vmem:[%s11768_s4 + $0x5dc] sm:$0xf0] }
 0x1e4   :  { %619 = vrot.lane.b32.xlu1 %v618_v31, %s7967_s24  ;;  %v715_v44 = vld [vmem:[#allocation1 + $0x2] ss:$4 sm:$0xff]  ;;  %v5917_v32 = vor.u32 %v7566_v27, %v5916_v21 }
 0x1e5   :  { %v628_v60 = vld [vmem:[#allocation1 + $0x23] ss:$4 sm:$0xff]  ;;  %730 = vst.sshfl [vmem:[#allocation1] sm:$0xff pattern:$0x73625140] %v8210_v14  ;;  %v719_v51 = vrot.slane %v715_v44, 1  ;;  %2351 = vmatpush.bf16.msra.mxu1 %v5405_v26 }
 0x1e6   :  { %v632_v11 = vsel %vm385_vm0, %v628_v60, %v629_v33  ;;  %665 = vst.sshfl [vmem:[#allocation1 + $0x20] sm:$0xff pattern:$0x73625140] %v8232_v42  ;;  %v5372_v33 = vld [vmem:[%s11768_s4 + $0x180] sm:$0xf]  ;;  %2377 = vmatpush.bf16.msra.mxu3 %v5917_v32 }
 0x1e7   :  { %v633_v34 = vsel %vm387_vm1, %v628_v60, %v632_v11  ;;  %v7430_v44 = vld [vmem:[%s11768_s4 + $0x19c] sm:$0xf0] }
 0x1e8   :  { %v634_v35 = vsel %vm389_vm2, %v628_v60, %v633_v34  ;;  %v5373_v11 = vor.u32 %v7430_v44, %v5372_v33  ;;  %v7494_v34 = vld [vmem:[%s11768_s4 + $0x39c] sm:$0xf0]  ;;  %v5332_v44 = vld [vmem:[%s11768_s4 + $0x118] sm:$0xf] }
 0x1e9   :  { %v635_v30 = vsel %vm391_vm3, %v628_v60, %v634_v35  ;;  %v5628_v60 = vld [vmem:[%s11768_s4 + $0x380] sm:$0xf] }
 0x1ea   :  { %v5884_v35 = vld [vmem:[%s11768_s4 + $0x580] sm:$0xf]  ;;  %2352 = vmatpush.bf16.msra.mxu1 %v5373_v11 }
 0x1eb   :  { %v5212_v19 = vld [vmem:[%s11768_s4 + $0x40] sm:$0xf] }
 0x1ec   :  { %636 = vrot.lane.b32.xlu1 %v635_v30, %s7968_s25  ;;  %v732_v2 = vld [vmem:[#allocation1 + $0x3] ss:$4 sm:$0xff] }
 0x1ed   :  { %v667_v37 = vld [vmem:[#allocation1 + $0x21] ss:$4 sm:$0xff]  ;;  %747 = vst.sshfl [vmem:[#allocation1] sm:$0xff pattern:$0x73625140] %v8210_v14 }
 0x1ee   :  { %v670_v38 = vrot.slane %v667_v37, 7  ;;  %682 = vst.sshfl [vmem:[#allocation1 + $0x20] sm:$0xff pattern:$0x73625140] %v8232_v42  ;;  %v7558_v30 = vld [vmem:[%s11768_s4 + $0x59c] sm:$0xf0] }
 0x1ef   :  { %v5885_v37 = vor.u32 %v7558_v30, %v5884_v35  ;;  %v7454_v21 = vld [vmem:[%s11768_s4 + $0x25c] sm:$0xf0] }
 0x1f0   :  { %v671_v36 = vsel %vm385_vm0, %v670_v38, %v664_v63  ;;  %v5724_v27 = vld [vmem:[%s11768_s4 + $0x440] sm:$0xf] }
 0x1f1   :  { %v672_v18 = vsel %vm387_vm1, %v670_v38, %v671_v36  ;;  %2378 = vmatpush.bf16.msra.mxu3 %v5885_v37  ;;  %v7422_v36 = vld [vmem:[%s11768_s4 + $0x15c] sm:$0xf0] }
 0x1f2   :  { %v673_v39 = vsel %vm389_vm2, %v670_v38, %v672_v18  ;;  %v5596_v18 = vld [vmem:[%s11768_s4 + $0x340] sm:$0xf] }
 0x1f3   :  { %v674_v40 = vsel %vm391_vm3, %v670_v38, %v673_v39  ;;  %v5340_v38 = vld [vmem:[%s11768_s4 + $0x140] sm:$0xf] }
 0x1f4   :  { %675 = vrot.lane.b32.xlu2 %v674_v40, %s7963_s20  ;;  %v749_v63 = vld [vmem:[#allocation1 + $0x3] ss:$4 sm:$0xff]  ;;  %v5341_v39 = vor.u32 %v7422_v36, %v5340_v38 }
 0x1f5   :  { %v684_v7 = vld [vmem:[#allocation1 + $0x21] ss:$4 sm:$0xff]  ;;  %v753_v4 = vrot.slane %v749_v63, 1 }
 0x1f6   :  { %v688_v41 = vsel %vm385_vm0, %v684_v7, %v685_v50  ;;  %699 = vst.sshfl [vmem:[#allocation1 + $0x20] sm:$0xff pattern:$0x73625140] %v8232_v42  ;;  %v7486_v40 = vld [vmem:[%s11768_s4 + $0x35c] sm:$0xf0]  ;;  %2353 = vmatpush.bf16.msra.mxu1 %v5341_v39 }
 0x1f7   :  { %v689_v14 = vsel %vm387_vm1, %v684_v7, %v688_v41  ;;  %v5852_v50 = vld [vmem:[%s11768_s4 + $0x540] sm:$0xf]  ;;  %v5597_v41 = vor.u32 %v7486_v40, %v5596_v18 }
 0x1f8   :  { %v690_v17 = vsel %vm389_vm2, %v684_v7, %v689_v14  ;;  %v7382_v35 = vld [vmem:[%s11768_s4 + $0x1c] sm:$0xf0] }
 0x1f9   :  { %v691_v59 = vsel %vm391_vm3, %v684_v7, %v690_v17  ;;  %v7550_v7 = vld [vmem:[%s11768_s4 + $0x55c] sm:$0xf0] }
 0x1fa   :  { %v5853_v14 = vor.u32 %v7550_v7, %v5852_v50  ;;  %v5308_v17 = vld [vmem:[%s11768_s4 + $0x100] sm:$0xf]  ;;  %v7434_v7 = vld [vmem:[%s11768_s4 + $0x1c4] sm:$0xf] }
 0x1fb   :  { %v404_v43 = vpop.permute.xlu0 %403  ;;  %v5436_v30 = vld [vmem:[%s11768_s4 + $0x200] sm:$0xf] }
 0x1fc   :  { %692 = vrot.lane.b32.xlu2 %v691_v59, %s7964_s21  ;;  %407 = vst.msk [vmem:[#allocation2] sm:$0x3] %vm406_vm5, %v404_v43  ;;  %v7414_v59 = vld [vmem:[%s11768_s4 + $0x11c] sm:$0xf0]  ;;  %2379 = vmatpush.bf16.msra.mxu3 %v5853_v14  ;;  %v5406_v14 = vld [vmem:[%s11768_s4 + $0x1e0] sm:$0xf0] }
 0x1fd   :  { %v701_v45 = vld [vmem:[#allocation1 + $0x22] ss:$4 sm:$0xff] }
 0x1fe   :  { %v704_v47 = vrot.slane %v701_v45, 7  ;;  %716 = vst.sshfl [vmem:[#allocation1 + $0x20] sm:$0xff pattern:$0x73625140] %v8232_v42  ;;  %v5564_v43 = vld [vmem:[%s11768_s4 + $0x300] sm:$0xf]  ;;  %v5309_v45 = vor.u32 %v7414_v59, %v5308_v17 }
 0x1ff   :  { %v7446_v37 = vld [vmem:[%s11768_s4 + $0x21c] sm:$0xf0]  ;;  %v7498_v17 = vld [vmem:[%s11768_s4 + $0x3c4] sm:$0xf] }
 0x200   :  { %v705_v46 = vsel %vm385_vm0, %v704_v47, %v698_v23  ;;  %v5660_v23 = vld [vmem:[%s11768_s4 + $0x3c0] sm:$0xf]  ;;  %2354 = vmatpush.bf16.msra.mxu1 %v5309_v45  ;;  %v5437_v18 = vor.u32 %v7446_v37, %v5436_v30  ;;  %v5662_v59 = vld [vmem:[%s11768_s4 + $0x3e0] sm:$0xf0] }
 0x201   :  { %v706_v13 = vsel %vm387_vm1, %v704_v47, %v705_v46  ;;  %v5661_v31 = vor.u32 %v7502_v29, %v5660_v23  ;;  %v5820_v46 = vld [vmem:[%s11768_s4 + $0x500] sm:$0xf]  ;;  %v5665_v45 = vor.u32 %v7498_v17, %v5662_v59  ;;  %v5278_v37 = vld [vmem:[%s11768_s4 + $0xe0] sm:$0xf0] }
 0x202   :  { %v707_v49 = vsel %vm389_vm2, %v704_v47, %v706_v13  ;;  %v7542_v13 = vld [vmem:[%s11768_s4 + $0x51c] sm:$0xf0] }
 0x203   :  { %v708_v24 = vsel %vm391_vm3, %v704_v47, %v707_v49  ;;  %v535_v3 = vpop.permute.xlu0 %534  ;;  %2364 = vmatpush.bf16.msra.mxu2 %v5661_v31  ;;  %v7478_v47 = vld [vmem:[%s11768_s4 + $0x31c] sm:$0xf0] }
 0x204   :  { %709 = vrot.lane.b32.xlu2 %v708_v24, %s7965_s22  ;;  %537 = vst.msk [vmem:[#allocation2 + $0x2] sm:$0x3] %vm406_vm5, %v535_v3  ;;  %v5565_v49 = vor.u32 %v7478_v47, %v5564_v43  ;;  %v5821_v24 = vor.u32 %v7542_v13, %v5820_v46  ;;  %v5428_v3 = vld [vmem:[%s11768_s4 + $0x1d8] sm:$0xf]  ;;  %v7390_v23 = vld [vmem:[%s11768_s4 + $0x5c] sm:$0xf0]  ;;  %v5409_v43 = vor.u32 %v7434_v7, %v5406_v14 }
 0x205   :  { %v718_v48 = vld [vmem:[#allocation1 + $0x22] ss:$4 sm:$0xff]  ;;  %v5213_v29 = vor.u32 %v7390_v23, %v5212_v19 }
 0x206   :  { %v422_v52 = vpop.permute.xlu1 %421  ;;  %v722_v53 = vsel %vm385_vm0, %v718_v48, %v719_v51  ;;  %733 = vst.sshfl [vmem:[#allocation1 + $0x20] sm:$0xff pattern:$0x73625140] %v8232_v42  ;;  %v7441_v51 = vld [vmem:[%s11768_s4 + $0x1f4] sm:$0xf0]  ;;  %2380 = vmatpush.bf16.msra.mxu3 %v5821_v24 }
 0x207   :  { %425 = vst.msk [vmem:[#allocation2] sm:$0x3] %vm424_vm6, %v422_v52  ;;  %v723_v55 = vsel %vm387_vm1, %v718_v48, %v722_v53  ;;  %v5276_v53 = vld [vmem:[%s11768_s4 + $0xc0] sm:$0xf]  ;;  %v5300_v47 = vld [vmem:[%s11768_s4 + $0xd8] sm:$0xf] }
 0x208   :  { %v724_v56 = vsel %vm389_vm2, %v718_v48, %v723_v55  ;;  %v7406_v55 = vld [vmem:[%s11768_s4 + $0xdc] sm:$0xf0]  ;;  %v7409_v46 = vld [vmem:[%s11768_s4 + $0xf4] sm:$0xf0]  ;;  %v7410_v19 = vld [vmem:[%s11768_s4 + $0x104] sm:$0xf] }
 0x209   :  { %v725_v57 = vsel %vm391_vm3, %v718_v48, %v724_v56  ;;  %v5429_v48 = vor.u32 %v7441_v51, %v5428_v3  ;;  %v5277_v56 = vor.u32 %v7406_v55, %v5276_v53  ;;  %v7518_v31 = vld [vmem:[%s11768_s4 + $0x45c] sm:$0xf0]  ;;  %v5301_v13 = vor.u32 %v7409_v46, %v5300_v47  ;;  %v5374_v53 = vld [vmem:[%s11768_s4 + $0x1a0] sm:$0xf0]  ;;  %v5398_v7 = vld [vmem:[%s11768_s4 + $0x1b8] sm:$0xf0] }
 0x20a   :  { %v5725_v33 = vor.u32 %v7518_v31, %v5724_v27  ;;  %v5692_v38 = vld [vmem:[%s11768_s4 + $0x400] sm:$0xf]  ;;  %v7490_v55 = vld [vmem:[%s11768_s4 + $0x384] sm:$0xf] }
 0x20b   :  { %2663 = vmatpush.bf16.msrb.mxu0 %v5429_v48  ;;  %2355 = vmatpush.bf16.msra.mxu1 %v5277_v56  ;;  %v7510_v36 = vld [vmem:[%s11768_s4 + $0x41c] sm:$0xf0]  ;;  %v7426_v48 = vld [vmem:[%s11768_s4 + $0x184] sm:$0xf] }
 0x20c   :  { %726 = vrot.lane.b32.xlu2 %v725_v57, %s7966_s23  ;;  %v440_v20 = vpop.permute.xlu0 %439  ;;  %v5532_v57 = vld [vmem:[%s11768_s4 + $0x2c0] sm:$0xf]  ;;  %v5693_v39 = vor.u32 %v7510_v36, %v5692_v38  ;;  %v5377_v56 = vor.u32 %v7426_v48, %v5374_v53  ;;  %v5566_v27 = vld [vmem:[%s11768_s4 + $0x320] sm:$0xf0]  ;;  %v5366_v48 = vld [vmem:[%s11768_s4 + $0x178] sm:$0xf0] }
 0x20d   :  { %443 = vst.msk [vmem:[#allocation2] sm:$0x3] %vm442_vm7, %v440_v20  ;;  %v735_v58 = vld [vmem:[#allocation1 + $0x23] ss:$4 sm:$0xff] }
 0x20e   :  { %v659_v54 = vpop.permute.xlu1 %658  ;;  %v738_v61 = vrot.slane %v735_v58, 7  ;;  %750 = vst.sshfl [vmem:[#allocation1 + $0x20] sm:$0xff pattern:$0x73625140] %v8232_v42  ;;  %v7470_v20 = vld [vmem:[%s11768_s4 + $0x2dc] sm:$0xf0] }
 0x20f   :  { %661 = vst.msk [vmem:[#allocation2 + $0x4] sm:$0x3] %vm406_vm5, %v659_v54  ;;  %v5788_v58 = vld [vmem:[%s11768_s4 + $0x4c0] sm:$0xf]  ;;  %v5533_v54 = vor.u32 %v7470_v20, %v5532_v57  ;;  %v5630_v57 = vld [vmem:[%s11768_s4 + $0x3a0] sm:$0xf0] }
 0x210   :  { %v739_v62 = vsel %vm385_vm0, %v738_v61, %v732_v2  ;;  %v5629_v2 = vor.u32 %v7494_v34, %v5628_v60  ;;  %v7417_v60 = vld [vmem:[%s11768_s4 + $0x134] sm:$0xf0]  ;;  %v5180_v34 = vld [vmem:[%s11768_s4] sm:$0xf]  ;;  %v5246_v46 = vld [vmem:[%s11768_s4 + $0xa0] sm:$0xf0] }
 0x211   :  { %v740_v22 = vsel %vm387_vm1, %v738_v61, %v739_v62  ;;  %v5396_v62 = vld [vmem:[%s11768_s4 + $0x198] sm:$0xf]  ;;  %v5333_v11 = vor.u32 %v7417_v60, %v5332_v44  ;;  %v6172_v40 = vld [vmem:[%s11768_s4 + $0x7c0] sm:$0xf]  ;;  %v7437_v60 = vld [vmem:[%s11768_s4 + $0x1dc] sm:$0xf] }
 0x212   :  { %v741_v0 = vsel %vm389_vm2, %v738_v61, %v740_v22  ;;  %2365 = vmatpush.bf16.msra.mxu2 %v5629_v2  ;;  %v7433_v22 = vld [vmem:[%s11768_s4 + $0x1b4] sm:$0xf0]  ;;  %v5181_v2 = vor.u32 %v7382_v35, %v5180_v34  ;;  %v7630_v50 = vld [vmem:[%s11768_s4 + $0x7dc] sm:$0xf0] }
 0x213   :  { %v742_v1 = vsel %vm391_vm3, %v738_v61, %v741_v0  ;;  %v7534_v61 = vld [vmem:[%s11768_s4 + $0x4dc] sm:$0xf0]  ;;  %v5397_v0 = vor.u32 %v7433_v22, %v5396_v62  ;;  %v5268_v20 = vld [vmem:[%s11768_s4 + $0x98] sm:$0xf] }
 0x214   :  { %743 = vrot.lane.b32.xlu2 %v742_v1, %s7967_s24  ;;  %v5789_v63 = vor.u32 %v7534_v61, %v5788_v58  ;;  %v5244_v1 = vld [vmem:[%s11768_s4 + $0x80] sm:$0xf]  ;;  %v5633_v58 = vor.u32 %v7490_v55, %v5630_v57  ;;  %v7386_v57 = vld [vmem:[%s11768_s4 + $0x44] sm:$0xf] }
 0x215   :  { %v752_v5 = vld [vmem:[#allocation1 + $0x23] ss:$4 sm:$0xff]  ;;  %2664 = vmatpush.bf16.msrb.mxu0 %v5397_v0 }
 0x216   :  { %v458_v8 = vpop.permute.xlu0 %457  ;;  %v756_v9 = vsel %vm385_vm0, %v752_v5, %v753_v4  ;;  %2366 = vmatpush.bf16.msra.mxu2 %v5597_v41  ;;  %v7398_v4 = vld [vmem:[%s11768_s4 + $0x9c] sm:$0xf0]  ;;  %2381 = vmatpush.bf16.msra.mxu3 %v5789_v63  ;;  %v6173_v41 = vor.u32 %v7630_v50, %v6172_v40  ;;  %v7418_v0 = vld [vmem:[%s11768_s4 + $0x144] sm:$0xf]  ;;  %v7429_v40 = vld [vmem:[%s11768_s4 + $0x19c] sm:$0xf] }
 0x217   :  { %461 = vst.msk [vmem:[#allocation2] sm:$0x3] %vm460_vm8, %v458_v8  ;;  %v757_v42 = vsel %vm387_vm1, %v752_v5, %v756_v9  ;;  %v5245_v8 = vor.u32 %v7398_v4, %v5244_v1  ;;  %v7462_v9 = vld [vmem:[%s11768_s4 + $0x29c] sm:$0xf0]  ;;  %v5342_v1 = vld [vmem:[%s11768_s4 + $0x160] sm:$0xf0]  ;;  %v5401_v17 = vor.u32 %v7429_v40, %v5398_v7 }
 0x218   :  { %v758_v10 = vsel %vm389_vm2, %v752_v5, %v757_v42  ;;  %v5756_v42 = vld [vmem:[%s11768_s4 + $0x480] sm:$0xf]  ;;  %v7482_v4 = vld [vmem:[%s11768_s4 + $0x344] sm:$0xf] }
 0x219   :  { %v759_v28 = vsel %vm391_vm3, %v752_v5, %v758_v10  ;;  %v5500_v5 = vld [vmem:[%s11768_s4 + $0x280] sm:$0xf]  ;;  %2356 = vmatpush.bf16.msra.mxu1 %v5245_v8  ;;  %v5598_v8 = vld [vmem:[%s11768_s4 + $0x360] sm:$0xf0] }
 0x21a   :  { %2367 = vmatpush.bf16.msra.mxu2 %v5565_v49  ;;  %v7526_v10 = vld [vmem:[%s11768_s4 + $0x49c] sm:$0xf0] }
 0x21b   :  { %v6140_v3 = vld [vmem:[%s11768_s4 + $0x780] sm:$0xf] }
 0x21c   :  { %760 = vrot.lane.b32.xlu2 %v759_v28, %s7968_s25  ;;  %v5501_v28 = vor.u32 %v7462_v9, %v5500_v5  ;;  %v7622_v51 = vld [vmem:[%s11768_s4 + $0x79c] sm:$0xf0]  ;;  %v5345_v5 = vor.u32 %v7418_v0, %v5342_v1  ;;  %v5236_v9 = vld [vmem:[%s11768_s4 + $0x58] sm:$0xf] }
 0x21d   :  { %2357 = vmatpush.bf16.msra.mxu1 %v5213_v29  ;;  %v6108_v61 = vld [vmem:[%s11768_s4 + $0x740] sm:$0xf] }
 0x21e   :  { %v552_v6 = vpop.permute.xlu2 %551  ;;  %v476_v12 = vpop.permute.xlu0 %475  ;;  %2368 = vmatpush.bf16.msra.mxu2 %v5533_v54  ;;  %v7401_v54 = vld [vmem:[%s11768_s4 + $0xb4] sm:$0xf0]  ;;  %v7614_v62 = vld [vmem:[%s11768_s4 + $0x75c] sm:$0xf0] }
 0x21f   :  { %554 = vst.msk [vmem:[#allocation2 + $0x2] sm:$0x3] %vm424_vm6, %v552_v6  ;;  %v5757_v6 = vor.u32 %v7526_v10, %v5756_v42  ;;  %v5269_v22 = vor.u32 %v7401_v54, %v5268_v20  ;;  %v6109_v63 = vor.u32 %v7614_v62, %v6108_v61  ;;  %v7393_v42 = vld [vmem:[%s11768_s4 + $0x74] sm:$0xf0]  ;;  %v5601_v10 = vor.u32 %v7482_v4, %v5598_v8  ;;  %v6044_v34 = vld [vmem:[%s11768_s4 + $0x6c0] sm:$0xf] }
 0x220   :  { %479 = vst.msk [vmem:[#allocation2] sm:$0x3] %vm478_vm9, %v476_v12  ;;  %v5364_v12 = vld [vmem:[%s11768_s4 + $0x158] sm:$0xf]  ;;  %v7598_v30 = vld [vmem:[%s11768_s4 + $0x6dc] sm:$0xf0] }
 0x221   :  { %2382 = vmatpush.bf16.msra.mxu3 %v5757_v6  ;;  %2358 = vmatpush.bf16.msra.mxu1 %v5181_v2  ;;  %v7402_v2 = vld [vmem:[%s11768_s4 + $0xc4] sm:$0xf]  ;;  %v6045_v38 = vor.u32 %v7598_v30, %v6044_v34  ;;  %v6012_v59 = vld [vmem:[%s11768_s4 + $0x680] sm:$0xf]  ;;  %v7413_v62 = vld [vmem:[%s11768_s4 + $0x11c] sm:$0xf] }
 0x222   :  { %2369 = vmatpush.bf16.msra.mxu2 %v5501_v28  ;;  %v5237_v28 = vor.u32 %v7393_v42, %v5236_v9  ;;  %v5281_v36 = vor.u32 %v7402_v2, %v5278_v37  ;;  %v7582_v53 = vld [vmem:[%s11768_s4 + $0x65c] sm:$0xf0]  ;;  %v5214_v20 = vld [vmem:[%s11768_s4 + $0x60] sm:$0xf0]  ;;  %v5412_v37 = vld [vmem:[%s11768_s4 + $0x1c8] sm:$0xf] }
 0x223   :  { %v5217_v54 = vor.u32 %v7386_v57, %v5214_v20  ;;  %v5470_v61 = vld [vmem:[%s11768_s4 + $0x260] sm:$0xf0]  ;;  %v5948_v0 = vld [vmem:[%s11768_s4 + $0x600] sm:$0xf] }
 0x224   :  { %v7574_v1 = vld [vmem:[%s11768_s4 + $0x61c] sm:$0xf0]  ;;  %v7378_v4 = vld [vmem:[%s11768_s4 + $0x4] sm:$0xf] }
 0x225   :  { %2383 = vmatpush.bf16.msra.mxu3 %v5725_v33  ;;  %2390 = vmatpush.bf16.msrb.mxu1 %v6173_v41  ;;  %v7385_v33 = vld [vmem:[%s11768_s4 + $0x34] sm:$0xf0]  ;;  %v5182_v8 = vld [vmem:[%s11768_s4 + $0x20] sm:$0xf0] }
 0x226   :  { %v494_v15 = vpop.permute.xlu0 %493  ;;  %v7442_v9 = vld [vmem:[%s11768_s4 + $0x204] sm:$0xf] }
 0x227   :  { %497 = vst.msk [vmem:[#allocation2] sm:$0x3] %vm496_vm10, %v494_v15  ;;  %v7425_v15 = vld [vmem:[%s11768_s4 + $0x174] sm:$0xf0]  ;;  %v5438_v42 = vld [vmem:[%s11768_s4 + $0x220] sm:$0xf0] }
 0x228   :  { %v5365_v16 = vor.u32 %v7425_v15, %v5364_v12  ;;  %v6076_v15 = vld [vmem:[%s11768_s4 + $0x700] sm:$0xf]  ;;  %v7562_v34 = vld [vmem:[%s11768_s4 + $0x5c4] sm:$0xf] }
 0x229   :  { %2384 = vmatpush.bf16.msra.mxu3 %v5693_v39  ;;  %v5534_v39 = vld [vmem:[%s11768_s4 + $0x2e0] sm:$0xf0] }
 0x22a   :  { %2665 = vmatpush.bf16.msrb.mxu0 %v5365_v16  ;;  %v7606_v16 = vld [vmem:[%s11768_s4 + $0x71c] sm:$0xf0]  ;;  %v7626_v30 = vld [vmem:[%s11768_s4 + $0x7c4] sm:$0xf] }
 0x22b   :  { %v6174_v2 = vld [vmem:[%s11768_s4 + $0x7e0] sm:$0xf0] }
 0x22d   :  { %2416 = vmatpush.bf16.msrb.mxu3 %v5665_v45  ;;  %v7394_v45 = vld [vmem:[%s11768_s4 + $0x84] sm:$0xf] }
 0x22e   :  { %v512_v25 = vpop.permute.xlu0 %511  ;;  %2666 = vmatpush.bf16.msrb.mxu0 %v5333_v11  ;;  %v5430_v11 = vld [vmem:[%s11768_s4 + $0x1f8] sm:$0xf0] }
 0x22f   :  { %515 = vst.msk [vmem:[#allocation2] sm:$0x3] %vm514_vm11, %v512_v25  ;;  %v5468_v25 = vld [vmem:[%s11768_s4 + $0x240] sm:$0xf]  ;;  %v5433_v35 = vor.u32 %v7437_v60, %v5430_v11 }
 0x230   :  { %v5469_v32 = vor.u32 %v7454_v21, %v5468_v25  ;;  %v6077_v25 = vor.u32 %v7606_v16, %v6076_v15  ;;  %v7474_v21 = vld [vmem:[%s11768_s4 + $0x304] sm:$0xf]  ;;  %v7405_v15 = vld [vmem:[%s11768_s4 + $0xdc] sm:$0xf] }
 0x231   :  { %2417 = vmatpush.bf16.msrb.mxu3 %v5633_v58  ;;  %v5569_v31 = vor.u32 %v7474_v21, %v5566_v27  ;;  %v7450_v58 = vld [vmem:[%s11768_s4 + $0x244] sm:$0xf]  ;;  %v5302_v16 = vld [vmem:[%s11768_s4 + $0xf8] sm:$0xf0] }
 0x232   :  { %2370 = vmatpush.bf16.msra.mxu2 %v5469_v32  ;;  %2667 = vmatpush.bf16.msrb.mxu0 %v5301_v13  ;;  %v5204_v32 = vld [vmem:[%s11768_s4 + $0x18] sm:$0xf]  ;;  %v7458_v13 = vld [vmem:[%s11768_s4 + $0x284] sm:$0xf]  ;;  %v7389_v21 = vld [vmem:[%s11768_s4 + $0x5c] sm:$0xf] }
 0x233   :  { %v5205_v44 = vor.u32 %v7385_v33, %v5204_v32  ;;  %v5238_v27 = vld [vmem:[%s11768_s4 + $0x78] sm:$0xf0] }
 0x234   :  { %v7381_v33 = vld [vmem:[%s11768_s4 + $0x1c] sm:$0xf] }
 0x235   :  { %2418 = vmatpush.bf16.msrb.mxu3 %v5601_v10 }
 0x236   :  { %2371 = vmatpush.bf16.msra.mxu2 %v5437_v18  ;;  %2668 = vmatpush.bf16.msrb.mxu0 %v5269_v22  ;;  %v778_v23 = vpop.permute.xlu0 %777  ;;  %v7466_v18 = vld [vmem:[%s11768_s4 + $0x2c4] sm:$0xf]  ;;  %v5334_v22 = vld [vmem:[%s11768_s4 + $0x138] sm:$0xf0] }
 0x237   :  { %781 = vst.msk [vmem:[#allocation2 + $0x6] sm:$0x3] %vm780_vm12, %v778_v23  ;;  %v5537_v50 = vor.u32 %v7466_v18, %v5534_v39  ;;  %v5886_v18 = vld [vmem:[%s11768_s4 + $0x5a0] sm:$0xf0] }
 0x239   :  { %2419 = vmatpush.bf16.msrb.mxu3 %v5569_v31  ;;  %v5241_v31 = vor.u32 %v7389_v21, %v5238_v27  ;;  %v6014_v21 = vld [vmem:[%s11768_s4 + $0x6a0] sm:$0xf0]  ;;  %v5252_v27 = vld [vmem:[%s11768_s4 + $0x88] sm:$0xf] }
 0x23a   :  { %2403 = vmatpush.bf16.msrb.mxu2 %v5409_v43  ;;  %2669 = vmatpush.bf16.msrb.mxu0 %v5237_v28  ;;  %v7590_v43 = vld [vmem:[%s11768_s4 + $0x69c] sm:$0xf0]  ;;  %v5949_v28 = vor.u32 %v7574_v1, %v5948_v0  ;;  %v7415_v0 = vld [vmem:[%s11768_s4 + $0x124] sm:$0xf0] }
 0x23b   :  { %v6013_v47 = vor.u32 %v7590_v43, %v6012_v59  ;;  %v7618_v43 = vld [vmem:[%s11768_s4 + $0x784] sm:$0xf] }
 0x23c   :  { %v569_v52 = vpop.permute.xlu1 %568 }
 0x23d   :  { %571 = vst.msk [vmem:[#allocation2 + $0x2] sm:$0x3] %vm442_vm7, %v569_v52  ;;  %v6141_v52 = vor.u32 %v7622_v51, %v6140_v3  ;;  %2420 = vmatpush.bf16.msrb.mxu3 %v5537_v50  ;;  %v7421_v3 = vld [vmem:[%s11768_s4 + $0x15c] sm:$0xf] }
 0x23e   :  { %2404 = vmatpush.bf16.msrb.mxu2 %v5377_v56  ;;  %2670 = vmatpush.bf16.msrb.mxu0 %v5205_v44  ;;  %v5369_v55 = vor.u32 %v7421_v3, %v5366_v48  ;;  %v5206_v44 = vld [vmem:[%s11768_s4 + $0x38] sm:$0xf0]  ;;  %v5854_v48 = vld [vmem:[%s11768_s4 + $0x560] sm:$0xf0] }
 0x23f   :  { %2391 = vmatpush.bf16.msrb.mxu1 %v6141_v52  ;;  %v5980_v52 = vld [vmem:[%s11768_s4 + $0x640] sm:$0xf]  ;;  %v5209_v60 = vor.u32 %v7381_v33, %v5206_v44 }
 0x240   :  { %v5981_v56 = vor.u32 %v7582_v53, %v5980_v52  ;;  %v7610_v52 = vld [vmem:[%s11768_s4 + $0x744] sm:$0xf] }
 0x241   :  { %v6110_v53 = vld [vmem:[%s11768_s4 + $0x760] sm:$0xf0] }
 0x242   :  { %2405 = vmatpush.bf16.msrb.mxu2 %v5345_v5  ;;  %2715 = vmatpush.bf16.msra.mxu0 %v5433_v35  ;;  %v5337_v5 = vor.u32 %v7413_v62, %v5334_v22  ;;  %v5918_v35 = vld [vmem:[%s11768_s4 + $0x5e0] sm:$0xf0]  ;;  %v6113_v20 = vor.u32 %v7610_v52, %v6110_v53  ;;  %v5636_v53 = vld [vmem:[%s11768_s4 + $0x388] sm:$0xf] }
 0x243   :  { %2392 = vmatpush.bf16.msrb.mxu1 %v6109_v63  ;;  %v5473_v63 = vor.u32 %v7450_v58, %v5470_v61  ;;  %v5921_v50 = vor.u32 %v7562_v34, %v5918_v35  ;;  %v5822_v61 = vld [vmem:[%s11768_s4 + $0x520] sm:$0xf0] }
 0x244   :  { %v7602_v62 = vld [vmem:[%s11768_s4 + $0x704] sm:$0xf] }
 0x245   :  { %v6078_v22 = vld [vmem:[%s11768_s4 + $0x720] sm:$0xf0] }
 0x246   :  { %v586_v26 = vpop.permute.xlu1 %585  ;;  %2716 = vmatpush.bf16.msra.mxu0 %v5401_v17  ;;  %v6177_v17 = vor.u32 %v7626_v30, %v6174_v2  ;;  %v7578_v34 = vld [vmem:[%s11768_s4 + $0x644] sm:$0xf]  ;;  %v5220_v30 = vld [vmem:[%s11768_s4 + $0x48] sm:$0xf] }
 0x247   :  { %588 = vst.msk [vmem:[#allocation2 + $0x2] sm:$0x3] %vm460_vm8, %v586_v26  ;;  %v5310_v26 = vld [vmem:[%s11768_s4 + $0x120] sm:$0xf0]  ;;  %2393 = vmatpush.bf16.msrb.mxu1 %v6077_v25  ;;  %v7397_v25 = vld [vmem:[%s11768_s4 + $0x9c] sm:$0xf] }
 0x248   :  { %v5313_v29 = vor.u32 %v7410_v19, %v5310_v26  ;;  %v5305_v19 = vor.u32 %v7405_v15, %v5302_v16  ;;  %v5270_v26 = vld [vmem:[%s11768_s4 + $0xb8] sm:$0xf0]  ;;  %v5982_v35 = vld [vmem:[%s11768_s4 + $0x660] sm:$0xf0]  ;;  %v7391_v2 = vld [vmem:[%s11768_s4 + $0x64] sm:$0xf0] }
 0x24a   :  { %2406 = vmatpush.bf16.msrb.mxu2 %v5313_v29  ;;  %2717 = vmatpush.bf16.msra.mxu0 %v5369_v55  ;;  %v5273_v29 = vor.u32 %v7397_v25, %v5270_v26  ;;  %v5348_v55 = vld [vmem:[%s11768_s4 + $0x148] sm:$0xf]  ;;  %v7522_v25 = vld [vmem:[%s11768_s4 + $0x484] sm:$0xf] }
 0x24b   :  { %2394 = vmatpush.bf16.msrb.mxu1 %v6045_v38  ;;  %v7439_v38 = vld [vmem:[%s11768_s4 + $0x1e4] sm:$0xf0]  ;;  %v5758_v26 = vld [vmem:[%s11768_s4 + $0x4a0] sm:$0xf0] }
 0x24c   :  { %v5413_v59 = vor.u32 %v7439_v38, %v5412_v37  ;;  %v7506_v38 = vld [vmem:[%s11768_s4 + $0x404] sm:$0xf] }
 0x24e   :  { %v676_v49 = vpop.permute.xlu2 %675  ;;  %v603_v24 = vpop.permute.xlu1 %602  ;;  %2407 = vmatpush.bf16.msrb.mxu2 %v5281_v36  ;;  %2718 = vmatpush.bf16.msra.mxu0 %v5337_v5  ;;  %v7554_v36 = vld [vmem:[%s11768_s4 + $0x584] sm:$0xf] }
 0x24f   :  { %678 = vst.msk [vmem:[#allocation2 + $0x4] sm:$0x3] %vm424_vm6, %v676_v49  ;;  %v5249_v49 = vor.u32 %v7394_v45, %v5246_v46  ;;  %2395 = vmatpush.bf16.msrb.mxu1 %v6013_v47  ;;  %v6142_v47 = vld [vmem:[%s11768_s4 + $0x7a0] sm:$0xf0]  ;;  %v5380_v46 = vld [vmem:[%s11768_s4 + $0x188] sm:$0xf] }
 0x250   :  { %605 = vst.msk [vmem:[#allocation2 + $0x2] sm:$0x3] %vm478_vm9, %v603_v24  ;;  %v5502_v24 = vld [vmem:[%s11768_s4 + $0x2a0] sm:$0xf0] }
 0x251   :  { %v5505_v51 = vor.u32 %v7458_v13, %v5502_v24  ;;  %v7431_v13 = vld [vmem:[%s11768_s4 + $0x1a4] sm:$0xf0]  ;;  %v6145_v24 = vor.u32 %v7618_v43, %v6142_v47  ;;  %v5790_v5 = vld [vmem:[%s11768_s4 + $0x4e0] sm:$0xf0] }
 0x252   :  { %2408 = vmatpush.bf16.msrb.mxu2 %v5249_v49  ;;  %2719 = vmatpush.bf16.msra.mxu0 %v5305_v19  ;;  %v5889_v49 = vor.u32 %v7554_v36, %v5886_v18  ;;  %v5381_v3 = vor.u32 %v7431_v13, %v5380_v46  ;;  %v5985_v36 = vor.u32 %v7578_v34, %v5982_v35  ;;  %v7503_v43 = vld [vmem:[%s11768_s4 + $0x3e4] sm:$0xf0] }
 0x253   :  { %2421 = vmatpush.bf16.msrb.mxu3 %v5505_v51  ;;  %2396 = vmatpush.bf16.msrb.mxu1 %v5981_v56  ;;  %v7546_v51 = vld [vmem:[%s11768_s4 + $0x544] sm:$0xf]  ;;  %v7423_v56 = vld [vmem:[%s11768_s4 + $0x164] sm:$0xf0]  ;;  %v5221_v18 = vor.u32 %v7391_v2, %v5220_v30 }
 0x254   :  { %v5857_v57 = vor.u32 %v7546_v51, %v5854_v48  ;;  %v5349_v58 = vor.u32 %v7423_v56, %v5348_v55  ;;  %v5924_v47 = vld [vmem:[%s11768_s4 + $0x5c8] sm:$0xf] }
 0x255   :  { %v7567_v46 = vld [vmem:[%s11768_s4 + $0x5e4] sm:$0xf0] }
 0x256   :  { %v693_v6 = vpop.permute.xlu2 %692  ;;  %v620_v12 = vpop.permute.xlu1 %619  ;;  %2409 = vmatpush.bf16.msrb.mxu2 %v5217_v54  ;;  %2720 = vmatpush.bf16.msra.mxu0 %v5273_v29  ;;  %v7538_v54 = vld [vmem:[%s11768_s4 + $0x504] sm:$0xf]  ;;  %v5925_v52 = vor.u32 %v7567_v46, %v5924_v47  ;;  %v7495_v56 = vld [vmem:[%s11768_s4 + $0x3a4] sm:$0xf0] }
 0x257   :  { %695 = vst.msk [vmem:[#allocation2 + $0x4] sm:$0x3] %vm442_vm7, %v693_v6  ;;  %v5185_v6 = vor.u32 %v7378_v4, %v5182_v8  ;;  %2422 = vmatpush.bf16.msrb.mxu3 %v5473_v63  ;;  %2397 = vmatpush.bf16.msrb.mxu1 %v5949_v28  ;;  %v5316_v63 = vld [vmem:[%s11768_s4 + $0x108] sm:$0xf]  ;;  %v5825_v1 = vor.u32 %v7538_v54, %v5822_v61  ;;  %v7530_v4 = vld [vmem:[%s11768_s4 + $0x4c4] sm:$0xf] }
 0x258   :  { %622 = vst.msk [vmem:[#allocation2 + $0x2] sm:$0x3] %vm496_vm10, %v620_v12  ;;  %v5441_v12 = vor.u32 %v7442_v9, %v5438_v42  ;;  %v6081_v8 = vor.u32 %v7602_v62, %v6078_v22  ;;  %v5317_v9 = vor.u32 %v7415_v0, %v5316_v63  ;;  %v7594_v42 = vld [vmem:[%s11768_s4 + $0x6c4] sm:$0xf]  ;;  %v5284_v28 = vld [vmem:[%s11768_s4 + $0xc8] sm:$0xf]  ;;  %v5793_v15 = vor.u32 %v7530_v4, %v5790_v5 }
 0x259   :  { %v7586_v29 = vld [vmem:[%s11768_s4 + $0x684] sm:$0xf]  ;;  %v7623_v54 = vld [vmem:[%s11768_s4 + $0x7a4] sm:$0xf0]  ;;  %v5637_v61 = vor.u32 %v7495_v56, %v5636_v53  ;;  %v5414_v56 = vld [vmem:[%s11768_s4 + $0x1e8] sm:$0xf0] }
 0x25a   :  { %2410 = vmatpush.bf16.msrb.mxu2 %v5185_v6  ;;  %2721 = vmatpush.bf16.msra.mxu0 %v5241_v31  ;;  %v7399_v31 = vld [vmem:[%s11768_s4 + $0xa4] sm:$0xf0]  ;;  %v6017_v33 = vor.u32 %v7586_v29, %v6014_v21 }
 0x25b   :  { %2423 = vmatpush.bf16.msrb.mxu3 %v5441_v12  ;;  %v7407_v12 = vld [vmem:[%s11768_s4 + $0xe4] sm:$0xf0]  ;;  %v5253_v44 = vor.u32 %v7399_v31, %v5252_v27 }
 0x25c   :  { %v5604_v22 = vld [vmem:[%s11768_s4 + $0x348] sm:$0xf] }
 0x25d   :  { %v7487_v0 = vld [vmem:[%s11768_s4 + $0x364] sm:$0xf0] }
 0x25e   :  { %v710_v41 = vpop.permute.xlu2 %709  ;;  %v637_v14 = vpop.permute.xlu1 %636  ;;  %2722 = vmatpush.bf16.msra.mxu0 %v5209_v60  ;;  %v7514_v60 = vld [vmem:[%s11768_s4 + $0x444] sm:$0xf]  ;;  %v7551_v4 = vld [vmem:[%s11768_s4 + $0x564] sm:$0xf0] }
 0x25f   :  { %712 = vst.msk [vmem:[#allocation2 + $0x4] sm:$0x3] %vm460_vm8, %v710_v41  ;;  %v6116_v5 = vld [vmem:[%s11768_s4 + $0x748] sm:$0xf] }
 0x260   :  { %639 = vst.msk [vmem:[#allocation2 + $0x2] sm:$0x3] %vm514_vm11, %v637_v14  ;;  %v5540_v29 = vld [vmem:[%s11768_s4 + $0x2c8] sm:$0xf] }
 0x261   :  { %v7471_v27 = vld [vmem:[%s11768_s4 + $0x2e4] sm:$0xf0] }
 0x262   :  { %v5796_v31 = vld [vmem:[%s11768_s4 + $0x4c8] sm:$0xf] }
 0x263   :  { %v5508_v34 = vld [vmem:[%s11768_s4 + $0x288] sm:$0xf] }
 0x264   :  { %v7463_v30 = vld [vmem:[%s11768_s4 + $0x2a4] sm:$0xf0] }
 0x265   :  { %v5764_v2 = vld [vmem:[%s11768_s4 + $0x488] sm:$0xf] }
 0x266   :  { %v727_v10 = vpop.permute.xlu2 %726  ;;  %v7583_v47 = vld [vmem:[%s11768_s4 + $0x664] sm:$0xf0] }
 0x267   :  { %729 = vst.msk [vmem:[#allocation2 + $0x4] sm:$0x3] %vm478_vm9, %v727_v10  ;;  %v6046_v10 = vld [vmem:[%s11768_s4 + $0x6e0] sm:$0xf0]  ;;  %v7575_v53 = vld [vmem:[%s11768_s4 + $0x624] sm:$0xf0] }
 0x268   :  { %v6049_v19 = vor.u32 %v7594_v42, %v6046_v10  ;;  %v5572_v10 = vld [vmem:[%s11768_s4 + $0x308] sm:$0xf] }
 0x26e   :  { %v744_v23 = vpop.permute.xlu2 %743 }
 0x26f   :  { %746 = vst.msk [vmem:[#allocation2 + $0x4] sm:$0x3] %vm496_vm10, %v744_v23  ;;  %v5285_v23 = vor.u32 %v7407_v12, %v5284_v28  ;;  %v5828_v12 = vld [vmem:[%s11768_s4 + $0x508] sm:$0xf] }
 0x276   :  { %v761_v32 = vpop.permute.xlu2 %760 }
 0x277   :  { %763 = vst.msk [vmem:[#allocation2 + $0x4] sm:$0x3] %vm514_vm11, %v761_v32  ;;  %v5761_v32 = vor.u32 %v7522_v25, %v5758_v26 }
 0x27e   :  { %v782_v11 = vld [vmem:[#allocation2] sm:$0xff] }
 0x27f   :  { %784 = vst [vmem:[#allocation1] ss:$4 sm:$0xff] %v782_v11  ;;  %v5726_v11 = vld [vmem:[%s11768_s4 + $0x460] sm:$0xf0] }
 0x280   :  { %v5729_v37 = vor.u32 %v7514_v60, %v5726_v11  ;;  %v5541_v60 = vor.u32 %v7471_v27, %v5540_v29  ;;  %v5862_v29 = vld [vmem:[%s11768_s4 + $0x568] sm:$0xf0] }
 0x286   :  { %v785_v39 = vld.sshfl [vmem:[#allocation1] sm:$0xff pattern:$0x73625140]  ;;  %v786_v40 = vld.sshfl [vmem:[#allocation1 + $0x8] sm:$0xff pattern:$0x73625140] }
 0x287   :  { %v8815_v7 = vpack.c.bf16 %v785_v39, %v785_v39  ;;  %v8817_v41 = vpack.c.bf16 %v786_v40, %v786_v40  ;;  %v787_v14 = vld.sshfl [vmem:[#allocation1 + $0x10] sm:$0xff pattern:$0x73625140]  ;;  %v788_v6 = vld.sshfl [vmem:[#allocation1 + $0x18] sm:$0xff pattern:$0x73625140] }
 0x288   :  { %v8822_v45 = vpack.c.bf16 %v787_v14, %v787_v14  ;;  %v8891_v16 = vpack.c.bf16 %v788_v6, %v788_v6  ;;  %v5694_v39 = vld [vmem:[%s11768_s4 + $0x420] sm:$0xf0]  ;;  %v5188_v14 = vld [vmem:[%s11768_s4 + $0x8] sm:$0xf] }
 0x289   :  { %2359 = vmatmul.bf16.vlgmr.msra.gmra.mxu1 %v8815_v7  ;;  %2372 = vmatmul.bf16.vlgmr.msra.gmra.mxu2 %v8817_v41  ;;  %v7570_v40 = vld [vmem:[%s11768_s4 + $0x604] sm:$0xf]  ;;  %v5697_v13 = vor.u32 %v7506_v38, %v5694_v39  ;;  %v7479_v6 = vld [vmem:[%s11768_s4 + $0x324] sm:$0xf0] }
 0x28a   :  { %2385 = vmatmul.bf16.vlgmr.msra.gmra.mxu3 %v8822_v45  ;;  %2429 = vmatpush.bf16.msra.mxu1 %v5921_v50  ;;  %v5950_v50 = vld [vmem:[%s11768_s4 + $0x620] sm:$0xf0]  ;;  %v5573_v25 = vor.u32 %v7479_v6, %v5572_v10  ;;  %v6020_v38 = vld [vmem:[%s11768_s4 + $0x688] sm:$0xf]  ;;  %v5894_v10 = vld [vmem:[%s11768_s4 + $0x5a8] sm:$0xf0] }
 0x28b   :  { %2442 = vmatpush.bf16.msra.mxu2 %v6177_v17  ;;  %2455 = vmatpush.bf16.msra.mxu3 %v5413_v59  ;;  %v7383_v17 = vld [vmem:[%s11768_s4 + $0x24] sm:$0xf0] }
 0x28c   :  { %2671 = vmatmul.bf16.vlgmr.msrb.gmra.mxu0 %v8815_v7  ;;  %v5668_v59 = vld [vmem:[%s11768_s4 + $0x3c8] sm:$0xf]  ;;  %v5189_v51 = vor.u32 %v7383_v17, %v5188_v14 }
 0x28d   :  { %v5669_v48 = vor.u32 %v7503_v43, %v5668_v59  ;;  %v7455_v14 = vld [vmem:[%s11768_s4 + $0x264] sm:$0xf0] }
 0x28e   :  { %2430 = vmatpush.bf16.msra.mxu1 %v5889_v49  ;;  %v6180_v49 = vld [vmem:[%s11768_s4 + $0x7c8] sm:$0xf] }
 0x28f   :  { %2443 = vmatpush.bf16.msra.mxu2 %v6145_v24  ;;  %2456 = vmatpush.bf16.msra.mxu3 %v5381_v3  ;;  %v7631_v24 = vld [vmem:[%s11768_s4 + $0x7e4] sm:$0xf0]  ;;  %v5953_v3 = vor.u32 %v7570_v40, %v5950_v50 }
 0x290   :  { %v6181_v55 = vor.u32 %v7631_v24, %v6180_v49  ;;  %v5476_v40 = vld [vmem:[%s11768_s4 + $0x248] sm:$0xf] }
 0x291   :  { %v5732_v17 = vld [vmem:[%s11768_s4 + $0x448] sm:$0xf]  ;;  %v5477_v46 = vor.u32 %v7455_v14, %v5476_v40  ;;  %v5798_v40 = vld [vmem:[%s11768_s4 + $0x4e8] sm:$0xf0] }
 0x292   :  { %2431 = vmatpush.bf16.msra.mxu1 %v5857_v57  ;;  %v5892_v57 = vld [vmem:[%s11768_s4 + $0x588] sm:$0xf] }
 0x293   :  { %2444 = vmatpush.bf16.msra.mxu2 %v6113_v20  ;;  %2457 = vmatpush.bf16.msra.mxu3 %v5349_v58  ;;  %v7559_v20 = vld [vmem:[%s11768_s4 + $0x5a4] sm:$0xf0] }
 0x294   :  { %v6148_v58 = vld [vmem:[%s11768_s4 + $0x788] sm:$0xf]  ;;  %v5893_v62 = vor.u32 %v7559_v20, %v5892_v57  ;;  %v7499_v57 = vld [vmem:[%s11768_s4 + $0x3cc] sm:$0xf] }
 0x295   :  { %v6149_v63 = vor.u32 %v7623_v54, %v6148_v58  ;;  %v7519_v59 = vld [vmem:[%s11768_s4 + $0x464] sm:$0xf0]  ;;  %v5670_v20 = vld [vmem:[%s11768_s4 + $0x3e8] sm:$0xf0] }
 0x296   :  { %2432 = vmatpush.bf16.msra.mxu1 %v5825_v1  ;;  %v5860_v1 = vld [vmem:[%s11768_s4 + $0x548] sm:$0xf]  ;;  %v7563_v58 = vld [vmem:[%s11768_s4 + $0x5cc] sm:$0xf] }
 0x297   :  { %2445 = vmatpush.bf16.msra.mxu2 %v6081_v8  ;;  %2458 = vmatpush.bf16.msra.mxu3 %v5317_v9  ;;  %v7615_v8 = vld [vmem:[%s11768_s4 + $0x764] sm:$0xf0]  ;;  %v5605_v9 = vor.u32 %v7487_v0, %v5604_v22  ;;  %v5861_v42 = vor.u32 %v7551_v4, %v5860_v1  ;;  %v5926_v54 = vld [vmem:[%s11768_s4 + $0x5e8] sm:$0xf0]  ;;  %v5673_v0 = vor.u32 %v7499_v57, %v5670_v20 }
 0x298   :  { %v6117_v28 = vor.u32 %v7615_v8, %v6116_v5  ;;  %v5988_v43 = vld [vmem:[%s11768_s4 + $0x648] sm:$0xf]  ;;  %v5929_v1 = vor.u32 %v7563_v58, %v5926_v54  ;;  %v7427_v4 = vld [vmem:[%s11768_s4 + $0x18c] sm:$0xf] }
 0x299   :  { %2398 = vmatmul.bf16.vlgmr.msrb.gmra.mxu1 %v8891_v16  ;;  %2411 = vmatmul.bf16.vlgmr.msrb.gmra.mxu2 %v8815_v7  ;;  %v5444_v49 = vld [vmem:[%s11768_s4 + $0x208] sm:$0xf]  ;;  %v5382_v5 = vld [vmem:[%s11768_s4 + $0x1a8] sm:$0xf0] }
 0x29a   :  { %2424 = vmatmul.bf16.vlgmr.msrb.gmra.mxu3 %v8817_v41  ;;  %2433 = vmatpush.bf16.msra.mxu1 %v5793_v15  ;;  %v7543_v15 = vld [vmem:[%s11768_s4 + $0x524] sm:$0xf0]  ;;  %v7491_v8 = vld [vmem:[%s11768_s4 + $0x38c] sm:$0xf] }
 0x29b   :  { %2446 = vmatpush.bf16.msra.mxu2 %v6049_v19  ;;  %2459 = vmatpush.bf16.msra.mxu3 %v5285_v23  ;;  %v6084_v19 = vld [vmem:[%s11768_s4 + $0x708] sm:$0xf]  ;;  %v5829_v26 = vor.u32 %v7543_v15, %v5828_v12  ;;  %v7419_v15 = vld [vmem:[%s11768_s4 + $0x14c] sm:$0xf] }
 0x29c   :  { %2723 = vmatmul.bf16.vlgmr.msra.gmra.mxu0 %v8815_v7  ;;  %v7607_v23 = vld [vmem:[%s11768_s4 + $0x724] sm:$0xf0]  ;;  %v5734_v57 = vld [vmem:[%s11768_s4 + $0x468] sm:$0xf0] }
 0x29d   :  { %v6085_v21 = vor.u32 %v7607_v23, %v6084_v19  ;;  %v7447_v24 = vld [vmem:[%s11768_s4 + $0x224] sm:$0xf0]  ;;  %v5350_v19 = vld [vmem:[%s11768_s4 + $0x168] sm:$0xf0] }
 0x29e   :  { %2434 = vmatpush.bf16.msra.mxu1 %v5761_v32  ;;  %v7535_v32 = vld [vmem:[%s11768_s4 + $0x4e4] sm:$0xf0]  ;;  %v7483_v23 = vld [vmem:[%s11768_s4 + $0x34c] sm:$0xf] }
 0x29f   :  { %2447 = vmatpush.bf16.msra.mxu2 %v6017_v33  ;;  %2460 = vmatpush.bf16.msra.mxu3 %v5253_v44  ;;  %v6052_v33 = vld [vmem:[%s11768_s4 + $0x6c8] sm:$0xf]  ;;  %v5797_v11 = vor.u32 %v7535_v32, %v5796_v31  ;;  %v7411_v32 = vld [vmem:[%s11768_s4 + $0x10c] sm:$0xf] }
 0x2a0   :  { %v7599_v44 = vld [vmem:[%s11768_s4 + $0x6e4] sm:$0xf0]  ;;  %v7379_v58 = vld [vmem:[%s11768_s4 + $0xc] sm:$0xf] }
 0x2a1   :  { %v6053_v35 = vor.u32 %v7599_v44, %v6052_v33  ;;  %v5318_v33 = vld [vmem:[%s11768_s4 + $0x128] sm:$0xf0] }
 0x2a2   :  { %2435 = vmatpush.bf16.msra.mxu1 %v5729_v37  ;;  %v7527_v37 = vld [vmem:[%s11768_s4 + $0x4a4] sm:$0xf0]  ;;  %v7475_v44 = vld [vmem:[%s11768_s4 + $0x30c] sm:$0xf] }
 0x2a3   :  { %2448 = vmatpush.bf16.msra.mxu2 %v5985_v36  ;;  %2461 = vmatpush.bf16.msra.mxu3 %v5221_v18  ;;  %v7591_v36 = vld [vmem:[%s11768_s4 + $0x6a4] sm:$0xf0]  ;;  %v5509_v18 = vor.u32 %v7463_v30, %v5508_v34  ;;  %v5765_v39 = vor.u32 %v7527_v37, %v5764_v2  ;;  %v5830_v34 = vld [vmem:[%s11768_s4 + $0x528] sm:$0xf0] }
 0x2a4   :  { %v6021_v50 = vor.u32 %v7591_v36, %v6020_v38  ;;  %v7403_v37 = vld [vmem:[%s11768_s4 + $0xcc] sm:$0xf] }
 0x2a5   :  { %v5286_v38 = vld [vmem:[%s11768_s4 + $0xe8] sm:$0xf0] }
 0x2a6   :  { %2436 = vmatpush.bf16.msra.mxu1 %v5697_v13  ;;  %v5733_v13 = vor.u32 %v7519_v59, %v5732_v17  ;;  %v7467_v36 = vld [vmem:[%s11768_s4 + $0x2cc] sm:$0xf] }
 0x2a7   :  { %2449 = vmatpush.bf16.msra.mxu2 %v5953_v3  ;;  %2462 = vmatpush.bf16.msra.mxu3 %v5189_v51  ;;  %v5700_v3 = vld [vmem:[%s11768_s4 + $0x408] sm:$0xf]  ;;  %v5989_v51 = vor.u32 %v7583_v47, %v5988_v43  ;;  %v7395_v59 = vld [vmem:[%s11768_s4 + $0x8c] sm:$0xf] }
 0x2a8   :  { %v5254_v43 = vld [vmem:[%s11768_s4 + $0xa8] sm:$0xf0] }
 0x2a9   :  { %2437 = vmatmul.bf16.vlgmr.msra.gmra.mxu1 %v8822_v45  ;;  %v7459_v47 = vld [vmem:[%s11768_s4 + $0x28c] sm:$0xf] }
 0x2aa   :  { %2468 = vmatpush.bf16.msrb.mxu1 %v5669_v48  ;;  %2450 = vmatmul.bf16.vlgmr.msra.gmra.mxu2 %v8891_v16  ;;  %v7511_v48 = vld [vmem:[%s11768_s4 + $0x424] sm:$0xf0] }
 0x2ab   :  { %2481 = vmatpush.bf16.msrb.mxu2 %v5925_v52  ;;  %2494 = vmatpush.bf16.msrb.mxu3 %v6181_v55  ;;  %v5956_v52 = vld [vmem:[%s11768_s4 + $0x608] sm:$0xf]  ;;  %v7435_v55 = vld [vmem:[%s11768_s4 + $0x1cc] sm:$0xf] }
 0x2ac   :  { %2463 = vmatmul.bf16.vlgmr.msra.gmra.mxu3 %v8815_v7  ;;  %v5957_v22 = vor.u32 %v7575_v53, %v5956_v52  ;;  %v5222_v52 = vld [vmem:[%s11768_s4 + $0x68] sm:$0xf0] }
 0x2ad   :  { %v7451_v53 = vld [vmem:[%s11768_s4 + $0x24c] sm:$0xf] }
 0x2ae   :  { %2469 = vmatpush.bf16.msrb.mxu1 %v5637_v61  ;;  %v5445_v61 = vor.u32 %v7447_v24, %v5444_v49  ;;  %v5766_v49 = vld [vmem:[%s11768_s4 + $0x4a8] sm:$0xf0]  ;;  %v5257_v24 = vor.u32 %v7395_v59, %v5254_v43  ;;  %v6284_v59 = vld [vmem:[%s11770_s6 + $0xa0] sm:$0xf]  ;;  %v7656_v43 = vld [vmem:[%s11770_s6 + $0xac] sm:$0xf0] }
 0x2af   :  { %2482 = vmatpush.bf16.msrb.mxu2 %v5893_v62  ;;  %2495 = vmatpush.bf16.msrb.mxu3 %v6149_v63  ;;  %v5701_v62 = vor.u32 %v7511_v48, %v5700_v3  ;;  %v5417_v63 = vor.u32 %v7435_v55, %v5414_v56  ;;  %v7387_v48 = vld [vmem:[%s11768_s4 + $0x4c] sm:$0xf] }
 0x2b0   :  { %v5478_v55 = vld [vmem:[%s11768_s4 + $0x268] sm:$0xf0]  ;;  %v5225_v20 = vor.u32 %v7387_v48, %v5222_v52 }
 0x2b1   :  { %v7515_v56 = vld [vmem:[%s11768_s4 + $0x44c] sm:$0xf]  ;;  %v5481_v54 = vor.u32 %v7451_v53, %v5478_v55 }
 0x2b2   :  { %2470 = vmatpush.bf16.msrb.mxu1 %v5605_v9  ;;  %v5638_v9 = vld [vmem:[%s11768_s4 + $0x3a8] sm:$0xf0] }
 0x2b3   :  { %2483 = vmatpush.bf16.msrb.mxu2 %v5861_v42  ;;  %2496 = vmatpush.bf16.msrb.mxu3 %v6117_v28  ;;  %v7555_v42 = vld [vmem:[%s11768_s4 + $0x58c] sm:$0xf]  ;;  %v5385_v28 = vor.u32 %v7427_v4, %v5382_v5  ;;  %v5641_v6 = vor.u32 %v7491_v8, %v5638_v9  ;;  %v5420_v8 = vld [vmem:[%s11768_s4 + $0x1d0] sm:$0xf] }
 0x2b4   :  { %v5897_v12 = vor.u32 %v7555_v42, %v5894_v10  ;;  %v7627_v4 = vld [vmem:[%s11768_s4 + $0x7cc] sm:$0xf]  ;;  %v7440_v9 = vld [vmem:[%s11768_s4 + $0x1ec] sm:$0xf0] }
 0x2b5   :  { %v6182_v5 = vld [vmem:[%s11768_s4 + $0x7e8] sm:$0xf0]  ;;  %v5676_v10 = vld [vmem:[%s11768_s4 + $0x3d0] sm:$0xf] }
 0x2b6   :  { %2471 = vmatpush.bf16.msrb.mxu1 %v5573_v25  ;;  %v5606_v25 = vld [vmem:[%s11768_s4 + $0x368] sm:$0xf0] }
 0x2b7   :  { %2484 = vmatpush.bf16.msrb.mxu2 %v5829_v26  ;;  %2497 = vmatpush.bf16.msrb.mxu3 %v6085_v21  ;;  %v7547_v26 = vld [vmem:[%s11768_s4 + $0x54c] sm:$0xf]  ;;  %v5353_v21 = vor.u32 %v7419_v15, %v5350_v19  ;;  %v5609_v27 = vor.u32 %v7483_v23, %v5606_v25  ;;  %v6185_v15 = vor.u32 %v7627_v4, %v6182_v5  ;;  %v5260_v5 = vld [vmem:[%s11768_s4 + $0x90] sm:$0xf] }
 0x2b8   :  { %v5865_v31 = vor.u32 %v7547_v26, %v5862_v29  ;;  %v5421_v19 = vor.u32 %v7440_v9, %v5420_v8  ;;  %v7619_v23 = vld [vmem:[%s11768_s4 + $0x78c] sm:$0xf]  ;;  %v5388_v26 = vld [vmem:[%s11768_s4 + $0x190] sm:$0xf] }
 0x2b9   :  { %v6150_v25 = vld [vmem:[%s11768_s4 + $0x7a8] sm:$0xf0]  ;;  %v7400_v9 = vld [vmem:[%s11768_s4 + $0xac] sm:$0xf0] }
 0x2ba   :  { %2472 = vmatpush.bf16.msrb.mxu1 %v5541_v60  ;;  %v5574_v60 = vld [vmem:[%s11768_s4 + $0x328] sm:$0xf0] }
 0x2bb   :  { %2485 = vmatpush.bf16.msrb.mxu2 %v5797_v11  ;;  %2498 = vmatpush.bf16.msrb.mxu3 %v6053_v35  ;;  %v7539_v11 = vld [vmem:[%s11768_s4 + $0x50c] sm:$0xf]  ;;  %v5321_v35 = vor.u32 %v7411_v32, %v5318_v33  ;;  %v5577_v30 = vor.u32 %v7475_v44, %v5574_v60  ;;  %v5644_v32 = vld [vmem:[%s11768_s4 + $0x390] sm:$0xf]  ;;  %v6153_v60 = vor.u32 %v7619_v23, %v6150_v25  ;;  %v6236_v25 = vld [vmem:[%s11770_s6 + $0x40] sm:$0xf] }
 0x2bc   :  { %v5833_v2 = vor.u32 %v7539_v11, %v5830_v34  ;;  %v7496_v33 = vld [vmem:[%s11768_s4 + $0x3ac] sm:$0xf0]  ;;  %v7611_v34 = vld [vmem:[%s11768_s4 + $0x74c] sm:$0xf] }
 0x2bd   :  { %v7595_v53 = vld [vmem:[%s11768_s4 + $0x6cc] sm:$0xf] }
 0x2be   :  { %2473 = vmatpush.bf16.msrb.mxu1 %v5509_v18  ;;  %v5542_v18 = vld [vmem:[%s11768_s4 + $0x2e8] sm:$0xf0] }
 0x2bf   :  { %2486 = vmatpush.bf16.msrb.mxu2 %v5765_v39  ;;  %2499 = vmatpush.bf16.msrb.mxu3 %v6021_v50  ;;  %v7531_v39 = vld [vmem:[%s11768_s4 + $0x4cc] sm:$0xf]  ;;  %v5289_v50 = vor.u32 %v7403_v37, %v5286_v38  ;;  %v5545_v14 = vor.u32 %v7467_v36, %v5542_v18  ;;  %v7424_v37 = vld [vmem:[%s11768_s4 + $0x16c] sm:$0xf0]  ;;  %v6300_v38 = vld [vmem:[%s11770_s6 + $0xc0] sm:$0xf] }
 0x2c0   :  { %v5801_v17 = vor.u32 %v7531_v39, %v5798_v40  ;;  %v7660_v36 = vld [vmem:[%s11770_s6 + $0xcc] sm:$0xf0]  ;;  %v6054_v55 = vld [vmem:[%s11768_s4 + $0x6e8] sm:$0xf0] }
 0x2c1   :  { %v5612_v18 = vld [vmem:[%s11768_s4 + $0x350] sm:$0xf]  ;;  %v6301_v40 = vor.u32 %v7660_v36, %v6300_v38  ;;  %v6022_v4 = vld [vmem:[%s11768_s4 + $0x6a8] sm:$0xf0] }
 0x2c2   :  { %2474 = vmatpush.bf16.msrb.mxu1 %v5477_v46  ;;  %v5510_v46 = vld [vmem:[%s11768_s4 + $0x2a8] sm:$0xf0]  ;;  %v7488_v39 = vld [vmem:[%s11768_s4 + $0x36c] sm:$0xf0] }
 0x2c3   :  { %2487 = vmatpush.bf16.msrb.mxu2 %v5733_v13  ;;  %2500 = vmatpush.bf16.msrb.mxu3 %v5989_v51  ;;  %v7523_v13 = vld [vmem:[%s11768_s4 + $0x48c] sm:$0xf]  ;;  %v5513_v3 = vor.u32 %v7459_v47, %v5510_v46  ;;  %v5613_v47 = vor.u32 %v7488_v39, %v5612_v18  ;;  %v7384_v36 = vld [vmem:[%s11768_s4 + $0x2c] sm:$0xf0] }
 0x2c4   :  { %v5769_v51 = vor.u32 %v7523_v13, %v5766_v49  ;;  %v6086_v46 = vld [vmem:[%s11768_s4 + $0x728] sm:$0xf0]  ;;  %v5324_v13 = vld [vmem:[%s11768_s4 + $0x110] sm:$0xf] }
 0x2c5   :  { %v7416_v49 = vld [vmem:[%s11768_s4 + $0x12c] sm:$0xf0]  ;;  %v7579_v23 = vld [vmem:[%s11768_s4 + $0x64c] sm:$0xf] }
 0x2c6   :  { %2475 = vmatpush.bf16.msrb.mxu1 %v5445_v61  ;;  %v5737_v61 = vor.u32 %v7515_v56, %v5734_v57  ;;  %v5325_v52 = vor.u32 %v7416_v49, %v5324_v13  ;;  %v5292_v56 = vld [vmem:[%s11768_s4 + $0xd0] sm:$0xf] }
 0x2c7   :  { %2488 = vmatpush.bf16.msrb.mxu2 %v5701_v62  ;;  %2501 = vmatpush.bf16.msrb.mxu3 %v5957_v22  ;;  %v5190_v62 = vld [vmem:[%s11768_s4 + $0x28] sm:$0xf0]  ;;  %v5452_v18 = vld [vmem:[%s11768_s4 + $0x210] sm:$0xf] }
 0x2c8   :  { %v7443_v22 = vld [vmem:[%s11768_s4 + $0x20c] sm:$0xf]  ;;  %v5193_v42 = vor.u32 %v7379_v58, %v5190_v62  ;;  %v6268_v58 = vld [vmem:[%s11770_s6 + $0x80] sm:$0xf]  ;;  %v7472_v62 = vld [vmem:[%s11768_s4 + $0x2ec] sm:$0xf0] }
 0x2c9   :  { %2476 = vmatmul.bf16.vlgmr.msrb.gmra.mxu1 %v8817_v41  ;;  %v7448_v39 = vld [vmem:[%s11768_s4 + $0x22c] sm:$0xf0] }
 0x2ca   :  { %2507 = vmatpush.bf16.msra.mxu1 %v5417_v63  ;;  %2489 = vmatmul.bf16.vlgmr.msrb.gmra.mxu2 %v8822_v45  ;;  %v5446_v63 = vld [vmem:[%s11768_s4 + $0x228] sm:$0xf0]  ;;  %v5453_v49 = vor.u32 %v7448_v39, %v5452_v18  ;;  %v5772_v18 = vld [vmem:[%s11768_s4 + $0x490] sm:$0xf] }
 0x2cb   :  { %2520 = vmatpush.bf16.msra.mxu2 %v5673_v0  ;;  %2533 = vmatpush.bf16.msra.mxu3 %v5929_v1  ;;  %v7507_v0 = vld [vmem:[%s11768_s4 + $0x40c] sm:$0xf]  ;;  %v7528_v39 = vld [vmem:[%s11768_s4 + $0x4ac] sm:$0xf0] }
 0x2cc   :  { %2502 = vmatmul.bf16.vlgmr.msrb.gmra.mxu3 %v8891_v16  ;;  %v5702_v1 = vld [vmem:[%s11768_s4 + $0x428] sm:$0xf0] }
 0x2ce   :  { %2508 = vmatpush.bf16.msra.mxu1 %v5385_v28  ;;  %v7504_v28 = vld [vmem:[%s11768_s4 + $0x3ec] sm:$0xf0] }
 0x2cf   :  { %2521 = vmatpush.bf16.msra.mxu2 %v5641_v6  ;;  %2534 = vmatpush.bf16.msra.mxu3 %v5897_v12  ;;  %v5449_v6 = vor.u32 %v7443_v22, %v5446_v63  ;;  %v5705_v12 = vor.u32 %v7507_v0, %v5702_v1  ;;  %v5677_v29 = vor.u32 %v7504_v28, %v5676_v10  ;;  %v7587_v1 = vld [vmem:[%s11768_s4 + $0x68c] sm:$0xf]  ;;  %v7648_v10 = vld [vmem:[%s11770_s6 + $0x6c] sm:$0xf0] }
 0x2d0   :  { %v6057_v63 = vor.u32 %v7595_v53, %v6054_v55  ;;  %v5516_v28 = vld [vmem:[%s11768_s4 + $0x290] sm:$0xf] }
 0x2d1   :  { %v6156_v53 = vld [vmem:[%s11768_s4 + $0x790] sm:$0xf] }
 0x2d2   :  { %2509 = vmatpush.bf16.msra.mxu1 %v5353_v21  ;;  %v7432_v21 = vld [vmem:[%s11768_s4 + $0x1ac] sm:$0xf0] }
 0x2d3   :  { %2522 = vmatpush.bf16.msra.mxu2 %v5609_v27  ;;  %2535 = vmatpush.bf16.msra.mxu3 %v5865_v31  ;;  %v6316_v27 = vld [vmem:[%s11770_s6 + $0xe0] sm:$0xf]  ;;  %v7664_v31 = vld [vmem:[%s11770_s6 + $0xec] sm:$0xf0]  ;;  %v5389_v11 = vor.u32 %v7432_v21, %v5388_v26  ;;  %v5990_v21 = vld [vmem:[%s11768_s4 + $0x668] sm:$0xf0] }
 0x2d4   :  { %v6317_v44 = vor.u32 %v7664_v31, %v6316_v27  ;;  %v7644_v26 = vld [vmem:[%s11770_s6 + $0x4c] sm:$0xf0] }
 0x2d5   :  { %v5228_v27 = vld [vmem:[%s11768_s4 + $0x50] sm:$0xf] }
 0x2d6   :  { %2510 = vmatpush.bf16.msra.mxu1 %v5321_v35  ;;  %v6118_v35 = vld [vmem:[%s11768_s4 + $0x768] sm:$0xf0]  ;;  %4329 = vmatpush.bf16.msrb.mxu0 %v6317_v44  ;;  %v7392_v31 = vld [vmem:[%s11768_s4 + $0x6c] sm:$0xf0] }
 0x2d7   :  { %2523 = vmatpush.bf16.msra.mxu2 %v5577_v30  ;;  %2536 = vmatpush.bf16.msra.mxu3 %v5833_v2  ;;  %v5356_v30 = vld [vmem:[%s11768_s4 + $0x150] sm:$0xf]  ;;  %v5645_v2 = vor.u32 %v7496_v33, %v5644_v32  ;;  %v7571_v44 = vld [vmem:[%s11768_s4 + $0x60c] sm:$0xf] }
 0x2d8   :  { %v5484_v32 = vld [vmem:[%s11768_s4 + $0x250] sm:$0xf] }
 0x2d9   :  { %v7456_v33 = vld [vmem:[%s11768_s4 + $0x26c] sm:$0xf0] }
 0x2da   :  { %2511 = vmatpush.bf16.msra.mxu1 %v5289_v50  ;;  %v6121_v50 = vor.u32 %v7611_v34, %v6118_v35  ;;  %4330 = vmatpush.bf16.msrb.mxu0 %v6301_v40  ;;  %v5993_v34 = vor.u32 %v7579_v23, %v5990_v21  ;;  %v5229_v35 = vor.u32 %v7392_v31, %v5228_v27  ;;  %v5932_v40 = vld [vmem:[%s11768_s4 + $0x5d0] sm:$0xf]  ;;  %v7412_v23 = vld [vmem:[%s11768_s4 + $0x114] sm:$0xf] }
 0x2db   :  { %2524 = vmatpush.bf16.msra.mxu2 %v5545_v14  ;;  %2537 = vmatpush.bf16.msra.mxu3 %v5801_v17  ;;  %v5357_v14 = vor.u32 %v7424_v37, %v5356_v30  ;;  %v7603_v17 = vld [vmem:[%s11768_s4 + $0x70c] sm:$0xf]  ;;  %v5196_v30 = vld [vmem:[%s11768_s4 + $0x10] sm:$0xf]  ;;  %v5485_v38 = vor.u32 %v7456_v33, %v5484_v32 }
 0x2dc   :  { %v6089_v48 = vor.u32 %v7603_v17, %v6086_v46  ;;  %v7640_v37 = vld [vmem:[%s11770_s6 + $0x2c] sm:$0xf0]  ;;  %v5197_v13 = vor.u32 %v7384_v36, %v5196_v30 }
 0x2dd   :  { %v7632_v17 = vld [vmem:[%s11768_s4 + $0x7ec] sm:$0xf0] }
 0x2de   :  { %2512 = vmatpush.bf16.msra.mxu1 %v5257_v24  ;;  %v5580_v24 = vld [vmem:[%s11768_s4 + $0x310] sm:$0xf] }
 0x2df   :  { %2525 = vmatpush.bf16.msra.mxu2 %v5513_v3  ;;  %2538 = vmatpush.bf16.msra.mxu3 %v5769_v51  ;;  %v7480_v3 = vld [vmem:[%s11768_s4 + $0x32c] sm:$0xf0]  ;;  %v6285_v51 = vor.u32 %v7656_v43, %v6284_v59  ;;  %v7436_v59 = vld [vmem:[%s11768_s4 + $0x1d4] sm:$0xf] }
 0x2e0   :  { %v5581_v57 = vor.u32 %v7480_v3, %v5580_v24  ;;  %v5422_v43 = vld [vmem:[%s11768_s4 + $0x1f0] sm:$0xf0]  ;;  %v5900_v3 = vld [vmem:[%s11768_s4 + $0x590] sm:$0xf] }
 0x2e1   :  { %4331 = vmatpush.bf16.msrb.mxu0 %v6285_v51  ;;  %v7560_v51 = vld [vmem:[%s11768_s4 + $0x5ac] sm:$0xf0] }
 0x2e2   :  { %2513 = vmatpush.bf16.msra.mxu1 %v5225_v20  ;;  %v7408_v20 = vld [vmem:[%s11768_s4 + $0xec] sm:$0xf0] }
 0x2e3   :  { %2526 = vmatpush.bf16.msra.mxu2 %v5481_v54  ;;  %2539 = vmatpush.bf16.msra.mxu3 %v5737_v61  ;;  %v7652_v54 = vld [vmem:[%s11770_s6 + $0x8c] sm:$0xf0]  ;;  %v5293_v0 = vor.u32 %v7408_v20, %v5292_v56  ;;  %v7428_v56 = vld [vmem:[%s11768_s4 + $0x194] sm:$0xf]  ;;  %v6204_v20 = vld [vmem:[%s11770_s6] sm:$0xf] }
 0x2e4   :  { %v5548_v61 = vld [vmem:[%s11768_s4 + $0x2d0] sm:$0xf]  ;;  %v6269_v22 = vor.u32 %v7652_v54, %v6268_v58 }
 0x2e5   :  { %v5549_v8 = vor.u32 %v7472_v62, %v5548_v61  ;;  %v7624_v55 = vld [vmem:[%s11768_s4 + $0x7ac] sm:$0xf0]  ;;  %v5901_v61 = vor.u32 %v7560_v51, %v5900_v3 }
 0x2e6   :  { %2514 = vmatpush.bf16.msra.mxu1 %v5193_v42  ;;  %v6252_v42 = vld [vmem:[%s11770_s6 + $0x60] sm:$0xf]  ;;  %4332 = vmatpush.bf16.msrb.mxu0 %v6269_v22  ;;  %v7636_v58 = vld [vmem:[%s11770_s6 + $0xc] sm:$0xf0]  ;;  %v6157_v62 = vor.u32 %v7624_v55, %v6156_v53  ;;  %v7388_v53 = vld [vmem:[%s11768_s4 + $0x54] sm:$0xf] }
 0x2e7   :  { %2527 = vmatpush.bf16.msra.mxu2 %v5449_v6  ;;  %2540 = vmatpush.bf16.msra.mxu3 %v5705_v12  ;;  %v7464_v6 = vld [vmem:[%s11768_s4 + $0x2ac] sm:$0xf0]  ;;  %v6253_v12 = vor.u32 %v7648_v10, %v6252_v42  ;;  %v6205_v54 = vor.u32 %v7636_v58, %v6204_v20  ;;  %v5230_v55 = vld [vmem:[%s11768_s4 + $0x70] sm:$0xf0] }
 0x2e8   :  { %v5804_v32 = vld [vmem:[%s11768_s4 + $0x4d0] sm:$0xf] }
 0x2e9   :  { %2515 = vmatmul.bf16.vlgmr.msra.gmra.mxu1 %v8815_v7  ;;  %v7536_v33 = vld [vmem:[%s11768_s4 + $0x4ec] sm:$0xf0] }
 0x2ea   :  { %2546 = vmatpush.bf16.msrb.mxu1 %v6185_v15  ;;  %2528 = vmatmul.bf16.vlgmr.msra.gmra.mxu2 %v8817_v41  ;;  %v6025_v15 = vor.u32 %v7587_v1, %v6022_v4  ;;  %v6124_v1 = vld [vmem:[%s11768_s4 + $0x750] sm:$0xf] }
 0x2eb   :  { %2559 = vmatpush.bf16.msrb.mxu2 %v5421_v19  ;;  %2572 = vmatpush.bf16.msrb.mxu3 %v5677_v29  ;;  %v5261_v19 = vor.u32 %v7400_v9, %v5260_v5  ;;  %v5517_v29 = vor.u32 %v7464_v6, %v5516_v28  ;;  %v7616_v4 = vld [vmem:[%s11768_s4 + $0x76c] sm:$0xf0]  ;;  %v7420_v5 = vld [vmem:[%s11768_s4 + $0x154] sm:$0xf] }
 0x2ec   :  { %2541 = vmatmul.bf16.vlgmr.msra.gmra.mxu3 %v8822_v45  ;;  %4333 = vmatpush.bf16.msrb.mxu0 %v6253_v12  ;;  %v6125_v42 = vor.u32 %v7616_v4, %v6124_v1  ;;  %v5836_v28 = vld [vmem:[%s11768_s4 + $0x510] sm:$0xf]  ;;  %v7380_v4 = vld [vmem:[%s11768_s4 + $0x14] sm:$0xf] }
 0x2ed   :  { %v7544_v6 = vld [vmem:[%s11768_s4 + $0x52c] sm:$0xf0] }
 0x2ee   :  { %2547 = vmatpush.bf16.msrb.mxu1 %v6153_v60  ;;  %v5958_v60 = vld [vmem:[%s11768_s4 + $0x628] sm:$0xf0]  ;;  %v6092_v12 = vld [vmem:[%s11768_s4 + $0x710] sm:$0xf] }
 0x2ef   :  { %2560 = vmatpush.bf16.msrb.mxu2 %v5389_v11  ;;  %2573 = vmatpush.bf16.msrb.mxu3 %v5645_v2  ;;  %v6237_v11 = vor.u32 %v7644_v26, %v6236_v25  ;;  %v6220_v2 = vld [vmem:[%s11770_s6 + $0x20] sm:$0xf]  ;;  %v5961_v46 = vor.u32 %v7571_v44, %v5958_v60  ;;  %v5326_v25 = vld [vmem:[%s11768_s4 + $0x130] sm:$0xf0]  ;;  %v6060_v44 = vld [vmem:[%s11768_s4 + $0x6d0] sm:$0xf] }
 0x2f0   :  { %v9518_v26 = vld [vmem:[%s11769_s5] sm:$0xff]  ;;  %v5329_v31 = vor.u32 %v7412_v23, %v5326_v25  ;;  %v7600_v60 = vld [vmem:[%s11768_s4 + $0x6ec] sm:$0xf0] }
 0x2f1   :  { %4334 = vmatpush.bf16.msrb.mxu0 %v6237_v11  ;;  %v7404_v11 = vld [vmem:[%s11768_s4 + $0xd4] sm:$0xf]  ;;  %v5740_v3 = vld [vmem:[%s11768_s4 + $0x450] sm:$0xf] }
 0x2f2   :  { %2548 = vmatpush.bf16.msrb.mxu1 %v6121_v50  ;;  %v7568_v50 = vld [vmem:[%s11768_s4 + $0x5ec] sm:$0xf0] }
 0x2f3   :  { %2561 = vmatpush.bf16.msrb.mxu2 %v5357_v14  ;;  %2574 = vmatpush.bf16.msrb.mxu3 %v5613_v47  ;;  %v6188_v14 = vld [vmem:[%s11768_s4 + $0x7d0] sm:$0xf]  ;;  %v6221_v47 = vor.u32 %v7640_v37, %v6220_v2  ;;  %v5933_v24 = vor.u32 %v7568_v50, %v5932_v40  ;;  %v5805_v2 = vor.u32 %v7536_v33, %v5804_v32  ;;  %v7492_v33 = vld [vmem:[%s11768_s4 + $0x394] sm:$0xf] }
 0x2f4   :  { %v6028_v40 = vld [vmem:[%s11768_s4 + $0x690] sm:$0xf] }
 0x2f5   :  { %4335 = vmatpush.bf16.msrb.mxu0 %v6221_v47  ;;  %v5773_v47 = vor.u32 %v7528_v39, %v5772_v18  ;;  %v7520_v51 = vld [vmem:[%s11768_s4 + $0x46c] sm:$0xf0] }
 0x2f6   :  { %2549 = vmatpush.bf16.msrb.mxu1 %v6089_v48  ;;  %v6189_v48 = vor.u32 %v7632_v17, %v6188_v14  ;;  %v7592_v14 = vld [vmem:[%s11768_s4 + $0x6ac] sm:$0xf0]  ;;  %v7396_v17 = vld [vmem:[%s11768_s4 + $0x94] sm:$0xf] }
 0x2f7   :  { %2562 = vmatpush.bf16.msrb.mxu2 %v5325_v52  ;;  %2575 = vmatpush.bf16.msrb.mxu3 %v5581_v57  ;;  %v5425_v52 = vor.u32 %v7436_v59, %v5422_v43  ;;  %v5390_v57 = vld [vmem:[%s11768_s4 + $0x1b0] sm:$0xf0]  ;;  %v5708_v20 = vld [vmem:[%s11768_s4 + $0x410] sm:$0xf] }
 0x2f8   :  { %v5393_v22 = vor.u32 %v7428_v56, %v5390_v57  ;;  %v5262_v59 = vld [vmem:[%s11768_s4 + $0xb0] sm:$0xf0]  ;;  %v5741_v57 = vor.u32 %v7520_v51, %v5740_v3 }
 0x2f9   :  { %4336 = vmatpush.bf16.msrb.mxu0 %v6205_v54  ;;  %v7476_v51 = vld [vmem:[%s11768_s4 + $0x314] sm:$0xf] }
 0x2fa   :  { %2550 = vmatpush.bf16.msrb.mxu1 %v6057_v63  ;;  %v5868_v63 = vld [vmem:[%s11768_s4 + $0x550] sm:$0xf] }
 0x2fb   :  { %2563 = vmatpush.bf16.msrb.mxu2 %v5293_v0  ;;  %2576 = vmatpush.bf16.msrb.mxu3 %v5549_v8  ;;  %v7552_v0 = vld [vmem:[%s11768_s4 + $0x56c] sm:$0xf0]  ;;  %v5358_v8 = vld [vmem:[%s11768_s4 + $0x170] sm:$0xf0] }
 0x2fc   :  { %v5869_v9 = vor.u32 %v7552_v0, %v5868_v63  ;;  %v5361_v10 = vor.u32 %v7420_v5, %v5358_v8  ;;  %v5964_v63 = vld [vmem:[%s11768_s4 + $0x610] sm:$0xf]  ;;  %v5198_v5 = vld [vmem:[%s11768_s4 + $0x30] sm:$0xf0] }
 0x2fd   :  { %v7576_v0 = vld [vmem:[%s11768_s4 + $0x62c] sm:$0xf0]  ;;  %v7500_v8 = vld [vmem:[%s11768_s4 + $0x3d4] sm:$0xf] }
 0x2fe   :  { %2551 = vmatpush.bf16.msrb.mxu1 %v6025_v15  ;;  %v5965_v25 = vor.u32 %v7576_v0, %v5964_v63  ;;  %v5550_v0 = vld [vmem:[%s11768_s4 + $0x2f0] sm:$0xf0] }
 0x2ff   :  { %2564 = vmatpush.bf16.msrb.mxu2 %v5261_v19  ;;  %2577 = vmatpush.bf16.msrb.mxu3 %v5517_v29  ;;  %v7608_v19 = vld [vmem:[%s11768_s4 + $0x72c] sm:$0xf0]  ;;  %v5837_v29 = vor.u32 %v7544_v6, %v5836_v28  ;;  %v5934_v28 = vld [vmem:[%s11768_s4 + $0x5f0] sm:$0xf0] }
 0x300   :  { %v6093_v27 = vor.u32 %v7608_v19, %v6092_v12  ;;  %v7628_v12 = vld [vmem:[%s11768_s4 + $0x7d4] sm:$0xf] }
 0x302   :  { %2552 = vmatpush.bf16.msrb.mxu1 %v5993_v34  ;;  %v5294_v34 = vld [vmem:[%s11768_s4 + $0xf0] sm:$0xf0] }
 0x303   :  { %2565 = vmatpush.bf16.msrb.mxu2 %v5229_v35  ;;  %2578 = vmatpush.bf16.msrb.mxu3 %v5485_v38  ;;  %v1055_v35 = vperm.slane %v9518_v26, 0  ;;  %v6061_v38 = vor.u32 %v7600_v60, %v6060_v44  ;;  %v5297_v36 = vor.u32 %v7404_v11, %v5294_v34  ;;  %v5646_v60 = vld [vmem:[%s11768_s4 + $0x3b0] sm:$0xf0] }
 0x304   :  { %v7556_v11 = vld [vmem:[%s11768_s4 + $0x594] sm:$0xf]  ;;  %v5649_v39 = vor.u32 %v7492_v33, %v5646_v60 }
 0x305   :  { %v5902_v34 = vld [vmem:[%s11768_s4 + $0x5b0] sm:$0xf0] }
 0x306   :  { %2553 = vmatpush.bf16.msrb.mxu1 %v5961_v46  ;;  %v2360_v15 = vpop.f32.mrf.mxu1  ;;  %v7452_v60 = vld [vmem:[%s11768_s4 + $0x254] sm:$0xf] }
 0x307   :  { %2566 = vmatpush.bf16.msrb.mxu2 %v5197_v13  ;;  %2579 = vmatpush.bf16.msrb.mxu3 %v5453_v49  ;;  %v2361_v43 = vadd.f32 %v2360_v15, %v1055_v35  ;;  %v6029_v49 = vor.u32 %v7592_v14, %v6028_v40  ;;  %v6190_v15 = vld [vmem:[%s11768_s4 + $0x7f0] sm:$0xf0]  ;;  %v5905_v40 = vor.u32 %v7556_v11, %v5902_v34 }
 0x308   :  { %v6193_v44 = vor.u32 %v7628_v12, %v6190_v15  ;;  %v7524_v12 = vld [vmem:[%s11768_s4 + $0x494] sm:$0xf] }
 0x309   :  { %2554 = vmatmul.bf16.vlgmr.msrb.gmra.mxu1 %v8891_v16  ;;  %v9520_v21 = vpop.f32.mrf.mxu0  ;;  %v5774_v15 = vld [vmem:[%s11768_s4 + $0x4b0] sm:$0xf0] }
 0x30a   :  { %2585 = vmatpush.bf16.msra.mxu1 %v5933_v24  ;;  %2567 = vmatmul.bf16.vlgmr.msrb.gmra.mxu2 %v8815_v7  ;;  %v5265_v24 = vor.u32 %v7396_v17, %v5262_v59  ;;  %v5614_v59 = vld [vmem:[%s11768_s4 + $0x370] sm:$0xf0] }
 0x30b   :  { %2598 = vmatpush.bf16.msra.mxu2 %v6189_v48  ;;  %2611 = vmatpush.bf16.msra.mxu3 %v5425_v52  ;;  %v5996_v48 = vld [vmem:[%s11768_s4 + $0x650] sm:$0xf]  ;;  %v5486_v34 = vld [vmem:[%s11768_s4 + $0x270] sm:$0xf0] }
 0x30c   :  { %2580 = vmatmul.bf16.vlgmr.msrb.gmra.mxu3 %v8817_v41  ;;  %v2373_v30 = vpop.f32.mrf.mxu2  ;;  %v7584_v52 = vld [vmem:[%s11768_s4 + $0x66c] sm:$0xf0] }
 0x30d   :  { %v2386_v37 = vpop.f32.mrf.mxu3  ;;  %v2374_v46 = vadd.f32 %v2373_v30, %v2361_v43  ;;  %v7620_v30 = vld [vmem:[%s11768_s4 + $0x794] sm:$0xf] }
 0x30e   :  { %2586 = vmatpush.bf16.msra.mxu1 %v5901_v61  ;;  %v2362_v50 = vpop.f32.mrf.mxu1  ;;  %v5997_v61 = vor.u32 %v7584_v52, %v5996_v48  ;;  %v7548_v43 = vld [vmem:[%s11768_s4 + $0x554] sm:$0xf] }
 0x30f   :  { %2599 = vmatpush.bf16.msra.mxu2 %v6157_v62  ;;  %2612 = vmatpush.bf16.msra.mxu3 %v5393_v22  ;;  %v2387_v58 = vadd.f32 %v2386_v37, %v2374_v46  ;;  %v5233_v62 = vor.u32 %v7388_v53, %v5230_v55  ;;  %v7512_v22 = vld [vmem:[%s11768_s4 + $0x42c] sm:$0xf0]  ;;  %v7484_v50 = vld [vmem:[%s11768_s4 + $0x354] sm:$0xf] }
 0x310   :  { %v5709_v6 = vor.u32 %v7512_v22, %v5708_v20  ;;  %v7612_v46 = vld [vmem:[%s11768_s4 + $0x754] sm:$0xf] }
 0x311   :  { %v2674_v13 = vpop.f32.mrf.mxu0  ;;  %v5582_v48 = vld [vmem:[%s11768_s4 + $0x330] sm:$0xf0] }
 0x312   :  { %2587 = vmatpush.bf16.msra.mxu1 %v5869_v9  ;;  %v6126_v13 = vld [vmem:[%s11768_s4 + $0x770] sm:$0xf0] }
 0x313   :  { %2600 = vmatpush.bf16.msra.mxu2 %v6125_v42  ;;  %2613 = vmatpush.bf16.msra.mxu3 %v5361_v10  ;;  %v5678_v42 = vld [vmem:[%s11768_s4 + $0x3f0] sm:$0xf0] }
 0x314   :  { %v2375_v56 = vpop.f32.mrf.mxu2  ;;  %v7564_v10 = vld [vmem:[%s11768_s4 + $0x5d4] sm:$0xf] }
 0x315   :  { %v2388_v54 = vpop.f32.mrf.mxu3  ;;  %v5937_v32 = vor.u32 %v7564_v10, %v5934_v28  ;;  %v7540_v52 = vld [vmem:[%s11768_s4 + $0x514] sm:$0xf] }
 0x316   :  { %2588 = vmatpush.bf16.msra.mxu1 %v5837_v29  ;;  %v2399_v1 = vpop.f32.mrf.mxu1  ;;  %v5201_v29 = vor.u32 %v7380_v4, %v5198_v5  ;;  %v5838_v53 = vld [vmem:[%s11768_s4 + $0x530] sm:$0xf0]  ;;  %v5585_v54 = vor.u32 %v7476_v51, %v5582_v48  ;;  %v6196_v51 = vld [vmem:[%s11768_s4 + $0x7d8] sm:$0xf] }
 0x317   :  { %2601 = vmatpush.bf16.msra.mxu2 %v6093_v27  ;;  %2614 = vmatpush.bf16.msra.mxu3 %v5329_v31  ;;  %v2400_v9 = vadd.f32 %v2399_v1, %v2387_v58  ;;  %v1056_v27 = vperm.slane %v9518_v26, 1  ;;  %v5681_v31 = vor.u32 %v7500_v8, %v5678_v42  ;;  %v7604_v56 = vld [vmem:[%s11768_s4 + $0x714] sm:$0xf] }
 0x318   :  { %v7532_v1 = vld [vmem:[%s11768_s4 + $0x4d4] sm:$0xf] }
 0x319   :  { %v2767_v19 = vmax.f32 %v2400_v9, 0.0  ;;  %v9613_v23 = vpop.f32.mrf.mxu0  ;;  %v5806_v4 = vld [vmem:[%s11768_s4 + $0x4f0] sm:$0xf0] }
 0x31a   :  { %2589 = vmatpush.bf16.msra.mxu1 %v5805_v2  ;;  %v6158_v2 = vld [vmem:[%s11768_s4 + $0x7b0] sm:$0xf0]  ;;  %v5809_v42 = vor.u32 %v7532_v1, %v5806_v4  ;;  %v5620_v4 = vld [vmem:[%s11768_s4 + $0x358] sm:$0xf] }
 0x31b   :  { %2602 = vmatpush.bf16.msra.mxu2 %v6061_v38  ;;  %2615 = vmatpush.bf16.msra.mxu3 %v5297_v36  ;;  %v9634_v37 = vpack.c.bf16 %v2767_v19, %v2767_v19  ;;  %v6161_v17 = vor.u32 %v7620_v30, %v6158_v2  ;;  %v7596_v5 = vld [vmem:[%s11768_s4 + $0x6d4] sm:$0xf] }
 0x31c   :  { %v2412_v35 = vpop.f32.mrf.mxu2  ;;  %v6062_v8 = vld [vmem:[%s11768_s4 + $0x6f0] sm:$0xf0] }
 0x31d   :  { %v2413_v38 = vadd.f32 %v2412_v35, %v1056_v27  ;;  %v2425_v36 = vpop.f32.mrf.mxu3  ;;  %4337 = vmatmul.bf16.vlgmr.msrb.gmra.mxu0 %v9634_v37  ;;  %v7460_v10 = vld [vmem:[%s11768_s4 + $0x294] sm:$0xf]  ;;  %v6065_v28 = vor.u32 %v7596_v5, %v6062_v8  ;;  %v7489_v5 = vld [vmem:[%s11768_s4 + $0x374] sm:$0xf0] }
 0x31e   :  { %2590 = vmatpush.bf16.msra.mxu1 %v5773_v47  ;;  %v2401_v18 = vpop.f32.mrf.mxu1  ;;  %v5870_v47 = vld [vmem:[%s11768_s4 + $0x570] sm:$0xf0]  ;;  %v5876_v8 = vld [vmem:[%s11768_s4 + $0x558] sm:$0xf] }
 0x31f   :  { %2603 = vmatpush.bf16.msra.mxu2 %v6029_v49  ;;  %2616 = vmatpush.bf16.msra.mxu3 %v5265_v24  ;;  %v2426_v14 = vadd.f32 %v2425_v36, %v2413_v38  ;;  %v5617_v24 = vor.u32 %v7484_v50, %v5614_v59  ;;  %v5873_v3 = vor.u32 %v7548_v43, %v5870_v47  ;;  %v7588_v19 = vld [vmem:[%s11768_s4 + $0x694] sm:$0xf]  ;;  %v5684_v47 = vld [vmem:[%s11768_s4 + $0x3d8] sm:$0xf] }
 0x320   :  { %v7516_v35 = vld [vmem:[%s11768_s4 + $0x454] sm:$0xf]  ;;  %v5489_v36 = vor.u32 %v7452_v60, %v5486_v34 }
 0x321   :  { %v2726_v49 = vpop.f32.mrf.mxu0  ;;  %v5742_v30 = vld [vmem:[%s11768_s4 + $0x470] sm:$0xf0] }
 0x322   :  { %2591 = vmatpush.bf16.msra.mxu1 %v5741_v57  ;;  %v6094_v57 = vld [vmem:[%s11768_s4 + $0x730] sm:$0xf0]  ;;  %v5745_v18 = vor.u32 %v7516_v35, %v5742_v30 }
 0x323   :  { %2604 = vmatpush.bf16.msra.mxu2 %v5997_v61  ;;  %2617 = vmatpush.bf16.msra.mxu3 %v5233_v62  ;;  %v5841_v61 = vor.u32 %v7540_v52, %v5838_v53  ;;  %v7468_v62 = vld [vmem:[%s11768_s4 + $0x2d4] sm:$0xf]  ;;  %v6097_v63 = vor.u32 %v7604_v56, %v6094_v57 }
 0x324   :  { %v2414_v55 = vpop.f32.mrf.mxu2  ;;  %v5553_v9 = vor.u32 %v7468_v62, %v5550_v0  ;;  %v7580_v2 = vld [vmem:[%s11768_s4 + $0x654] sm:$0xf]  ;;  %v6164_v62 = vld [vmem:[%s11768_s4 + $0x798] sm:$0xf] }
 0x325   :  { %v2427_v20 = vpop.f32.mrf.mxu3  ;;  %v5998_v38 = vld [vmem:[%s11768_s4 + $0x670] sm:$0xf0] }
 0x326   :  { %2592 = vmatpush.bf16.msra.mxu1 %v5709_v6  ;;  %v2438_v58 = vpop.f32.mrf.mxu1  ;;  %v5518_v6 = vld [vmem:[%s11768_s4 + $0x2b0] sm:$0xf0]  ;;  %v5652_v20 = vld [vmem:[%s11768_s4 + $0x398] sm:$0xf] }
 0x327   :  { %2605 = vmatpush.bf16.msra.mxu2 %v5965_v25  ;;  %2618 = vmatpush.bf16.msra.mxu3 %v5201_v29  ;;  %v2439_v22 = vadd.f32 %v2438_v58, %v2426_v14  ;;  %v6030_v25 = vld [vmem:[%s11768_s4 + $0x6b0] sm:$0xf0]  ;;  %v5521_v33 = vor.u32 %v7460_v10, %v5518_v6  ;;  %v6001_v14 = vor.u32 %v7580_v2, %v5998_v38  ;;  %v7497_v58 = vld [vmem:[%s11768_s4 + $0x3b4] sm:$0xf0] }
 0x328   :  { %v6033_v11 = vor.u32 %v7588_v19, %v6030_v25  ;;  %v7508_v50 = vld [vmem:[%s11768_s4 + $0x414] sm:$0xf]  ;;  %v7617_v10 = vld [vmem:[%s11768_s4 + $0x774] sm:$0xf0]  ;;  %v5621_v6 = vor.u32 %v7489_v5, %v5620_v4 }
 0x329   :  { %2593 = vmatmul.bf16.vlgmr.msra.gmra.mxu1 %v8822_v45  ;;  %v7572_v59 = vld [vmem:[%s11768_s4 + $0x614] sm:$0xf]  ;;  %v5588_v19 = vld [vmem:[%s11768_s4 + $0x318] sm:$0xf] }
 0x32a   :  { %2624 = vmatpush.bf16.msrb.mxu1 %v5681_v31  ;;  %2606 = vmatmul.bf16.vlgmr.msra.gmra.mxu2 %v8891_v16  ;;  %v5966_v43 = vld [vmem:[%s11768_s4 + $0x630] sm:$0xf0]  ;;  %v7481_v25 = vld [vmem:[%s11768_s4 + $0x334] sm:$0xf0] }
 0x32b   :  { %2637 = vmatpush.bf16.msrb.mxu2 %v5937_v32  ;;  %2650 = vmatpush.bf16.msrb.mxu3 %v6193_v44  ;;  %v5777_v44 = vor.u32 %v7524_v12, %v5774_v15  ;;  %v5969_v53 = vor.u32 %v7572_v59, %v5966_v43  ;;  %v5556_v2 = vld [vmem:[%s11768_s4 + $0x2d8] sm:$0xf] }
 0x32c   :  { %2619 = vmatmul.bf16.vlgmr.msra.gmra.mxu3 %v8815_v7  ;;  %v6129_v7 = vor.u32 %v7612_v46, %v6126_v13  ;;  %v7505_v46 = vld [vmem:[%s11768_s4 + $0x3f4] sm:$0xf0] }
 0x32d   :  { %v2451_v29 = vpop.f32.mrf.mxu2  ;;  %v5940_v13 = vld [vmem:[%s11768_s4 + $0x5d8] sm:$0xf]  ;;  %v5685_v55 = vor.u32 %v7505_v46, %v5684_v47 }
 0x32e   :  { %2625 = vmatpush.bf16.msrb.mxu1 %v5649_v39  ;;  %v9714_v31 = vadd.f32 %v2451_v29, %v2439_v22  ;;  %v2440_v32 = vpop.f32.mrf.mxu1  ;;  %v7444_v39 = vld [vmem:[%s11768_s4 + $0x214] sm:$0xf]  ;;  %v7625_v22 = vld [vmem:[%s11768_s4 + $0x7b4] sm:$0xf0] }
 0x32f   :  { %2638 = vmatpush.bf16.msrb.mxu2 %v5905_v40  ;;  %2651 = vmatpush.bf16.msrb.mxu3 %v6161_v17  ;;  %v9712_v27 = vpop.f32.mrf.mxu3  ;;  %v5454_v40 = vld [vmem:[%s11768_s4 + $0x230] sm:$0xf0]  ;;  %v6165_v1 = vor.u32 %v7625_v22, %v6164_v62  ;;  %v5844_v29 = vld [vmem:[%s11768_s4 + $0x518] sm:$0xf] }
 0x330   :  { %v5710_v17 = vld [vmem:[%s11768_s4 + $0x430] sm:$0xf0]  ;;  %v5457_v48 = vor.u32 %v7444_v39, %v5454_v40  ;;  %v7545_v32 = vld [vmem:[%s11768_s4 + $0x534] sm:$0xf0] }
 0x331   :  { %v5713_v52 = vor.u32 %v7508_v50, %v5710_v17  ;;  %v5845_v35 = vor.u32 %v7545_v32, %v5844_v29  ;;  %v7473_v38 = vld [vmem:[%s11768_s4 + $0x2f4] sm:$0xf0] }
 0x332   :  { %2626 = vmatpush.bf16.msrb.mxu1 %v5617_v24  ;;  %v6068_v39 = vld [vmem:[%s11768_s4 + $0x6d8] sm:$0xf]  ;;  %v5557_v50 = vor.u32 %v7473_v38, %v5556_v2  ;;  %v6812_v2 = vld [vmem:[%s11770_s6 + $0x4c0] sm:$0xf]  ;;  %v7788_v38 = vld [vmem:[%s11770_s6 + $0x4cc] sm:$0xf0] }
 0x333   :  { %2639 = vmatpush.bf16.msrb.mxu2 %v5873_v3  ;;  %2652 = vmatpush.bf16.msrb.mxu3 %v6129_v7  ;;  %v7569_v3 = vld [vmem:[%s11768_s4 + $0x5f4] sm:$0xf0] }
 0x334   :  { %v7633_v7 = vld [vmem:[%s11768_s4 + $0x7f4] sm:$0xf0]  ;;  %v5941_v56 = vor.u32 %v7569_v3, %v5940_v13 }
 0x335   :  { %v2453_v49 = vpop.f32.mrf.mxu2  ;;  %v6197_v57 = vor.u32 %v7633_v7, %v6196_v51  ;;  %v7601_v40 = vld [vmem:[%s11768_s4 + $0x6f4] sm:$0xf0] }
 0x336   :  { %2627 = vmatpush.bf16.msrb.mxu1 %v5585_v54  ;;  %v5908_v54 = vld [vmem:[%s11768_s4 + $0x598] sm:$0xf]  ;;  %v6069_v17 = vor.u32 %v7601_v40, %v6068_v39  ;;  %v5910_v39 = vld [vmem:[%s11768_s4 + $0x5b8] sm:$0xf0] }
 0x337   :  { %2640 = vmatpush.bf16.msrb.mxu2 %v5841_v61  ;;  %2653 = vmatpush.bf16.msrb.mxu3 %v6097_v63  ;;  %v2466_v24 = vpop.f32.mrf.mxu3  ;;  %v7561_v61 = vld [vmem:[%s11768_s4 + $0x5b4] sm:$0xf0]  ;;  %v5653_v63 = vor.u32 %v7497_v58, %v5652_v20  ;;  %v7621_v40 = vld [vmem:[%s11768_s4 + $0x79c] sm:$0xf] }
 0x338   :  { %v5909_v0 = vor.u32 %v7561_v61, %v5908_v54  ;;  %v5524_v59 = vld [vmem:[%s11768_s4 + $0x298] sm:$0xf] }
 0x339   :  { %v7465_v43 = vld [vmem:[%s11768_s4 + $0x2b4] sm:$0xf0] }
 0x33a   :  { %2628 = vmatpush.bf16.msrb.mxu1 %v5553_v9  ;;  %v7553_v9 = vld [vmem:[%s11768_s4 + $0x574] sm:$0xf0]  ;;  %v5525_v7 = vor.u32 %v7465_v43, %v5524_v59  ;;  %v7485_v43 = vld [vmem:[%s11768_s4 + $0x35c] sm:$0xf] }
 0x33b   :  { %2641 = vmatpush.bf16.msrb.mxu2 %v5809_v42  ;;  %2654 = vmatpush.bf16.msrb.mxu3 %v6065_v28  ;;  %v6132_v42 = vld [vmem:[%s11768_s4 + $0x758] sm:$0xf]  ;;  %v1057_v28 = vperm.slane %v9518_v26, 2  ;;  %v5877_v12 = vor.u32 %v7553_v9, %v5876_v8  ;;  %v6828_v9 = vld [vmem:[%s11770_s6 + $0x4e0] sm:$0xf] }
 0x33c   :  { %v6133_v15 = vor.u32 %v7617_v10, %v6132_v42  ;;  %v5780_v47 = vld [vmem:[%s11768_s4 + $0x498] sm:$0xf]  ;;  %v7501_v10 = vld [vmem:[%s11768_s4 + $0x3dc] sm:$0xf] }
 0x33d   :  { %v2465_v60 = vadd.f32 %v9712_v27, %v1057_v28  ;;  %v7529_v46 = vld [vmem:[%s11768_s4 + $0x4b4] sm:$0xf0]  ;;  %v7792_v28 = vld [vmem:[%s11770_s6 + $0x4ec] sm:$0xf0] }
 0x33e   :  { %2629 = vmatpush.bf16.msrb.mxu1 %v5521_v33  ;;  %v6100_v33 = vld [vmem:[%s11768_s4 + $0x718] sm:$0xf] }
 0x33f   :  { %2642 = vmatpush.bf16.msrb.mxu2 %v5777_v44  ;;  %2655 = vmatpush.bf16.msrb.mxu3 %v6033_v11  ;;  %v7609_v44 = vld [vmem:[%s11768_s4 + $0x734] sm:$0xf0]  ;;  %v5589_v11 = vor.u32 %v7481_v25, %v5588_v19  ;;  %v5942_v19 = vld [vmem:[%s11768_s4 + $0x5f8] sm:$0xf0]  ;;  %v6829_v25 = vor.u32 %v7792_v28, %v6828_v9  ;;  %v6764_v9 = vld [vmem:[%s11770_s6 + $0x460] sm:$0xf] }
 0x340   :  { %v6101_v30 = vor.u32 %v7609_v44, %v6100_v33  ;;  %v6036_v13 = vld [vmem:[%s11768_s4 + $0x698] sm:$0xf]  ;;  %v7629_v33 = vld [vmem:[%s11768_s4 + $0x7dc] sm:$0xf] }
 0x341   :  { %v7593_v49 = vld [vmem:[%s11768_s4 + $0x6b4] sm:$0xf0]  ;;  %v6198_v44 = vld [vmem:[%s11768_s4 + $0x7f8] sm:$0xf0]  ;;  %4381 = vmatpush.bf16.msra.mxu0 %v6829_v25 }
 0x342   :  { %2630 = vmatpush.bf16.msrb.mxu1 %v5489_v36  ;;  %v5812_v36 = vld [vmem:[%s11768_s4 + $0x4d8] sm:$0xf]  ;;  %v5558_v28 = vld [vmem:[%s11768_s4 + $0x2f8] sm:$0xf0] }
 0x343   :  { %2643 = vmatpush.bf16.msrb.mxu2 %v5745_v18  ;;  %2656 = vmatpush.bf16.msrb.mxu3 %v6001_v14  ;;  %v7537_v18 = vld [vmem:[%s11768_s4 + $0x4f4] sm:$0xf0] }
 0x344   :  { %v5813_v14 = vor.u32 %v7537_v18, %v5812_v36  ;;  %v7521_v58 = vld [vmem:[%s11768_s4 + $0x474] sm:$0xf0]  ;;  %v6201_v36 = vor.u32 %v7629_v33, %v6198_v44  ;;  %v7557_v18 = vld [vmem:[%s11768_s4 + $0x59c] sm:$0xf]  ;;  %v6748_v44 = vld [vmem:[%s11770_s6 + $0x440] sm:$0xf] }
 0x345   :  { %v6004_v54 = vld [vmem:[%s11768_s4 + $0x658] sm:$0xf]  ;;  %v5913_v59 = vor.u32 %v7557_v18, %v5910_v39  ;;  %v7461_v33 = vld [vmem:[%s11768_s4 + $0x29c] sm:$0xf] }
 0x346   :  { %2631 = vmatpush.bf16.msrb.mxu1 %v5457_v48  ;;  %v2477_v34 = vpop.f32.mrf.mxu1  ;;  %v7585_v61 = vld [vmem:[%s11768_s4 + $0x674] sm:$0xf0] }
 0x347   :  { %2644 = vmatpush.bf16.msrb.mxu2 %v5713_v52  ;;  %2657 = vmatpush.bf16.msrb.mxu3 %v5969_v53  ;;  %v2478_v27 = vadd.f32 %v2477_v34, %v2465_v60  ;;  %v5781_v52 = vor.u32 %v7529_v46, %v5780_v47  ;;  %v6037_v53 = vor.u32 %v7593_v49, %v6036_v13  ;;  %v5460_v22 = vld [vmem:[%s11768_s4 + $0x218] sm:$0xf]  ;;  %v6796_v47 = vld [vmem:[%s11770_s6 + $0x4a0] sm:$0xf]  ;;  %v7784_v46 = vld [vmem:[%s11770_s6 + $0x4ac] sm:$0xf0] }
 0x348   :  { %v6005_v4 = vor.u32 %v7585_v61, %v6004_v54  ;;  %v7513_v5 = vld [vmem:[%s11768_s4 + $0x434] sm:$0xf0]  ;;  %v5622_v49 = vld [vmem:[%s11768_s4 + $0x378] sm:$0xf0] }
 0x349   :  { %2632 = vmatmul.bf16.vlgmr.msrb.gmra.mxu1 %v8817_v41  ;;  %v5972_v8 = vld [vmem:[%s11768_s4 + $0x618] sm:$0xf]  ;;  %v5590_v54 = vld [vmem:[%s11768_s4 + $0x338] sm:$0xf0] }
 0x34a   :  { %2676 = vmatpush.bf16.msra.mxu1 %v5685_v55  ;;  %2645 = vmatmul.bf16.vlgmr.msrb.gmra.mxu2 %v8822_v45  ;;  %v5492_v55 = vld [vmem:[%s11768_s4 + $0x258] sm:$0xf]  ;;  %v7541_v61 = vld [vmem:[%s11768_s4 + $0x51c] sm:$0xf] }
 0x34b   :  { %2689 = vmatpush.bf16.msra.mxu2 %v5941_v56  ;;  %2702 = vmatpush.bf16.msra.mxu3 %v6197_v57  ;;  %v7457_v56 = vld [vmem:[%s11768_s4 + $0x274] sm:$0xf0] }
 0x34c   :  { %2658 = vmatmul.bf16.vlgmr.msrb.gmra.mxu3 %v8891_v16  ;;  %v5748_v57 = vld [vmem:[%s11768_s4 + $0x458] sm:$0xf]  ;;  %v5493_v62 = vor.u32 %v7457_v56, %v5492_v55  ;;  %v7477_v55 = vld [vmem:[%s11768_s4 + $0x31c] sm:$0xf]  ;;  %v6780_v56 = vld [vmem:[%s11770_s6 + $0x480] sm:$0xf] }
 0x34d   :  { %v2490_v24 = vpop.f32.mrf.mxu2  ;;  %v7577_v42 = vld [vmem:[%s11768_s4 + $0x634] sm:$0xf0] }
 0x34e   :  { %2677 = vmatpush.bf16.msra.mxu1 %v5653_v63  ;;  %v2491_v3 = vadd.f32 %v2490_v24, %v2478_v27  ;;  %v2479_v48 = vpop.f32.mrf.mxu1  ;;  %v7449_v63 = vld [vmem:[%s11768_s4 + $0x234] sm:$0xf0]  ;;  %v5654_v27 = vld [vmem:[%s11768_s4 + $0x3b8] sm:$0xf0] }
 0x34f   :  { %2690 = vmatpush.bf16.msra.mxu2 %v5909_v0  ;;  %2703 = vmatpush.bf16.msra.mxu3 %v6165_v1  ;;  %v2503_v51 = vpop.f32.mrf.mxu3  ;;  %v5716_v0 = vld [vmem:[%s11768_s4 + $0x418] sm:$0xf]  ;;  %v5749_v1 = vor.u32 %v7521_v58, %v5748_v57  ;;  %v5461_v32 = vor.u32 %v7449_v63, %v5460_v22  ;;  %v7549_v24 = vld [vmem:[%s11768_s4 + $0x55c] sm:$0xf]  ;;  %v6797_v48 = vor.u32 %v7784_v46, %v6796_v47  ;;  %v7780_v57 = vld [vmem:[%s11770_s6 + $0x48c] sm:$0xf0] }
 0x350   :  { %v9874_v20 = vadd.f32 %v2503_v51, %v2491_v3  ;;  %v5717_v60 = vor.u32 %v7513_v5, %v5716_v0  ;;  %v5878_v3 = vld [vmem:[%s11768_s4 + $0x578] sm:$0xf0]  ;;  %v6781_v0 = vor.u32 %v7780_v57, %v6780_v56  ;;  %v7764_v56 = vld [vmem:[%s11770_s6 + $0x40c] sm:$0xf0] }
 0x351   :  { %v7613_v51 = vld [vmem:[%s11768_s4 + $0x75c] sm:$0xf] }
 0x352   :  { %2678 = vmatpush.bf16.msra.mxu1 %v5621_v6  ;;  %v7605_v22 = vld [vmem:[%s11768_s4 + $0x71c] sm:$0xf] }
 0x353   :  { %2691 = vmatpush.bf16.msra.mxu2 %v5877_v12  ;;  %2704 = vmatpush.bf16.msra.mxu3 %v6133_v15  ;;  %v5686_v12 = vld [vmem:[%s11768_s4 + $0x3f8] sm:$0xf0] }
 0x354   :  { %v7565_v15 = vld [vmem:[%s11768_s4 + $0x5dc] sm:$0xf]  ;;  %v5689_v34 = vor.u32 %v7501_v10, %v5686_v12 }
 0x355   :  { %v2492_v6 = vpop.f32.mrf.mxu2  ;;  %v6102_v63 = vld [vmem:[%s11768_s4 + $0x738] sm:$0xf0] }
 0x356   :  { %2679 = vmatpush.bf16.msra.mxu1 %v5589_v11  ;;  %v5973_v11 = vor.u32 %v7577_v42, %v5972_v8  ;;  %v7469_v8 = vld [vmem:[%s11768_s4 + $0x2dc] sm:$0xf]  ;;  %v7776_v42 = vld [vmem:[%s11770_s6 + $0x46c] sm:$0xf0]  ;;  %v6105_v10 = vor.u32 %v7605_v22, %v6102_v63  ;;  %v6572_v63 = vld [vmem:[%s11770_s6 + $0x2e0] sm:$0xf] }
 0x357   :  { %2692 = vmatpush.bf16.msra.mxu2 %v5845_v35  ;;  %2705 = vmatpush.bf16.msra.mxu3 %v6101_v30  ;;  %v2505_v29 = vpop.f32.mrf.mxu3  ;;  %v5945_v35 = vor.u32 %v7565_v15, %v5942_v19  ;;  %v7493_v30 = vld [vmem:[%s11768_s4 + $0x39c] sm:$0xf]  ;;  %v6765_v25 = vor.u32 %v7776_v42, %v6764_v9  ;;  %v7696_v22 = vld [vmem:[%s11770_s6 + $0x1ec] sm:$0xf0] }
 0x358   :  { %v7533_v6 = vld [vmem:[%s11768_s4 + $0x4dc] sm:$0xf]  ;;  %v5561_v29 = vor.u32 %v7469_v8, %v5558_v28  ;;  %v6700_v8 = vld [vmem:[%s11770_s6 + $0x3e0] sm:$0xf]  ;;  %v7760_v9 = vld [vmem:[%s11770_s6 + $0x3ec] sm:$0xf0] }
 0x359   :  { %v5814_v12 = vld [vmem:[%s11768_s4 + $0x4f8] sm:$0xf0] }
 0x35a   :  { %2680 = vmatpush.bf16.msra.mxu1 %v5557_v50  ;;  %v6166_v50 = vld [vmem:[%s11768_s4 + $0x7b8] sm:$0xf0] }
 0x35b   :  { %2693 = vmatpush.bf16.msra.mxu2 %v5813_v14  ;;  %2706 = vmatpush.bf16.msra.mxu3 %v6069_v17  ;;  %v6813_v14 = vor.u32 %v7788_v38, %v6812_v2  ;;  %v5657_v17 = vor.u32 %v7493_v30, %v5654_v27  ;;  %v6169_v13 = vor.u32 %v7621_v40, %v6166_v50  ;;  %v7597_v15 = vld [vmem:[%s11768_s4 + $0x6dc] sm:$0xf] }
 0x35c   :  { %v6070_v19 = vld [vmem:[%s11768_s4 + $0x6f8] sm:$0xf0] }
 0x35d   :  { %4382 = vmatpush.bf16.msra.mxu0 %v6813_v14  ;;  %v5782_v30 = vld [vmem:[%s11768_s4 + $0x4b8] sm:$0xf0] }
 0x35e   :  { %2681 = vmatpush.bf16.msra.mxu1 %v5525_v7  ;;  %v6134_v7 = vld [vmem:[%s11768_s4 + $0x778] sm:$0xf0] }
 0x35f   :  { %2694 = vmatpush.bf16.msra.mxu2 %v5781_v52  ;;  %2707 = vmatpush.bf16.msra.mxu3 %v6037_v53  ;;  %v5625_v52 = vor.u32 %v7485_v43, %v5622_v49  ;;  %v5881_v53 = vor.u32 %v7549_v24, %v5878_v3  ;;  %v6137_v58 = vor.u32 %v7613_v51, %v6134_v7  ;;  %v7589_v2 = vld [vmem:[%s11768_s4 + $0x69c] sm:$0xf] }
 0x360   :  { %v6038_v38 = vld [vmem:[%s11768_s4 + $0x6b8] sm:$0xf0] }
 0x361   :  { %4383 = vmatpush.bf16.msra.mxu0 %v6797_v48  ;;  %v7453_v14 = vld [vmem:[%s11768_s4 + $0x25c] sm:$0xf]  ;;  %v6041_v43 = vor.u32 %v7589_v2, %v6038_v38  ;;  %v7658_v2 = vld [vmem:[%s11770_s6 + $0xc4] sm:$0xf]  ;;  %v6302_v38 = vld [vmem:[%s11770_s6 + $0xd0] sm:$0xf0] }
 0x362   :  { %2682 = vmatpush.bf16.msra.mxu1 %v5493_v62  ;;  %v5846_v62 = vld [vmem:[%s11768_s4 + $0x538] sm:$0xf0] }
 0x363   :  { %2695 = vmatpush.bf16.msra.mxu2 %v5749_v1  ;;  %2708 = vmatpush.bf16.msra.mxu3 %v6005_v4  ;;  %v5593_v4 = vor.u32 %v7477_v55, %v5590_v54  ;;  %v5849_v5 = vor.u32 %v7541_v61, %v5846_v62  ;;  %v5494_v47 = vld [vmem:[%s11768_s4 + $0x278] sm:$0xf0]  ;;  %v6716_v55 = vld [vmem:[%s11770_s6 + $0x400] sm:$0xf] }
 0x364   :  { %v7517_v46 = vld [vmem:[%s11768_s4 + $0x45c] sm:$0xf]  ;;  %v5497_v48 = vor.u32 %v7453_v14, %v5494_v47  ;;  %v6444_v62 = vld [vmem:[%s11770_s6 + $0x1e0] sm:$0xf]  ;;  %v6717_v42 = vor.u32 %v7764_v56, %v6716_v55  ;;  %v6305_v47 = vor.u32 %v7658_v2, %v6302_v38  ;;  %v7650_v56 = vld [vmem:[%s11770_s6 + $0x84] sm:$0xf] }
 0x365   :  { %4384 = vmatpush.bf16.msra.mxu0 %v6781_v0  ;;  %v7581_v49 = vld [vmem:[%s11768_s4 + $0x65c] sm:$0xf]  ;;  %v6540_v14 = vld [vmem:[%s11770_s6 + $0x2a0] sm:$0xf] }
 0x366   :  { %2683 = vmatpush.bf16.msra.mxu1 %v5461_v32  ;;  %v10002_v1 = vpop.f32.mrf.mxu1  ;;  %v5817_v32 = vor.u32 %v7533_v6, %v5814_v12  ;;  %v6006_v24 = vld [vmem:[%s11768_s4 + $0x678] sm:$0xf0]  ;;  %v6445_v12 = vor.u32 %v7696_v22, %v6444_v62  ;;  %v6380_v62 = vld [vmem:[%s11770_s6 + $0x160] sm:$0xf] }
 0x367   :  { %2696 = vmatpush.bf16.msra.mxu2 %v5717_v60  ;;  %2709 = vmatpush.bf16.msra.mxu3 %v5973_v11  ;;  %v7772_v60 = vld [vmem:[%s11770_s6 + $0x44c] sm:$0xf0]  ;;  %v6073_v11 = vor.u32 %v7597_v15, %v6070_v19  ;;  %v7445_v3 = vld [vmem:[%s11768_s4 + $0x21c] sm:$0xf]  ;;  %v6009_v57 = vor.u32 %v7581_v49, %v6006_v24  ;;  %v7662_v15 = vld [vmem:[%s11770_s6 + $0xe4] sm:$0xf] }
 0x368   :  { %v6749_v18 = vor.u32 %v7772_v60, %v6748_v44  ;;  %v5462_v51 = vld [vmem:[%s11768_s4 + $0x238] sm:$0xf0]  ;;  %v6318_v19 = vld [vmem:[%s11770_s6 + $0xf0] sm:$0xf0]  ;;  %v6556_v44 = vld [vmem:[%s11770_s6 + $0x2c0] sm:$0xf] }
 0x369   :  { %2684 = vmatmul.bf16.vlgmr.msra.gmra.mxu1 %v8817_v41  ;;  %4385 = vmatpush.bf16.msra.mxu0 %v6765_v25  ;;  %v7573_v54 = vld [vmem:[%s11768_s4 + $0x61c] sm:$0xf]  ;;  %v7724_v60 = vld [vmem:[%s11770_s6 + $0x2cc] sm:$0xf0]  ;;  %v6508_v22 = vld [vmem:[%s11770_s6 + $0x260] sm:$0xf] }
 0x36a   :  { %2728 = vmatpush.bf16.msrb.mxu1 %v5689_v34  ;;  %2697 = vmatmul.bf16.vlgmr.msra.gmra.mxu2 %v8822_v45  ;;  %v5526_v34 = vld [vmem:[%s11768_s4 + $0x2b8] sm:$0xf0]  ;;  %v7684_v24 = vld [vmem:[%s11770_s6 + $0x18c] sm:$0xf0] }
 0x36b   :  { %2741 = vmatpush.bf16.msrb.mxu2 %v5945_v35  ;;  %2754 = vmatpush.bf16.msrb.mxu3 %v6201_v36  ;;  %v7525_v35 = vld [vmem:[%s11768_s4 + $0x49c] sm:$0xf]  ;;  %v5529_v40 = vor.u32 %v7461_v33, %v5526_v34  ;;  %v7692_v33 = vld [vmem:[%s11770_s6 + $0x1cc] sm:$0xf0] }
 0x36c   :  { %2710 = vmatmul.bf16.vlgmr.msra.gmra.mxu3 %v8891_v16  ;;  %v5785_v50 = vor.u32 %v7525_v35, %v5782_v30  ;;  %v5974_v61 = vld [vmem:[%s11768_s4 + $0x638] sm:$0xf0]  ;;  %v7756_v34 = vld [vmem:[%s11770_s6 + $0x3cc] sm:$0xf0]  ;;  %v6321_v35 = vor.u32 %v7662_v15, %v6318_v19  ;;  %v6492_v15 = vld [vmem:[%s11770_s6 + $0x240] sm:$0xf] }
 0x36d   :  { %v10052_v36 = vpop.f32.mrf.mxu2  ;;  %4386 = vmatpush.bf16.msra.mxu0 %v6749_v18  ;;  %v5977_v6 = vor.u32 %v7573_v54, %v5974_v61  ;;  %v6557_v18 = vor.u32 %v7724_v60, %v6556_v44 }
 0x36e   :  { %2729 = vmatpush.bf16.msrb.mxu1 %v5657_v17  ;;  %v2518_v39 = vpop.f32.mrf.mxu1  ;;  %v6732_v17 = vld [vmem:[%s11770_s6 + $0x420] sm:$0xf] }
 0x36f   :  { %2742 = vmatpush.bf16.msrb.mxu2 %v5913_v59  ;;  %2755 = vmatpush.bf16.msrb.mxu3 %v6169_v13  ;;  %v10054_v27 = vpop.f32.mrf.mxu3  ;;  %v7768_v59 = vld [vmem:[%s11770_s6 + $0x42c] sm:$0xf0]  ;;  %v5750_v13 = vld [vmem:[%s11768_s4 + $0x478] sm:$0xf0] }
 0x370   :  { %v6733_v7 = vor.u32 %v7768_v59, %v6732_v17  ;;  %v7720_v17 = vld [vmem:[%s11770_s6 + $0x2ac] sm:$0xf0]  ;;  %v6668_v59 = vld [vmem:[%s11770_s6 + $0x3a0] sm:$0xf] }
 0x372   :  { %2730 = vmatpush.bf16.msrb.mxu1 %v5625_v52  ;;  %v5753_v52 = vor.u32 %v7517_v46, %v5750_v13  ;;  %4387 = vmatpush.bf16.msra.mxu0 %v6733_v7  ;;  %v6286_v46 = vld [vmem:[%s11770_s6 + $0xb0] sm:$0xf0]  ;;  %v6541_v13 = vor.u32 %v7720_v17, %v6540_v14  ;;  %v6652_v7 = vld [vmem:[%s11770_s6 + $0x380] sm:$0xf]  ;;  %v7736_v14 = vld [vmem:[%s11770_s6 + $0x32c] sm:$0xf0] }
 0x373   :  { %2743 = vmatpush.bf16.msrb.mxu2 %v5881_v53  ;;  %2756 = vmatpush.bf16.msrb.mxu3 %v6137_v58  ;;  %v7509_v53 = vld [vmem:[%s11768_s4 + $0x41c] sm:$0xf] }
 0x374   :  { %v5718_v58 = vld [vmem:[%s11768_s4 + $0x438] sm:$0xf0] }
 0x375   :  { %v2531_v0 = vpop.f32.mrf.mxu2  ;;  %v5721_v28 = vor.u32 %v7509_v53, %v5718_v58  ;;  %v1058_v53 = vperm.slane %v9518_v26, 3  ;;  %v7680_v26 = vld [vmem:[%s11770_s6 + $0x16c] sm:$0xf0] }
 0x376   :  { %2731 = vmatpush.bf16.msrb.mxu1 %v5593_v4  ;;  %4388 = vmatpush.bf16.msra.mxu0 %v6717_v42  ;;  %v6636_v0 = vld [vmem:[%s11770_s6 + $0x360] sm:$0xf]  ;;  %v6254_v42 = vld [vmem:[%s11770_s6 + $0x70] sm:$0xf0] }
 0x377   :  { %2744 = vmatpush.bf16.msrb.mxu2 %v5849_v5  ;;  %2757 = vmatpush.bf16.msrb.mxu3 %v6105_v10  ;;  %v2544_v4 = vpop.f32.mrf.mxu3  ;;  %v7728_v5 = vld [vmem:[%s11770_s6 + $0x2ec] sm:$0xf0]  ;;  %v5465_v10 = vor.u32 %v7445_v3, %v5462_v51  ;;  %v6524_v3 = vld [vmem:[%s11770_s6 + $0x280] sm:$0xf]  ;;  %v2517_v19 = vadd.f32 %v10002_v1, %v1058_v53 }
 0x378   :  { %v6573_v25 = vor.u32 %v7728_v5, %v6572_v63  ;;  %v7716_v51 = vld [vmem:[%s11770_s6 + $0x28c] sm:$0xf0] }
 0x379   :  { %v6525_v54 = vor.u32 %v7716_v51, %v6524_v3  ;;  %v7712_v63 = vld [vmem:[%s11770_s6 + $0x26c] sm:$0xf0]  ;;  %v2530_v60 = vadd.f32 %v10052_v36, %v2517_v19  ;;  %v6348_v36 = vld [vmem:[%s11770_s6 + $0x120] sm:$0xf] }
 0x37a   :  { %2732 = vmatpush.bf16.msrb.mxu1 %v5561_v29  ;;  %v6701_v29 = vor.u32 %v7760_v9, %v6700_v8  ;;  %4433 = vmatpush.bf16.msrb.mxu0 %v6321_v35  ;;  %v7744_v4 = vld [vmem:[%s11770_s6 + $0x36c] sm:$0xf0]  ;;  %v6381_v8 = vor.u32 %v7680_v26, %v6380_v62  ;;  %v7646_v9 = vld [vmem:[%s11770_s6 + $0x64] sm:$0xf]  ;;  %v6238_v35 = vld [vmem:[%s11770_s6 + $0x50] sm:$0xf0] }
 0x37b   :  { %2745 = vmatpush.bf16.msrb.mxu2 %v5817_v32  ;;  %2758 = vmatpush.bf16.msrb.mxu3 %v6073_v11  ;;  %v6428_v32 = vld [vmem:[%s11770_s6 + $0x1c0] sm:$0xf]  ;;  %v6257_v44 = vor.u32 %v7646_v9, %v6254_v42  ;;  %v7732_v51 = vld [vmem:[%s11770_s6 + $0x30c] sm:$0xf0]  ;;  %v2768_v62 = vmax.f32 %v9714_v31, 0.0  ;;  %v2769_v26 = vmax.f32 %v9874_v20, 0.0 }
 0x37c   :  { %v6684_v11 = vld [vmem:[%s11770_s6 + $0x3c0] sm:$0xf]  ;;  %v6429_v30 = vor.u32 %v7692_v33, %v6428_v32  ;;  %v7740_v32 = vld [vmem:[%s11770_s6 + $0x34c] sm:$0xf0] }
 0x37d   :  { %v6685_v39 = vor.u32 %v7756_v34, %v6684_v11  ;;  %v7642_v34 = vld [vmem:[%s11770_s6 + $0x44] sm:$0xf]  ;;  %v6588_v3 = vld [vmem:[%s11770_s6 + $0x300] sm:$0xf]  ;;  %v7820_v9 = vld [vmem:[%s11770_s6 + $0x5cc] sm:$0xf0] }
 0x37e   :  { %2733 = vmatpush.bf16.msrb.mxu1 %v5529_v40  ;;  %v6412_v40 = vld [vmem:[%s11770_s6 + $0x1a0] sm:$0xf]  ;;  %4434 = vmatpush.bf16.msrb.mxu0 %v6305_v47  ;;  %v6241_v17 = vor.u32 %v7642_v34, %v6238_v35  ;;  %v7852_v20 = vld [vmem:[%s11770_s6 + $0x6cc] sm:$0xf0] }
 0x37f   :  { %2746 = vmatpush.bf16.msrb.mxu2 %v5785_v50  ;;  %2759 = vmatpush.bf16.msrb.mxu3 %v6041_v43  ;;  %v7688_v50 = vld [vmem:[%s11770_s6 + $0x1ac] sm:$0xf0]  ;;  %v6332_v47 = vld [vmem:[%s11770_s6 + $0x100] sm:$0xf] }
 0x380   :  { %v7752_v43 = vld [vmem:[%s11770_s6 + $0x3ac] sm:$0xf0]  ;;  %v7068_v31 = vld [vmem:[%s11770_s6 + $0x6c0] sm:$0xf] }
 0x381   :  { %v6669_v49 = vor.u32 %v7752_v43, %v6668_v59  ;;  %v2543_v59 = vadd.f32 %v10054_v27, %v2530_v60  ;;  %v7668_v27 = vld [vmem:[%s11770_s6 + $0x10c] sm:$0xf0]  ;;  %v7069_v19 = vor.u32 %v7852_v20, %v7068_v31  ;;  %v6908_v34 = vld [vmem:[%s11770_s6 + $0x580] sm:$0xf] }
 0x382   :  { %2734 = vmatpush.bf16.msrb.mxu1 %v5497_v48  ;;  %v7748_v48 = vld [vmem:[%s11770_s6 + $0x38c] sm:$0xf0]  ;;  %v6972_v31 = vld [vmem:[%s11770_s6 + $0x600] sm:$0xf] }
 0x383   :  { %2747 = vmatpush.bf16.msrb.mxu2 %v5753_v52  ;;  %2760 = vmatpush.bf16.msrb.mxu3 %v6009_v57  ;;  %v6270_v57 = vld [vmem:[%s11770_s6 + $0x90] sm:$0xf0]  ;;  %v6653_v61 = vor.u32 %v7748_v48, %v6652_v7  ;;  %v6956_v7 = vld [vmem:[%s11770_s6 + $0x5e0] sm:$0xf]  ;;  %v7828_v20 = vld [vmem:[%s11770_s6 + $0x60c] sm:$0xf0] }
 0x384   :  { %v6273_v5 = vor.u32 %v7650_v56, %v6270_v57  ;;  %v7856_v56 = vld [vmem:[%s11770_s6 + $0x6ec] sm:$0xf0] }
 0x386   :  { %2735 = vmatpush.bf16.msrb.mxu1 %v5465_v10  ;;  %v2555_v58 = vpop.f32.mrf.mxu1  ;;  %v6509_v10 = vor.u32 %v7712_v63, %v6508_v22  ;;  %v6589_v63 = vor.u32 %v7732_v51, %v6588_v3 }
 0x387   :  { %2748 = vmatpush.bf16.msrb.mxu2 %v5721_v28  ;;  %2761 = vmatpush.bf16.msrb.mxu3 %v5977_v6  ;;  %v6637_v28 = vor.u32 %v7744_v4, %v6636_v0  ;;  %v6364_v6 = vld [vmem:[%s11770_s6 + $0x140] sm:$0xf] }
 0x389   :  { %2736 = vmatmul.bf16.vlgmr.msrb.gmra.mxu1 %v8817_v41  ;;  %v6413_v41 = vor.u32 %v7688_v50, %v6412_v40  ;;  %v7704_v40 = vld [vmem:[%s11770_s6 + $0x22c] sm:$0xf0]  ;;  %v6604_v50 = vld [vmem:[%s11770_s6 + $0x320] sm:$0xf] }
 0x38a   :  { %4342 = vmatpush.bf16.msra.mxu1 %v6445_v12  ;;  %2749 = vmatmul.bf16.vlgmr.msrb.gmra.mxu2 %v8822_v45  ;;  %v7654_v45 = vld [vmem:[%s11770_s6 + $0xa4] sm:$0xf]  ;;  %v7676_v12 = vld [vmem:[%s11770_s6 + $0x14c] sm:$0xf0] }
 0x38b   :  { %4355 = vmatpush.bf16.msra.mxu2 %v6573_v25  ;;  %4368 = vmatpush.bf16.msra.mxu3 %v6701_v29  ;;  %v6289_v52 = vor.u32 %v7654_v45, %v6286_v46  ;;  %v7708_v25 = vld [vmem:[%s11770_s6 + $0x24c] sm:$0xf0]  ;;  %v6620_v29 = vld [vmem:[%s11770_s6 + $0x340] sm:$0xf]  ;;  %v6365_v11 = vor.u32 %v7676_v12, %v6364_v6  ;;  %v6222_v45 = vld [vmem:[%s11770_s6 + $0x30] sm:$0xf0] }
 0x38c   :  { %2762 = vmatmul.bf16.vlgmr.msrb.gmra.mxu3 %v8891_v16  ;;  %v6396_v16 = vld [vmem:[%s11770_s6 + $0x180] sm:$0xf]  ;;  %v6493_v2 = vor.u32 %v7708_v25, %v6492_v15  ;;  %v6621_v38 = vor.u32 %v7740_v32, %v6620_v29  ;;  %v7816_v25 = vld [vmem:[%s11770_s6 + $0x5ac] sm:$0xf0] }
 0x38d   :  { %v6397_v55 = vor.u32 %v7684_v24, %v6396_v16  ;;  %4435 = vmatpush.bf16.msrb.mxu0 %v6289_v52  ;;  %v10247_v33 = vpop.f32.mrf.mxu2  ;;  %v7700_v16 = vld [vmem:[%s11770_s6 + $0x20c] sm:$0xf0]  ;;  %v2556_v24 = vadd.f32 %v2555_v58, %v2543_v59  ;;  %v6333_v58 = vor.u32 %v7668_v27, %v6332_v47  ;;  %v6924_v15 = vld [vmem:[%s11770_s6 + $0x5a0] sm:$0xf] }
 0x38e   :  { %4343 = vmatpush.bf16.msra.mxu1 %v6429_v30  ;;  %v2557_v30 = vpop.f32.mrf.mxu1  ;;  %v7824_v52 = vld [vmem:[%s11770_s6 + $0x5ec] sm:$0xf0]  ;;  %v7052_v29 = vld [vmem:[%s11770_s6 + $0x6a0] sm:$0xf] }
 0x38f   :  { %4356 = vmatpush.bf16.msra.mxu2 %v6557_v18  ;;  %4369 = vmatpush.bf16.msra.mxu3 %v6685_v39  ;;  %v10250_v1 = vpop.f32.mrf.mxu3  ;;  %v7672_v18 = vld [vmem:[%s11770_s6 + $0x12c] sm:$0xf0]  ;;  %v6476_v39 = vld [vmem:[%s11770_s6 + $0x220] sm:$0xf]  ;;  %v2770_v0 = vmax.f32 %v2556_v24, 0.0  ;;  %v6957_v4 = vor.u32 %v7824_v52, %v6956_v7 }
 0x390   :  { %v6349_v43 = vor.u32 %v7672_v18, %v6348_v36  ;;  %v6477_v46 = vor.u32 %v7704_v40, %v6476_v39  ;;  %v7848_v32 = vld [vmem:[%s11770_s6 + $0x6ac] sm:$0xf0]  ;;  %v6892_v40 = vld [vmem:[%s11770_s6 + $0x560] sm:$0xf]  ;;  %v6830_v52 = vld [vmem:[%s11770_s6 + $0x4f0] sm:$0xf0] }
 0x391   :  { %4436 = vmatpush.bf16.msrb.mxu0 %v6273_v5  ;;  %v6940_v5 = vld [vmem:[%s11770_s6 + $0x5c0] sm:$0xf]  ;;  %v10337_v6 = vpack.c.bf16 %v2770_v0, %v2770_v0  ;;  %v7053_v35 = vor.u32 %v7848_v32, %v7052_v29  ;;  %v7812_v30 = vld [vmem:[%s11770_s6 + $0x58c] sm:$0xf0] }
 0x392   :  { %4344 = vmatpush.bf16.msra.mxu1 %v6413_v41  ;;  %v7638_v41 = vld [vmem:[%s11770_s6 + $0x24] sm:$0xf]  ;;  %v6941_v12 = vor.u32 %v7820_v9, %v6940_v5  ;;  %v6909_v39 = vor.u32 %v7812_v30, %v6908_v34  ;;  %v6860_v7 = vld [vmem:[%s11770_s6 + $0x520] sm:$0xf]  ;;  %v7888_v9 = vld [vmem:[%s11770_s6 + $0x7ec] sm:$0xf0]  ;;  %v6973_v30 = vor.u32 %v7828_v20, %v6972_v31 }
 0x393   :  { %4357 = vmatpush.bf16.msra.mxu2 %v6541_v13  ;;  %4370 = vmatpush.bf16.msra.mxu3 %v6669_v49  ;;  %v6605_v13 = vor.u32 %v7736_v14, %v6604_v50  ;;  %v6460_v49 = vld [vmem:[%s11770_s6 + $0x200] sm:$0xf]  ;;  %v6225_v53 = vor.u32 %v7638_v41, %v6222_v45  ;;  %v7808_v14 = vld [vmem:[%s11770_s6 + $0x56c] sm:$0xf0]  ;;  %v6382_v31 = vld [vmem:[%s11770_s6 + $0x170] sm:$0xf0] }
 0x394   :  { %v6461_v22 = vor.u32 %v7700_v16, %v6460_v49  ;;  %v6893_v47 = vor.u32 %v7808_v14, %v6892_v40  ;;  %v6876_v41 = vld [vmem:[%s11770_s6 + $0x540] sm:$0xf]  ;;  %v7722_v14 = vld [vmem:[%s11770_s6 + $0x2c4] sm:$0xf] }
 0x395   :  { %4437 = vmatpush.bf16.msrb.mxu0 %v6257_v44  ;;  %v2570_v48 = vpop.f32.mrf.mxu2  ;;  %v10357_v44 = vld [vmem:[%s11769_s5] sm:$0xff] }
 0x396   :  { %4345 = vmatpush.bf16.msra.mxu1 %v6397_v55  ;;  %v7084_v55 = vld [vmem:[%s11770_s6 + $0x6e0] sm:$0xf]  ;;  %v1059_v60 = vperm.slane %v10357_v44, 4  ;;  %v7790_v48 = vld [vmem:[%s11770_s6 + $0x4e4] sm:$0xf] }
 0x397   :  { %4358 = vmatpush.bf16.msra.mxu2 %v6525_v54  ;;  %4371 = vmatpush.bf16.msra.mxu3 %v6653_v61  ;;  %v2583_v57 = vpop.f32.mrf.mxu3  ;;  %v7634_v54 = vld [vmem:[%s11770_s6 + $0x4] sm:$0xf]  ;;  %v6206_v61 = vld [vmem:[%s11770_s6 + $0x10] sm:$0xf0] }
 0x398   :  { %v6209_v42 = vor.u32 %v7634_v54, %v6206_v61  ;;  %v2569_v36 = vadd.f32 %v10247_v33, %v1059_v60  ;;  %v7840_v33 = vld [vmem:[%s11770_s6 + $0x66c] sm:$0xf0]  ;;  %v6833_v61 = vor.u32 %v7790_v48, %v6830_v52  ;;  %v6766_v48 = vld [vmem:[%s11770_s6 + $0x470] sm:$0xf0]  ;;  %v7164_v52 = vld [vmem:[%s11770_s6 + $0x780] sm:$0xf] }
 0x399   :  { %4438 = vmatpush.bf16.msrb.mxu0 %v6241_v17  ;;  %v7020_v17 = vld [vmem:[%s11770_s6 + $0x660] sm:$0xf]  ;;  %v7832_v57 = vld [vmem:[%s11770_s6 + $0x62c] sm:$0xf0] }
 0x39a   :  { %4346 = vmatpush.bf16.msra.mxu1 %v6381_v8  ;;  %v7085_v8 = vor.u32 %v7856_v56, %v7084_v55  ;;  %v10385_v59 = vpop.f32.mrf.mxu0  ;;  %v7021_v45 = vor.u32 %v7840_v33, %v7020_v17  ;;  %v7800_v55 = vld [vmem:[%s11770_s6 + $0x52c] sm:$0xf0]  ;;  %v6988_v56 = vld [vmem:[%s11770_s6 + $0x620] sm:$0xf]  ;;  %v6558_v17 = vld [vmem:[%s11770_s6 + $0x2d0] sm:$0xf0] }
 0x39b   :  { %4359 = vmatpush.bf16.msra.mxu2 %v6509_v10  ;;  %4372 = vmatpush.bf16.msra.mxu3 %v6637_v28  ;;  %v10333_v10 = vpack.c.bf16 %v2768_v62, %v2768_v62  ;;  %v10335_v28 = vpack.c.bf16 %v2769_v26, %v2769_v26  ;;  %v6844_v62 = vld [vmem:[%s11770_s6 + $0x500] sm:$0xf]  ;;  %v7796_v26 = vld [vmem:[%s11770_s6 + $0x50c] sm:$0xf0]  ;;  %v6861_v0 = vor.u32 %v7800_v55, %v6860_v7  ;;  %v7774_v7 = vld [vmem:[%s11770_s6 + $0x464] sm:$0xf] }
 0x39c   :  { %v6989_v5 = vor.u32 %v7832_v57, %v6988_v56  ;;  %v6845_v34 = vor.u32 %v7796_v26, %v6844_v62  ;;  %v7682_v56 = vld [vmem:[%s11770_s6 + $0x184] sm:$0xf]  ;;  %v6526_v62 = vld [vmem:[%s11770_s6 + $0x290] sm:$0xf0]  ;;  %v6769_v26 = vor.u32 %v7774_v7, %v6766_v48 }
 0x39d   :  { %4439 = vmatpush.bf16.msrb.mxu0 %v6225_v53  ;;  %v7702_v7 = vld [vmem:[%s11770_s6 + $0x224] sm:$0xf]  ;;  %v6478_v48 = vld [vmem:[%s11770_s6 + $0x230] sm:$0xf0] }
 0x39e   :  { %4347 = vmatpush.bf16.msra.mxu1 %v6365_v11  ;;  %v6925_v11 = vor.u32 %v7816_v25, %v6924_v15  ;;  %v6446_v15 = vld [vmem:[%s11770_s6 + $0x1f0] sm:$0xf0] }
 0x39f   :  { %4360 = vmatpush.bf16.msra.mxu2 %v6493_v2  ;;  %4373 = vmatpush.bf16.msra.mxu3 %v6621_v38  ;;  %v7036_v2 = vld [vmem:[%s11770_s6 + $0x680] sm:$0xf]  ;;  %v7844_v38 = vld [vmem:[%s11770_s6 + $0x68c] sm:$0xf0]  ;;  %v6574_v25 = vld [vmem:[%s11770_s6 + $0x2f0] sm:$0xf0] }
 0x3a0   :  { %v7037_v50 = vor.u32 %v7844_v38, %v7036_v2  ;;  %v7196_v2 = vld [vmem:[%s11770_s6 + $0x7c0] sm:$0xf]  ;;  %v7884_v38 = vld [vmem:[%s11770_s6 + $0x7cc] sm:$0xf0] }
 0x3a1   :  { %4440 = vmatpush.bf16.msrb.mxu0 %v6209_v42  ;;  %v7694_v42 = vld [vmem:[%s11770_s6 + $0x1e4] sm:$0xf]  ;;  %v7197_v40 = vor.u32 %v7884_v38, %v7196_v2  ;;  %v6366_v38 = vld [vmem:[%s11770_s6 + $0x150] sm:$0xf0] }
 0x3a2   :  { %4348 = vmatpush.bf16.msra.mxu1 %v6349_v43  ;;  %v2582_v43 = vadd.f32 %v10250_v1, %v2569_v36  ;;  %v7836_v1 = vld [vmem:[%s11770_s6 + $0x64c] sm:$0xf0]  ;;  %v4340_v54 = vpop.f32.mrf.mxu0  ;;  %v6449_v36 = vor.u32 %v7694_v42, %v6446_v15  ;;  %v7678_v42 = vld [vmem:[%s11770_s6 + $0x164] sm:$0xf] }
 0x3a3   :  { %4361 = vmatpush.bf16.msra.mxu2 %v6477_v46  ;;  %4374 = vmatpush.bf16.msra.mxu3 %v6605_v13  ;;  %v7804_v46 = vld [vmem:[%s11770_s6 + $0x54c] sm:$0xf0]  ;;  %v7004_v13 = vld [vmem:[%s11770_s6 + $0x640] sm:$0xf]  ;;  %v6398_v54 = vld [vmem:[%s11770_s6 + $0x190] sm:$0xf0] }
 0x3a4   :  { %v6877_v51 = vor.u32 %v7804_v46, %v6876_v41  ;;  %v7005_v53 = vor.u32 %v7836_v1, %v7004_v13  ;;  %v7180_v41 = vld [vmem:[%s11770_s6 + $0x7a0] sm:$0xf]  ;;  %v7686_v13 = vld [vmem:[%s11770_s6 + $0x1a4] sm:$0xf]  ;;  %v6561_v1 = vor.u32 %v7722_v14, %v6558_v17 }
 0x3a5   :  { %v7674_v2 = vld [vmem:[%s11770_s6 + $0x144] sm:$0xf] }
 0x3a6   :  { %4349 = vmatpush.bf16.msra.mxu1 %v6333_v58  ;;  %v2594_v18 = vpop.f32.mrf.mxu1  ;;  %v7762_v14 = vld [vmem:[%s11770_s6 + $0x404] sm:$0xf] }
 0x3a7   :  { %4362 = vmatpush.bf16.msra.mxu2 %v6461_v22  ;;  %4375 = vmatpush.bf16.msra.mxu3 %v6589_v63  ;;  %v2595_v27 = vadd.f32 %v2594_v18, %v2582_v43  ;;  %v7786_v22 = vld [vmem:[%s11770_s6 + $0x4c4] sm:$0xf] }
 0x3a8   :  { %v7690_v18 = vld [vmem:[%s11770_s6 + $0x1c4] sm:$0xf] }
 0x3a9   :  { %4350 = vmatmul.bf16.vlgmr.msra.gmra.mxu1 %v10333_v10  ;;  %v7778_v43 = vld [vmem:[%s11770_s6 + $0x484] sm:$0xf] }
 0x3aa   :  { %4394 = vmatpush.bf16.msrb.mxu1 %v6957_v4  ;;  %4363 = vmatmul.bf16.vlgmr.msra.gmra.mxu2 %v10335_v28  ;;  %v6814_v4 = vld [vmem:[%s11770_s6 + $0x4d0] sm:$0xf0] }
 0x3ab   :  { %4407 = vmatpush.bf16.msrb.mxu2 %v7085_v8  ;;  %4376 = vmatmul.bf16.vlgmr.msra.gmra.mxu3 %v10337_v6  ;;  %v7212_v8 = vld [vmem:[%s11770_s6 + $0x7e0] sm:$0xf]  ;;  %v6817_v60 = vor.u32 %v7786_v22, %v6814_v4  ;;  %v7770_v22 = vld [vmem:[%s11770_s6 + $0x444] sm:$0xf] }
 0x3ac   :  { %v7148_v4 = vld [vmem:[%s11770_s6 + $0x760] sm:$0xf] }
 0x3ad   :  { %v2607_v49 = vpop.f32.mrf.mxu2 }
 0x3ae   :  { %4395 = vmatpush.bf16.msrb.mxu1 %v6941_v12  ;;  %v2608_v24 = vadd.f32 %v2607_v49, %v2595_v27  ;;  %v2596_v3 = vpop.f32.mrf.mxu1  ;;  %v7213_v12 = vor.u32 %v7888_v9, %v7212_v8  ;;  %v6414_v49 = vld [vmem:[%s11770_s6 + $0x1b0] sm:$0xf0]  ;;  %v1060_v8 = vperm.slane %v10357_v44, 5  ;;  %v6401_v9 = vor.u32 %v7682_v56, %v6398_v54  ;;  %v7666_v56 = vld [vmem:[%s11770_s6 + $0x104] sm:$0xf] }
 0x3af   :  { %4408 = vmatpush.bf16.msrb.mxu2 %v7069_v19  ;;  %v10400_v16 = vpop.f32.mrf.mxu3  ;;  %v7726_v19 = vld [vmem:[%s11770_s6 + $0x2e4] sm:$0xf]  ;;  %v6542_v3 = vld [vmem:[%s11770_s6 + $0x2b0] sm:$0xf0]  ;;  %v6417_v55 = vor.u32 %v7686_v13, %v6414_v49  ;;  %v7100_v54 = vld [vmem:[%s11770_s6 + $0x700] sm:$0xf] }
 0x3b0   :  { %v2771_v58 = vmax.f32 %v2608_v24, 0.0  ;;  %4420 = vmatpush.bf16.msrb.mxu3 %v7213_v12  ;;  %v7718_v24 = vld [vmem:[%s11770_s6 + $0x2a4] sm:$0xf] }
 0x3b1   :  { %v6545_v57 = vor.u32 %v7718_v24, %v6542_v3  ;;  %v7670_v13 = vld [vmem:[%s11770_s6 + $0x124] sm:$0xf] }
 0x3b2   :  { %4396 = vmatpush.bf16.msrb.mxu1 %v6925_v11  ;;  %v10429_v63 = vpack.c.bf16 %v2771_v58, %v2771_v58  ;;  %v7782_v11 = vld [vmem:[%s11770_s6 + $0x4a4] sm:$0xf] }
 0x3b3   :  { %4409 = vmatpush.bf16.msrb.mxu2 %v7053_v35  ;;  %v6798_v35 = vld [vmem:[%s11770_s6 + $0x4b0] sm:$0xf0] }
 0x3b4   :  { %4389 = vmatmul.bf16.vlgmr.msra.gmra.mxu0 %v10429_v63  ;;  %v6801_v33 = vor.u32 %v7782_v11, %v6798_v35  ;;  %4421 = vmatpush.bf16.msrb.mxu3 %v7197_v40  ;;  %v6734_v11 = vld [vmem:[%s11770_s6 + $0x430] sm:$0xf0]  ;;  %v7868_v35 = vld [vmem:[%s11770_s6 + $0x74c] sm:$0xf0] }
 0x3b5   :  { %4485 = vmatpush.bf16.msra.mxu0 %v6833_v61  ;;  %v2609_v29 = vpop.f32.mrf.mxu2  ;;  %v7714_v61 = vld [vmem:[%s11770_s6 + $0x284] sm:$0xf] }
 0x3b6   :  { %4397 = vmatpush.bf16.msrb.mxu1 %v6909_v39  ;;  %v6577_v39 = vor.u32 %v7726_v19, %v6574_v25  ;;  %v6529_v20 = vor.u32 %v7714_v61, %v6526_v62  ;;  %v7710_v19 = vld [vmem:[%s11770_s6 + $0x264] sm:$0xf]  ;;  %v6510_v25 = vld [vmem:[%s11770_s6 + $0x270] sm:$0xf0]  ;;  %v7860_v61 = vld [vmem:[%s11770_s6 + $0x70c] sm:$0xf0] }
 0x3b7   :  { %4410 = vmatpush.bf16.msrb.mxu2 %v7037_v50  ;;  %v2622_v32 = vpop.f32.mrf.mxu3  ;;  %v6430_v50 = vld [vmem:[%s11770_s6 + $0x1d0] sm:$0xf0] }
 0x3b8   :  { %v6433_v46 = vor.u32 %v7690_v18, %v6430_v50  ;;  %v7766_v32 = vld [vmem:[%s11770_s6 + $0x424] sm:$0xf] }
 0x3b9   :  { %4486 = vmatpush.bf16.msra.mxu0 %v6817_v60  ;;  %v6385_v60 = vor.u32 %v7678_v42, %v6382_v31  ;;  %v6737_v50 = vor.u32 %v7766_v32, %v6734_v11  ;;  %v6702_v42 = vld [vmem:[%s11770_s6 + $0x3f0] sm:$0xf0]  ;;  %v7657_v11 = vld [vmem:[%s11770_s6 + $0xb4] sm:$0xf0] }
 0x3ba   :  { %4398 = vmatpush.bf16.msrb.mxu1 %v6893_v47  ;;  %v6782_v47 = vld [vmem:[%s11770_s6 + $0x490] sm:$0xf0] }
 0x3bb   :  { %4411 = vmatpush.bf16.msrb.mxu2 %v7021_v45  ;;  %v7880_v45 = vld [vmem:[%s11770_s6 + $0x7ac] sm:$0xf0] }
 0x3bc   :  { %v7181_v27 = vor.u32 %v7880_v45, %v7180_v41  ;;  %v7864_v41 = vld [vmem:[%s11770_s6 + $0x72c] sm:$0xf0] }
 0x3bd   :  { %4487 = vmatpush.bf16.msra.mxu0 %v6801_v33  ;;  %v6369_v33 = vor.u32 %v7674_v2, %v6366_v38  ;;  %v7818_v38 = vld [vmem:[%s11770_s6 + $0x5c4] sm:$0xf] }
 0x3be   :  { %4399 = vmatpush.bf16.msrb.mxu1 %v6877_v51  ;;  %v6785_v51 = vor.u32 %v7778_v43, %v6782_v47  ;;  %4422 = vmatpush.bf16.msrb.mxu3 %v7181_v27  ;;  %v6718_v43 = vld [vmem:[%s11770_s6 + $0x410] sm:$0xf0]  ;;  %v7116_v47 = vld [vmem:[%s11770_s6 + $0x720] sm:$0xf]  ;;  %v7665_v27 = vld [vmem:[%s11770_s6 + $0xf4] sm:$0xf0] }
 0x3bf   :  { %4412 = vmatpush.bf16.msrb.mxu2 %v7005_v53  ;;  %v7876_v53 = vld [vmem:[%s11770_s6 + $0x78c] sm:$0xf0]  ;;  %v7117_v24 = vor.u32 %v7864_v41, %v7116_v47 }
 0x3c0   :  { %v7165_v58 = vor.u32 %v7876_v53, %v7164_v52  ;;  %v6721_v53 = vor.u32 %v7762_v14, %v6718_v43  ;;  %v6670_v14 = vld [vmem:[%s11770_s6 + $0x3b0] sm:$0xf0] }
 0x3c1   :  { %4488 = vmatpush.bf16.msra.mxu0 %v6785_v51  ;;  %v6350_v51 = vld [vmem:[%s11770_s6 + $0x130] sm:$0xf0] }
 0x3c2   :  { %4400 = vmatpush.bf16.msrb.mxu1 %v6861_v0  ;;  %4423 = vmatpush.bf16.msrb.mxu3 %v7165_v58  ;;  %v6750_v0 = vld [vmem:[%s11770_s6 + $0x450] sm:$0xf0]  ;;  %v6308_v58 = vld [vmem:[%s11770_s6 + $0xc8] sm:$0xf] }
 0x3c3   :  { %4413 = vmatpush.bf16.msrb.mxu2 %v6989_v5  ;;  %v7872_v5 = vld [vmem:[%s11770_s6 + $0x76c] sm:$0xf0]  ;;  %v6753_v29 = vor.u32 %v7770_v22, %v6750_v0  ;;  %v7661_v22 = vld [vmem:[%s11770_s6 + $0xd4] sm:$0xf0]  ;;  %v6481_v0 = vor.u32 %v7702_v7, %v6478_v48  ;;  %v6926_v43 = vld [vmem:[%s11770_s6 + $0x5b0] sm:$0xf0] }
 0x3c4   :  { %v7149_v12 = vor.u32 %v7872_v5, %v7148_v4  ;;  %4441 = vmatmul.bf16.vlgmr.msrb.gmra.mxu0 %v9634_v37  ;;  %v7101_v4 = vor.u32 %v7860_v61, %v7100_v54  ;;  %v7698_v5 = vld [vmem:[%s11770_s6 + $0x204] sm:$0xf]  ;;  %v6244_v7 = vld [vmem:[%s11770_s6 + $0x48] sm:$0xf]  ;;  %v7645_v48 = vld [vmem:[%s11770_s6 + $0x54] sm:$0xf0] }
 0x3c5   :  { %4489 = vmatpush.bf16.msra.mxu0 %v6769_v26  ;;  %v6353_v26 = vor.u32 %v7670_v13, %v6350_v51  ;;  %v7746_v13 = vld [vmem:[%s11770_s6 + $0x384] sm:$0xf]  ;;  %v6894_v54 = vld [vmem:[%s11770_s6 + $0x570] sm:$0xf0] }
 0x3c6   :  { %4401 = vmatpush.bf16.msrb.mxu1 %v6845_v34  ;;  %v2633_v15 = vpop.f32.mrf.mxu1  ;;  %4424 = vmatpush.bf16.msrb.mxu3 %v7149_v12  ;;  %v7132_v34 = vld [vmem:[%s11770_s6 + $0x740] sm:$0xf]  ;;  %v6958_v12 = vld [vmem:[%s11770_s6 + $0x5f0] sm:$0xf0] }
 0x3c7   :  { %4414 = vmatpush.bf16.msrb.mxu2 %v6973_v30  ;;  %v2621_v30 = vadd.f32 %v10400_v16, %v1060_v8  ;;  %v7133_v18 = vor.u32 %v7868_v35, %v7132_v34  ;;  %v6494_v16 = vld [vmem:[%s11770_s6 + $0x250] sm:$0xf0]  ;;  %v7754_v35 = vld [vmem:[%s11770_s6 + $0x3c4] sm:$0xf] }
 0x3c8   :  { %v6462_v8 = vld [vmem:[%s11770_s6 + $0x210] sm:$0xf0] }
 0x3c9   :  { %v2634_v40 = vadd.f32 %v2633_v15, %v2621_v30  ;;  %4490 = vmatpush.bf16.msra.mxu0 %v6753_v29  ;;  %v6292_v29 = vld [vmem:[%s11770_s6 + $0xa8] sm:$0xf]  ;;  %v6465_v34 = vor.u32 %v7698_v5, %v6462_v8  ;;  %v6686_v30 = vld [vmem:[%s11770_s6 + $0x3d0] sm:$0xf0] }
 0x3ca   :  { %4446 = vmatpush.bf16.msra.mxu1 %v6449_v36  ;;  %v6513_v36 = vor.u32 %v7710_v19, %v6510_v25  ;;  %4425 = vmatpush.bf16.msrb.mxu3 %v7133_v18  ;;  %v6309_v25 = vor.u32 %v7661_v22, %v6308_v58  ;;  %v6689_v18 = vor.u32 %v7754_v35, %v6686_v30  ;;  %v7806_v58 = vld [vmem:[%s11770_s6 + $0x564] sm:$0xf]  ;;  %v7641_v22 = vld [vmem:[%s11770_s6 + $0x34] sm:$0xf0] }
 0x3cb   :  { %4459 = vmatpush.bf16.msra.mxu2 %v6577_v39  ;;  %v7706_v39 = vld [vmem:[%s11770_s6 + $0x244] sm:$0xf]  ;;  %v6897_v5 = vor.u32 %v7806_v58, %v6894_v54  ;;  %v7793_v35 = vld [vmem:[%s11770_s6 + $0x4f4] sm:$0xf0] }
 0x3cc   :  { %v6497_v49 = vor.u32 %v7706_v39, %v6494_v16  ;;  %v6293_v39 = vor.u32 %v7657_v11, %v6292_v29  ;;  %v6276_v16 = vld [vmem:[%s11770_s6 + $0x88] sm:$0xf]  ;;  %v6606_v29 = vld [vmem:[%s11770_s6 + $0x330] sm:$0xf0] }
 0x3cd   :  { %v2646_v17 = vpop.f32.mrf.mxu2  ;;  %4491 = vmatpush.bf16.msra.mxu0 %v6737_v50  ;;  %v7750_v50 = vld [vmem:[%s11770_s6 + $0x3a4] sm:$0xf] }
 0x3ce   :  { %4447 = vmatpush.bf16.msra.mxu1 %v6433_v46  ;;  %v2647_v45 = vadd.f32 %v2646_v17, %v2634_v40  ;;  %v2635_v3 = vpop.f32.mrf.mxu1  ;;  %4426 = vmatpush.bf16.msrb.mxu3 %v7117_v24  ;;  %v7653_v40 = vld [vmem:[%s11770_s6 + $0x94] sm:$0xf0]  ;;  %v6673_v47 = vor.u32 %v7750_v50, %v6670_v14  ;;  %v6910_v24 = vld [vmem:[%s11770_s6 + $0x590] sm:$0xf0] }
 0x3cf   :  { %4460 = vmatpush.bf16.msra.mxu2 %v6561_v1  ;;  %v2659_v46 = vpop.f32.mrf.mxu3  ;;  %v6324_v1 = vld [vmem:[%s11770_s6 + $0xe8] sm:$0xf]  ;;  %v6277_v41 = vor.u32 %v7653_v40, %v6276_v16  ;;  %v7854_v16 = vld [vmem:[%s11770_s6 + $0x6e4] sm:$0xf]  ;;  %v7086_v14 = vld [vmem:[%s11770_s6 + $0x6f0] sm:$0xf0] }
 0x3d0   :  { %v2660_v52 = vadd.f32 %v2659_v46, %v2647_v45  ;;  %v6260_v45 = vld [vmem:[%s11770_s6 + $0x68] sm:$0xf]  ;;  %v7649_v46 = vld [vmem:[%s11770_s6 + $0x74] sm:$0xf0] }
 0x3d1   :  { %4492 = vmatpush.bf16.msra.mxu0 %v6721_v53  ;;  %v6261_v51 = vor.u32 %v7649_v46, %v6260_v45  ;;  %v6638_v53 = vld [vmem:[%s11770_s6 + $0x370] sm:$0xf0]  ;;  %v7794_v46 = vld [vmem:[%s11770_s6 + $0x504] sm:$0xf] }
 0x3d2   :  { %4448 = vmatpush.bf16.msra.mxu1 %v6417_v55  ;;  %v6325_v55 = vor.u32 %v7665_v27, %v6324_v1  ;;  %v2772_v62 = vmax.f32 %v2660_v52, 0.0  ;;  %4427 = vmatpush.bf16.msrb.mxu3 %v7101_v4  ;;  %v6654_v1 = vld [vmem:[%s11770_s6 + $0x390] sm:$0xf0]  ;;  %v7742_v52 = vld [vmem:[%s11770_s6 + $0x364] sm:$0xf] }
 0x3d3   :  { %4461 = vmatpush.bf16.msra.mxu2 %v6545_v57  ;;  %v6334_v57 = vld [vmem:[%s11770_s6 + $0x110] sm:$0xf0]  ;;  %v6657_v3 = vor.u32 %v7746_v13, %v6654_v1  ;;  %v6641_v61 = vor.u32 %v7742_v52, %v6638_v53  ;;  %v7089_v1 = vor.u32 %v7854_v16, %v7086_v14  ;;  %v6388_v16 = vld [vmem:[%s11770_s6 + $0x168] sm:$0xf] }
 0x3d4   :  { %v10642_v31 = vpack.c.bf16 %v2772_v62, %v2772_v62  ;;  %4493 = vmatmul.bf16.vlgmr.msra.gmra.mxu0 %v10429_v63  ;;  %v6245_v62 = vor.u32 %v7645_v48, %v6244_v7  ;;  %v6622_v4 = vld [vmem:[%s11770_s6 + $0x350] sm:$0xf0]  ;;  %v7850_v7 = vld [vmem:[%s11770_s6 + $0x6c4] sm:$0xf] }
 0x3d5   :  { %4537 = vmatpush.bf16.msrb.mxu0 %v6325_v55  ;;  %v2648_v19 = vpop.f32.mrf.mxu2  ;;  %v6846_v13 = vld [vmem:[%s11770_s6 + $0x510] sm:$0xf0] }
 0x3d6   :  { %4449 = vmatpush.bf16.msra.mxu1 %v6401_v9  ;;  %v7758_v9 = vld [vmem:[%s11770_s6 + $0x3e4] sm:$0xf]  ;;  %v7070_v48 = vld [vmem:[%s11770_s6 + $0x6d0] sm:$0xf0] }
 0x3d7   :  { %4462 = vmatpush.bf16.msra.mxu2 %v6529_v20  ;;  %v7822_v20 = vld [vmem:[%s11770_s6 + $0x5e4] sm:$0xf]  ;;  %v6705_v15 = vor.u32 %v7758_v9, %v6702_v42  ;;  %v2661_v32 = vpop.f32.mrf.mxu3  ;;  %4402 = vmatmul.bf16.vlgmr.msrb.gmra.mxu1 %v10642_v31  ;;  %v6878_v42 = vld [vmem:[%s11770_s6 + $0x550] sm:$0xf0]  ;;  %v7073_v54 = vor.u32 %v7850_v7, %v7070_v48 }
 0x3d8   :  { %v6961_v2 = vor.u32 %v7822_v20, %v6958_v12  ;;  %v7802_v9 = vld [vmem:[%s11770_s6 + $0x544] sm:$0xf] }
 0x3d9   :  { %4472 = vmatpush.bf16.msra.mxu3 %v6705_v15  ;;  %4538 = vmatpush.bf16.msrb.mxu0 %v6309_v25  ;;  %v6212_v15 = vld [vmem:[%s11770_s6 + $0x8] sm:$0xf]  ;;  %v7734_v25 = vld [vmem:[%s11770_s6 + $0x324] sm:$0xf]  ;;  %v6881_v11 = vor.u32 %v7802_v9, %v6878_v42 }
 0x3da   :  { %4450 = vmatpush.bf16.msra.mxu1 %v6385_v60  ;;  %v6337_v60 = vor.u32 %v7666_v56, %v6334_v57  ;;  %v1061_v56 = vperm.slane %v10357_v44, 6  ;;  %v6420_v42 = vld [vmem:[%s11770_s6 + $0x1a8] sm:$0xf] }
 0x3db   :  { %4463 = vmatpush.bf16.msra.mxu2 %v6513_v36  ;;  %v6942_v36 = vld [vmem:[%s11770_s6 + $0x5d0] sm:$0xf0] }
 0x3dc   :  { %v6945_v17 = vor.u32 %v7818_v38, %v6942_v36  ;;  %v2673_v8 = vadd.f32 %v9520_v21, %v1061_v56  ;;  %v7637_v21 = vld [vmem:[%s11770_s6 + $0x14] sm:$0xf0]  ;;  %v7798_v38 = vld [vmem:[%s11770_s6 + $0x524] sm:$0xf]  ;;  %v6862_v36 = vld [vmem:[%s11770_s6 + $0x530] sm:$0xf0] }
 0x3dd   :  { %4473 = vmatpush.bf16.msra.mxu3 %v6689_v18  ;;  %4539 = vmatpush.bf16.msrb.mxu0 %v6293_v39  ;;  %v6609_v18 = vor.u32 %v7734_v25, %v6606_v29  ;;  %v6213_v39 = vor.u32 %v7637_v21, %v6212_v15  ;;  %v6804_v56 = vld [vmem:[%s11770_s6 + $0x4a8] sm:$0xf]  ;;  %v7842_v15 = vld [vmem:[%s11770_s6 + $0x684] sm:$0xf]  ;;  %v7777_v25 = vld [vmem:[%s11770_s6 + $0x474] sm:$0xf0] }
 0x3de   :  { %4451 = vmatpush.bf16.msra.mxu1 %v6369_v33  ;;  %v7814_v33 = vld [vmem:[%s11770_s6 + $0x5a4] sm:$0xf]  ;;  %v6772_v21 = vld [vmem:[%s11770_s6 + $0x468] sm:$0xf] }
 0x3df   :  { %4464 = vmatpush.bf16.msra.mxu2 %v6497_v49  ;;  %v6929_v27 = vor.u32 %v7814_v33, %v6926_v43  ;;  %v7810_v49 = vld [vmem:[%s11770_s6 + $0x584] sm:$0xf]  ;;  %v6590_v33 = vld [vmem:[%s11770_s6 + $0x310] sm:$0xf0]  ;;  %v6865_v43 = vor.u32 %v7798_v38, %v6862_v36  ;;  %v7773_v38 = vld [vmem:[%s11770_s6 + $0x454] sm:$0xf0] }
 0x3e0   :  { %v6913_v55 = vor.u32 %v7810_v49, %v6910_v24  ;;  %v7697_v49 = vld [vmem:[%s11770_s6 + $0x1f4] sm:$0xf0] }
 0x3e1   :  { %4474 = vmatpush.bf16.msra.mxu3 %v6673_v47  ;;  %4540 = vmatpush.bf16.msrb.mxu0 %v6277_v41  ;;  %v6820_v47 = vld [vmem:[%s11770_s6 + $0x4c8] sm:$0xf]  ;;  %v7789_v41 = vld [vmem:[%s11770_s6 + $0x4d4] sm:$0xf0] }
 0x3e2   :  { %4452 = vmatpush.bf16.msra.mxu1 %v6353_v26  ;;  %v6228_v26 = vld [vmem:[%s11770_s6 + $0x28] sm:$0xf] }
 0x3e3   :  { %4465 = vmatpush.bf16.msra.mxu2 %v6481_v0  ;;  %v7738_v0 = vld [vmem:[%s11770_s6 + $0x344] sm:$0xf]  ;;  %v6229_v12 = vor.u32 %v7641_v22, %v6228_v26 }
 0x3e4   :  { %v6625_v20 = vor.u32 %v7738_v0, %v6622_v4  ;;  %v7846_v22 = vld [vmem:[%s11770_s6 + $0x6a4] sm:$0xf]  ;;  %v7054_v0 = vld [vmem:[%s11770_s6 + $0x6b0] sm:$0xf0]  ;;  %v6788_v4 = vld [vmem:[%s11770_s6 + $0x488] sm:$0xf] }
 0x3e5   :  { %4475 = vmatpush.bf16.msra.mxu3 %v6657_v3  ;;  %4541 = vmatpush.bf16.msrb.mxu0 %v6261_v51  ;;  %v6821_v51 = vor.u32 %v7789_v41, %v6820_v47  ;;  %v7057_v9 = vor.u32 %v7846_v22, %v7054_v0  ;;  %v6974_v22 = vld [vmem:[%s11770_s6 + $0x610] sm:$0xf0]  ;;  %v7886_v0 = vld [vmem:[%s11770_s6 + $0x7e4] sm:$0xf] }
 0x3e6   :  { %4453 = vmatpush.bf16.msra.mxu1 %v6337_v60  ;;  %v2685_v57 = vpop.f32.mrf.mxu1 }
 0x3e7   :  { %4466 = vmatpush.bf16.msra.mxu2 %v6465_v34  ;;  %v2686_v19 = vadd.f32 %v2685_v57, %v2673_v8  ;;  %v6836_v34 = vld [vmem:[%s11770_s6 + $0x4e8] sm:$0xf]  ;;  %v7785_v57 = vld [vmem:[%s11770_s6 + $0x4b4] sm:$0xf0] }
 0x3e8   :  { %v6837_v50 = vor.u32 %v7793_v35, %v6836_v34  ;;  %v6805_v26 = vor.u32 %v7785_v57, %v6804_v56  ;;  %v6773_v34 = vor.u32 %v7777_v25, %v6772_v21  ;;  %v7838_v35 = vld [vmem:[%s11770_s6 + $0x664] sm:$0xf]  ;;  %v7659_v25 = vld [vmem:[%s11770_s6 + $0xcc] sm:$0xf] }
 0x3e9   :  { %4454 = vmatmul.bf16.vlgmr.msra.gmra.mxu1 %v10333_v10  ;;  %4476 = vmatpush.bf16.msra.mxu3 %v6641_v61  ;;  %v6436_v61 = vld [vmem:[%s11770_s6 + $0x1c8] sm:$0xf] }
 0x3ea   :  { %4498 = vmatpush.bf16.msrb.mxu1 %v6961_v2  ;;  %4542 = vmatpush.bf16.msrb.mxu0 %v6245_v62  ;;  %v7693_v62 = vld [vmem:[%s11770_s6 + $0x1d4] sm:$0xf0] }
 0x3eb   :  { %v6437_v8 = vor.u32 %v7693_v62, %v6436_v61 }
 0x3ed   :  { %v2698_v32 = vpop.f32.mrf.mxu2  ;;  %4477 = vmatpush.bf16.msra.mxu3 %v6625_v20  ;;  %v7689_v20 = vld [vmem:[%s11770_s6 + $0x1b4] sm:$0xf0] }
 0x3ee   :  { %4499 = vmatpush.bf16.msrb.mxu1 %v6945_v17  ;;  %v2699_v30 = vadd.f32 %v2698_v32, %v2686_v19  ;;  %v2687_v2 = vpop.f32.mrf.mxu1  ;;  %4543 = vmatpush.bf16.msrb.mxu0 %v6229_v12  ;;  %v7730_v17 = vld [vmem:[%s11770_s6 + $0x304] sm:$0xf]  ;;  %v7038_v19 = vld [vmem:[%s11770_s6 + $0x690] sm:$0xf0]  ;;  %v6421_v29 = vor.u32 %v7689_v20, %v6420_v42  ;;  %v7729_v42 = vld [vmem:[%s11770_s6 + $0x2f4] sm:$0xf0] }
 0x3ef   :  { %v2711_v60 = vpop.f32.mrf.mxu3  ;;  %v6593_v24 = vor.u32 %v7730_v17, %v6590_v33  ;;  %v7041_v32 = vor.u32 %v7842_v15, %v7038_v19  ;;  %v6756_v2 = vld [vmem:[%s11770_s6 + $0x448] sm:$0xf]  ;;  %v7834_v17 = vld [vmem:[%s11770_s6 + $0x644] sm:$0xf]  ;;  %v7669_v15 = vld [vmem:[%s11770_s6 + $0x114] sm:$0xf0] }
 0x3f0   :  { %v2712_v40 = vadd.f32 %v2711_v60, %v2699_v30  ;;  %v6404_v60 = vld [vmem:[%s11770_s6 + $0x188] sm:$0xf]  ;;  %v7022_v30 = vld [vmem:[%s11770_s6 + $0x670] sm:$0xf0]  ;;  %v6757_v14 = vor.u32 %v7773_v38, %v6756_v2 }
 0x3f1   :  { %4478 = vmatpush.bf16.msra.mxu3 %v6609_v18  ;;  %v1062_v18 = vperm.slane %v10357_v44, 7  ;;  %v7006_v44 = vld [vmem:[%s11770_s6 + $0x650] sm:$0xf0]  ;;  %v6740_v33 = vld [vmem:[%s11770_s6 + $0x428] sm:$0xf] }
 0x3f2   :  { %4500 = vmatpush.bf16.msrb.mxu1 %v6929_v27  ;;  %v2773_v45 = vmax.f32 %v2712_v40, 0.0  ;;  %4544 = vmatpush.bf16.msrb.mxu0 %v6213_v39  ;;  %v6452_v27 = vld [vmem:[%s11770_s6 + $0x1e8] sm:$0xf]  ;;  %v7025_v39 = vor.u32 %v7838_v35, %v7022_v30  ;;  %v7681_v40 = vld [vmem:[%s11770_s6 + $0x174] sm:$0xf0] }
 0x3f3   :  { %v6453_v58 = vor.u32 %v7697_v49, %v6452_v27  ;;  %v6389_v47 = vor.u32 %v7681_v40, %v6388_v16  ;;  %v2725_v41 = vadd.f32 %v9613_v23, %v1062_v18  ;;  %v7830_v27 = vld [vmem:[%s11770_s6 + $0x624] sm:$0xf]  ;;  %v6990_v23 = vld [vmem:[%s11770_s6 + $0x630] sm:$0xf0]  ;;  %v6564_v38 = vld [vmem:[%s11770_s6 + $0x2c8] sm:$0xf] }
 0x3f4   :  { %v10799_v3 = vpack.c.bf16 %v2773_v45, %v2773_v45  ;;  %v7009_v45 = vor.u32 %v7834_v17, %v7006_v44  ;;  %v6993_v57 = vor.u32 %v7830_v27, %v6990_v23  ;;  %v7882_v35 = vld [vmem:[%s11770_s6 + $0x7c4] sm:$0xf]  ;;  %v7198_v2 = vld [vmem:[%s11770_s6 + $0x7d0] sm:$0xf0]  ;;  %v6294_v17 = vld [vmem:[%s11770_s6 + $0xb8] sm:$0xf0] }
 0x3f5   :  { %v2700_v52 = vpop.f32.mrf.mxu2  ;;  %4545 = vmatmul.bf16.vlgmr.msrb.gmra.mxu0 %v9634_v37  ;;  %4479 = vmatpush.bf16.msra.mxu3 %v6593_v24  ;;  %v6724_v24 = vld [vmem:[%s11770_s6 + $0x408] sm:$0xf]  ;;  %v7201_v44 = vor.u32 %v7882_v35, %v7198_v2  ;;  %v11000_v27 = vld [vmem:[%s11771_s7] sm:$0xf] }
 0x3f6   :  { %4501 = vmatpush.bf16.msrb.mxu1 %v6913_v55  ;;  %4589 = vmatpush.bf16.msra.mxu0 %v6837_v50  ;;  %v6849_v55 = vor.u32 %v7794_v46, %v6846_v13  ;;  %v6372_v46 = vld [vmem:[%s11770_s6 + $0x148] sm:$0xf]  ;;  %v7677_v13 = vld [vmem:[%s11770_s6 + $0x154] sm:$0xf0]  ;;  %v7663_v52 = vld [vmem:[%s11770_s6 + $0xec] sm:$0xf] }
 0x3f7   :  { %v2713_v53 = vpop.f32.mrf.mxu3  ;;  %4415 = vmatmul.bf16.vlgmr.msrb.gmra.mxu2 %v10799_v3  ;;  %v6373_v48 = vor.u32 %v7677_v13, %v6372_v46  ;;  %v6548_v46 = vld [vmem:[%s11770_s6 + $0x2a8] sm:$0xf]  ;;  %v7721_v13 = vld [vmem:[%s11770_s6 + $0x2b4] sm:$0xf0] }
 0x3f8   :  { %4511 = vmatpush.bf16.msrb.mxu2 %v7089_v1  ;;  %v6326_v53 = vld [vmem:[%s11770_s6 + $0xf8] sm:$0xf0]  ;;  %v6500_v2 = vld [vmem:[%s11770_s6 + $0x248] sm:$0xf] }
 0x3fa   :  { %4502 = vmatpush.bf16.msrb.mxu1 %v6897_v5  ;;  %4590 = vmatpush.bf16.msra.mxu0 %v6821_v51  ;;  %v7781_v5 = vld [vmem:[%s11770_s6 + $0x494] sm:$0xf0] }
 0x3fb   :  { %v6789_v12 = vor.u32 %v7781_v5, %v6788_v4  ;;  %v7765_v51 = vld [vmem:[%s11770_s6 + $0x414] sm:$0xf0]  ;;  %v6329_v5 = vor.u32 %v7663_v52, %v6326_v53  ;;  %v7874_v53 = vld [vmem:[%s11770_s6 + $0x784] sm:$0xf] }
 0x3fc   :  { %4512 = vmatpush.bf16.msrb.mxu2 %v7073_v54  ;;  %v7673_v54 = vld [vmem:[%s11770_s6 + $0x134] sm:$0xf0]  ;;  %v6725_v62 = vor.u32 %v7765_v51, %v6724_v24  ;;  %v6278_v24 = vld [vmem:[%s11770_s6 + $0x98] sm:$0xf0] }
 0x3fd   :  { %v7817_v52 = vld [vmem:[%s11770_s6 + $0x5b4] sm:$0xf0] }
 0x3fe   :  { %4503 = vmatpush.bf16.msrb.mxu1 %v6881_v11  ;;  %4591 = vmatpush.bf16.msra.mxu0 %v6805_v26  ;;  %v7685_v11 = vld [vmem:[%s11770_s6 + $0x194] sm:$0xf0]  ;;  %v7826_v26 = vld [vmem:[%s11770_s6 + $0x604] sm:$0xf] }
 0x3ff   :  { %v6405_v36 = vor.u32 %v7685_v11, %v6404_v60  ;;  %v6977_v21 = vor.u32 %v7826_v26, %v6974_v22  ;;  %v6964_v11 = vld [vmem:[%s11770_s6 + $0x5e8] sm:$0xf]  ;;  %v6262_v26 = vld [vmem:[%s11770_s6 + $0x78] sm:$0xf0] }
 0x400   :  { %4513 = vmatpush.bf16.msrb.mxu2 %v7057_v9  ;;  %v6580_v9 = vld [vmem:[%s11770_s6 + $0x2e8] sm:$0xf] }
 0x401   :  { %v6581_v60 = vor.u32 %v7729_v42, %v6580_v9  ;;  %v7150_v9 = vld [vmem:[%s11770_s6 + $0x770] sm:$0xf0]  ;;  %v6516_v42 = vld [vmem:[%s11770_s6 + $0x268] sm:$0xf] }
 0x402   :  { %4504 = vmatpush.bf16.msrb.mxu1 %v6865_v43  ;;  %4592 = vmatpush.bf16.msra.mxu0 %v6789_v12  ;;  %v7769_v43 = vld [vmem:[%s11770_s6 + $0x434] sm:$0xf0]  ;;  %v6340_v12 = vld [vmem:[%s11770_s6 + $0x108] sm:$0xf] }
 0x403   :  { %v6741_v1 = vor.u32 %v7769_v43, %v6740_v33  ;;  %v6948_v43 = vld [vmem:[%s11770_s6 + $0x5c8] sm:$0xf] }
 0x404   :  { %4514 = vmatpush.bf16.msrb.mxu2 %v7041_v32 }
 0x406   :  { %4505 = vmatpush.bf16.msrb.mxu1 %v6849_v55  ;;  %v2737_v50 = vpop.f32.mrf.mxu1  ;;  %4593 = vmatpush.bf16.msra.mxu0 %v6773_v34  ;;  %v7825_v34 = vld [vmem:[%s11770_s6 + $0x5f4] sm:$0xf0] }
 0x407   :  { %4467 = vmatmul.bf16.vlgmr.msra.gmra.mxu2 %v10335_v28  ;;  %v2738_v49 = vadd.f32 %v2737_v50, %v2725_v41  ;;  %v6965_v50 = vor.u32 %v7825_v34, %v6964_v11  ;;  %v7878_v41 = vld [vmem:[%s11770_s6 + $0x7a4] sm:$0xf]  ;;  %v7809_v11 = vld [vmem:[%s11770_s6 + $0x574] sm:$0xf0] }
 0x408   :  { %4515 = vmatpush.bf16.msrb.mxu2 %v7025_v39  ;;  %v6341_v39 = vor.u32 %v7669_v15, %v6340_v12  ;;  %v7866_v34 = vld [vmem:[%s11770_s6 + $0x744] sm:$0xf] }
 0x409   :  { %4506 = vmatmul.bf16.vlgmr.msrb.gmra.mxu1 %v10642_v31 }
 0x40a   :  { %4550 = vmatpush.bf16.msra.mxu1 %v6453_v58  ;;  %4594 = vmatpush.bf16.msra.mxu0 %v6757_v14  ;;  %v6356_v58 = vld [vmem:[%s11770_s6 + $0x128] sm:$0xf]  ;;  %v7655_v14 = vld [vmem:[%s11770_s6 + $0xac] sm:$0xf] }
 0x40b   :  { %v6357_v20 = vor.u32 %v7673_v54, %v6356_v58  ;;  %v3041_v54 = vperm.slane %v11000_v27, 0 }
 0x40c   :  { %4516 = vmatpush.bf16.msrb.mxu2 %v7009_v45  ;;  %v7182_v45 = vld [vmem:[%s11770_s6 + $0x7b0] sm:$0xf0] }
 0x40d   :  { %v2750_v7 = vpop.f32.mrf.mxu2  ;;  %v7185_v51 = vor.u32 %v7878_v41, %v7182_v45  ;;  %v7705_v41 = vld [vmem:[%s11770_s6 + $0x234] sm:$0xf0] }
 0x40e   :  { %4551 = vmatpush.bf16.msra.mxu1 %v6437_v8  ;;  %v2751_v55 = vadd.f32 %v2750_v7, %v2738_v49  ;;  %v2739_v61 = vpop.f32.mrf.mxu1  ;;  %4595 = vmatpush.bf16.msra.mxu0 %v6741_v1  ;;  %v7214_v8 = vld [vmem:[%s11770_s6 + $0x7f0] sm:$0xf0]  ;;  %v6297_v1 = vor.u32 %v7655_v14, %v6294_v17  ;;  %v7651_v49 = vld [vmem:[%s11770_s6 + $0x8c] sm:$0xf]  ;;  %v6549_v7 = vor.u32 %v7721_v13, %v6548_v46  ;;  %v6884_v17 = vld [vmem:[%s11770_s6 + $0x548] sm:$0xf] }
 0x40f   :  { %v2763_v56 = vpop.f32.mrf.mxu3  ;;  %v7217_v32 = vor.u32 %v7886_v0, %v7214_v8  ;;  %v6281_v58 = vor.u32 %v7651_v49, %v6278_v24  ;;  %v7870_v8 = vld [vmem:[%s11770_s6 + $0x764] sm:$0xf]  ;;  %v7635_v46 = vld [vmem:[%s11770_s6 + $0xc] sm:$0xf]  ;;  %v6214_v13 = vld [vmem:[%s11770_s6 + $0x18] sm:$0xf0] }
 0x410   :  { %v2764_v4 = vadd.f32 %v2763_v56, %v2751_v55  ;;  %4517 = vmatpush.bf16.msrb.mxu2 %v6993_v57  ;;  %v7166_v55 = vld [vmem:[%s11770_s6 + $0x790] sm:$0xf0]  ;;  %v6532_v56 = vld [vmem:[%s11770_s6 + $0x288] sm:$0xf]  ;;  %v7717_v57 = vld [vmem:[%s11770_s6 + $0x294] sm:$0xf0] }
 0x411   :  { %v7169_v22 = vor.u32 %v7874_v53, %v7166_v55  ;;  %v6533_v0 = vor.u32 %v7717_v57, %v6532_v56  ;;  %v7801_v49 = vld [vmem:[%s11770_s6 + $0x534] sm:$0xf0]  ;;  %v7791_v24 = vld [vmem:[%s11770_s6 + $0x4ec] sm:$0xf]  ;;  %v6838_v53 = vld [vmem:[%s11770_s6 + $0x4f8] sm:$0xf0] }
 0x412   :  { %4552 = vmatpush.bf16.msra.mxu1 %v6421_v29  ;;  %v2774_v19 = vmax.f32 %v2764_v4, 0.0  ;;  %v6310_v29 = vld [vmem:[%s11770_s6 + $0xd8] sm:$0xf0]  ;;  %4596 = vmatpush.bf16.msra.mxu0 %v6725_v62  ;;  %v7647_v62 = vld [vmem:[%s11770_s6 + $0x6c] sm:$0xf] }
 0x413   :  { %v6313_v16 = vor.u32 %v7659_v25, %v6310_v29  ;;  %v6916_v4 = vld [vmem:[%s11770_s6 + $0x588] sm:$0xf]  ;;  %v6265_v12 = vor.u32 %v7647_v62, %v6262_v26  ;;  %v4339_v25 = vadd.f32 %v10385_v59, %v3041_v54  ;;  %v7153_v29 = vor.u32 %v7870_v8, %v7150_v9  ;;  %v7134_v59 = vld [vmem:[%s11770_s6 + $0x750] sm:$0xf0]  ;;  %v7858_v55 = vld [vmem:[%s11770_s6 + $0x704] sm:$0xf] }
 0x414   :  { %v10960_v30 = vpack.c.bf16 %v2774_v19, %v2774_v19  ;;  %4518 = vmatpush.bf16.msrb.mxu2 %v6977_v21  ;;  %v7643_v19 = vld [vmem:[%s11770_s6 + $0x4c] sm:$0xf]  ;;  %v6246_v21 = vld [vmem:[%s11770_s6 + $0x58] sm:$0xf0]  ;;  %v7102_v56 = vld [vmem:[%s11770_s6 + $0x710] sm:$0xf0]  ;;  %v6217_v26 = vor.u32 %v7635_v46, %v6214_v13  ;;  %v6841_v9 = vor.u32 %v7791_v24, %v6838_v53 }
 0x415   :  { %v2752_v18 = vpop.f32.mrf.mxu2  ;;  %4597 = vmatmul.bf16.vlgmr.msra.gmra.mxu0 %v10429_v63  ;;  %v6468_v54 = vld [vmem:[%s11770_s6 + $0x208] sm:$0xf]  ;;  %v7779_v13 = vld [vmem:[%s11770_s6 + $0x48c] sm:$0xf] }
 0x416   :  { %4553 = vmatpush.bf16.msra.mxu1 %v6405_v36  ;;  %4641 = vmatpush.bf16.msrb.mxu0 %v6329_v5  ;;  %v7725_v36 = vld [vmem:[%s11770_s6 + $0x2d4] sm:$0xf0]  ;;  %v6249_v18 = vor.u32 %v7643_v19, %v6246_v21  ;;  %v6708_v62 = vld [vmem:[%s11770_s6 + $0x3e8] sm:$0xf] }
 0x417   :  { %v2765_v40 = vpop.f32.mrf.mxu3  ;;  %4428 = vmatmul.bf16.vlgmr.msrb.gmra.mxu3 %v10960_v30  ;;  %v6565_v33 = vor.u32 %v7725_v36, %v6564_v38  ;;  %4519 = vmatmul.bf16.vlgmr.msrb.gmra.mxu2 %v10799_v3  ;;  %v7813_v5 = vld [vmem:[%s11770_s6 + $0x594] sm:$0xf0]  ;;  %v7044_v53 = vld [vmem:[%s11770_s6 + $0x688] sm:$0xf] }
 0x418   :  { %4524 = vmatpush.bf16.msrb.mxu3 %v7217_v32  ;;  %4563 = vmatpush.bf16.msra.mxu2 %v6581_v60  ;;  %v6917_v15 = vor.u32 %v7813_v5, %v6916_v4  ;;  %v6900_v60 = vld [vmem:[%s11770_s6 + $0x568] sm:$0xf]  ;;  %v7709_v38 = vld [vmem:[%s11770_s6 + $0x254] sm:$0xf0]  ;;  %v6230_v40 = vld [vmem:[%s11770_s6 + $0x38] sm:$0xf0] }
 0x419   :  { %v6501_v14 = vor.u32 %v7709_v38, %v6500_v2  ;;  %v7857_v4 = vld [vmem:[%s11770_s6 + $0x6f4] sm:$0xf0] }
 0x41a   :  { %4554 = vmatpush.bf16.msra.mxu1 %v6389_v47  ;;  %v7821_v47 = vld [vmem:[%s11770_s6 + $0x5d4] sm:$0xf0]  ;;  %4642 = vmatpush.bf16.msrb.mxu0 %v6313_v16  ;;  %v7639_v16 = vld [vmem:[%s11770_s6 + $0x2c] sm:$0xf] }
 0x41b   :  { %v6949_v23 = vor.u32 %v7821_v47, %v6948_v43  ;;  %v7118_v43 = vld [vmem:[%s11770_s6 + $0x730] sm:$0xf0]  ;;  %v6484_v47 = vld [vmem:[%s11770_s6 + $0x228] sm:$0xf]  ;;  %v6233_v45 = vor.u32 %v7639_v16, %v6230_v40  ;;  %v7853_v2 = vld [vmem:[%s11770_s6 + $0x6d4] sm:$0xf0] }
 0x41c   :  { %4525 = vmatpush.bf16.msrb.mxu3 %v7201_v44  ;;  %4564 = vmatpush.bf16.msra.mxu2 %v6565_v33  ;;  %v7805_v44 = vld [vmem:[%s11770_s6 + $0x554] sm:$0xf0]  ;;  %v7862_v33 = vld [vmem:[%s11770_s6 + $0x724] sm:$0xf]  ;;  %v7783_v40 = vld [vmem:[%s11770_s6 + $0x4ac] sm:$0xf] }
 0x41e   :  { %4555 = vmatpush.bf16.msra.mxu1 %v6373_v48  ;;  %v6932_v48 = vld [vmem:[%s11770_s6 + $0x5a8] sm:$0xf]  ;;  %4643 = vmatpush.bf16.msrb.mxu0 %v6297_v1  ;;  %v6885_v1 = vor.u32 %v7805_v44, %v6884_v17  ;;  %v6438_v44 = vld [vmem:[%s11770_s6 + $0x1d8] sm:$0xf0] }
 0x41f   :  { %v6933_v61 = vor.u32 %v7817_v52, %v6932_v48  ;;  %v7121_v48 = vor.u32 %v7862_v33, %v7118_v43  ;;  %v6485_v52 = vor.u32 %v7705_v41, %v6484_v47  ;;  %v6676_v33 = vld [vmem:[%s11770_s6 + $0x3a8] sm:$0xf]  ;;  %v7753_v43 = vld [vmem:[%s11770_s6 + $0x3b4] sm:$0xf0] }
 0x420   :  { %4526 = vmatpush.bf16.msrb.mxu3 %v7185_v51  ;;  %4565 = vmatpush.bf16.msra.mxu2 %v6549_v7  ;;  %v7849_v47 = vld [vmem:[%s11770_s6 + $0x6b4] sm:$0xf0]  ;;  %v6677_v46 = vor.u32 %v7753_v43, %v6676_v33  ;;  %v7763_v33 = vld [vmem:[%s11770_s6 + $0x40c] sm:$0xf] }
 0x422   :  { %4556 = vmatpush.bf16.msra.mxu1 %v6357_v20  ;;  %v7713_v20 = vld [vmem:[%s11770_s6 + $0x274] sm:$0xf0]  ;;  %4644 = vmatpush.bf16.msrb.mxu0 %v6281_v58 }
 0x423   :  { %v6517_v32 = vor.u32 %v7713_v20, %v6516_v42  ;;  %v7105_v42 = vor.u32 %v7858_v55, %v7102_v56  ;;  %v7845_v55 = vld [vmem:[%s11770_s6 + $0x694] sm:$0xf0] }
 0x424   :  { %4527 = vmatpush.bf16.msrb.mxu3 %v7169_v22  ;;  %4566 = vmatpush.bf16.msra.mxu2 %v6533_v0  ;;  %v7761_v22 = vld [vmem:[%s11770_s6 + $0x3f4] sm:$0xf0]  ;;  %v7092_v0 = vld [vmem:[%s11770_s6 + $0x6e8] sm:$0xf] }
 0x425   :  { %v6709_v19 = vor.u32 %v7761_v22, %v6708_v62  ;;  %v7093_v21 = vor.u32 %v7857_v4, %v7092_v0  ;;  %v7683_v62 = vld [vmem:[%s11770_s6 + $0x18c] sm:$0xf]  ;;  %v6406_v22 = vld [vmem:[%s11770_s6 + $0x198] sm:$0xf0]  ;;  %v6644_v0 = vld [vmem:[%s11770_s6 + $0x368] sm:$0xf] }
 0x426   :  { %4557 = vmatpush.bf16.msra.mxu1 %v6341_v39  ;;  %v4351_v35 = vpop.f32.mrf.mxu1  ;;  %4645 = vmatpush.bf16.msrb.mxu0 %v6265_v12  ;;  %v6901_v39 = vor.u32 %v7809_v11, %v6900_v60  ;;  %v6852_v12 = vld [vmem:[%s11770_s6 + $0x508] sm:$0xf]  ;;  %v6454_v60 = vld [vmem:[%s11770_s6 + $0x1f8] sm:$0xf0]  ;;  %v7745_v4 = vld [vmem:[%s11770_s6 + $0x374] sm:$0xf0] }
 0x427   :  { %v4352_v36 = vadd.f32 %v4351_v35, %v4339_v25  ;;  %4480 = vmatmul.bf16.vlgmr.msra.gmra.mxu3 %v10337_v6  ;;  %v7787_v25 = vld [vmem:[%s11770_s6 + $0x4cc] sm:$0xf]  ;;  %v6692_v11 = vld [vmem:[%s11770_s6 + $0x3c8] sm:$0xf] }
 0x428   :  { %4528 = vmatpush.bf16.msrb.mxu3 %v7153_v29  ;;  %4567 = vmatpush.bf16.msra.mxu2 %v6517_v32  ;;  %v6822_v29 = vld [vmem:[%s11770_s6 + $0x4d8] sm:$0xf0]  ;;  %v7695_v32 = vld [vmem:[%s11770_s6 + $0x1ec] sm:$0xf] }
 0x429   :  { %4558 = vmatmul.bf16.vlgmr.msra.gmra.mxu1 %v10333_v10 }
 0x42a   :  { %4602 = vmatpush.bf16.msrb.mxu1 %v6965_v50  ;;  %v7137_v50 = vor.u32 %v7866_v34, %v7134_v59  ;;  %4646 = vmatpush.bf16.msrb.mxu0 %v6249_v18  ;;  %v7757_v34 = vld [vmem:[%s11770_s6 + $0x3d4] sm:$0xf0]  ;;  %v7076_v59 = vld [vmem:[%s11770_s6 + $0x6c8] sm:$0xf]  ;;  %v6825_v18 = vor.u32 %v7787_v25, %v6822_v29  ;;  %v6390_v29 = vld [vmem:[%s11770_s6 + $0x178] sm:$0xf0] }
 0x42b   :  { %v6693_v16 = vor.u32 %v7757_v34, %v6692_v11  ;;  %v7077_v17 = vor.u32 %v7853_v2, %v7076_v59  ;;  %v7012_v11 = vld [vmem:[%s11770_s6 + $0x648] sm:$0xf]  ;;  %v7837_v34 = vld [vmem:[%s11770_s6 + $0x654] sm:$0xf0] }
 0x42c   :  { %4529 = vmatpush.bf16.msrb.mxu3 %v7137_v50  ;;  %4568 = vmatpush.bf16.msra.mxu2 %v6501_v14  ;;  %v6806_v50 = vld [vmem:[%s11770_s6 + $0x4b8] sm:$0xf0]  ;;  %v7691_v14 = vld [vmem:[%s11770_s6 + $0x1cc] sm:$0xf] }
 0x42d   :  { %v4364_v51 = vpop.f32.mrf.mxu2  ;;  %v6809_v41 = vor.u32 %v7783_v40, %v6806_v50  ;;  %v6612_v40 = vld [vmem:[%s11770_s6 + $0x328] sm:$0xf]  ;;  %v7737_v50 = vld [vmem:[%s11770_s6 + $0x334] sm:$0xf0] }
 0x42e   :  { %4603 = vmatpush.bf16.msrb.mxu1 %v6949_v23  ;;  %v6868_v23 = vld [vmem:[%s11770_s6 + $0x528] sm:$0xf]  ;;  %v4377_v7 = vpop.f32.mrf.mxu3  ;;  %v4365_v57 = vadd.f32 %v4364_v51, %v4352_v36  ;;  %v4353_v58 = vpop.f32.mrf.mxu1  ;;  %4647 = vmatpush.bf16.msrb.mxu0 %v6233_v45  ;;  %v6441_v45 = vor.u32 %v7691_v14, %v6438_v44  ;;  %v6422_v51 = vld [vmem:[%s11770_s6 + $0x1b8] sm:$0xf0] }
 0x42f   :  { %v6869_v8 = vor.u32 %v7801_v49, %v6868_v23  ;;  %v7687_v23 = vld [vmem:[%s11770_s6 + $0x1ac] sm:$0xf]  ;;  %v6996_v14 = vld [vmem:[%s11770_s6 + $0x628] sm:$0xf] }
 0x430   :  { %v4378_v5 = vadd.f32 %v4377_v7, %v4365_v57  ;;  %4530 = vmatpush.bf16.msrb.mxu3 %v7121_v48  ;;  %4569 = vmatpush.bf16.msra.mxu2 %v6485_v52  ;;  %v6660_v7 = vld [vmem:[%s11770_s6 + $0x388] sm:$0xf]  ;;  %v7749_v48 = vld [vmem:[%s11770_s6 + $0x394] sm:$0xf0]  ;;  %v6425_v57 = vor.u32 %v7687_v23, %v6422_v51 }
 0x431   :  { %v4390_v49 = vpop.f32.mrf.mxu0  ;;  %v6661_v58 = vor.u32 %v7749_v48, %v6660_v7  ;;  %v7733_v23 = vld [vmem:[%s11770_s6 + $0x314] sm:$0xf0]  ;;  %v7220_v51 = vld [vmem:[%s11770_s6 + $0x7e8] sm:$0xf] }
 0x432   :  { %4604 = vmatpush.bf16.msrb.mxu1 %v6933_v61  ;;  %v7701_v61 = vld [vmem:[%s11770_s6 + $0x214] sm:$0xf0]  ;;  %4648 = vmatpush.bf16.msrb.mxu0 %v6217_v26  ;;  %v11221_v52 = vadd.f32 %v4390_v49, %v4378_v5  ;;  %v7045_v26 = vor.u32 %v7845_v55, %v7044_v53  ;;  %v7028_v5 = vld [vmem:[%s11770_s6 + $0x668] sm:$0xf]  ;;  %v7727_v53 = vld [vmem:[%s11770_s6 + $0x2ec] sm:$0xf] }
 0x433   :  { %v6469_v20 = vor.u32 %v7701_v61, %v6468_v54  ;;  %v7775_v54 = vld [vmem:[%s11770_s6 + $0x46c] sm:$0xf]  ;;  %v6774_v61 = vld [vmem:[%s11770_s6 + $0x478] sm:$0xf0]  ;;  %v6980_v49 = vld [vmem:[%s11770_s6 + $0x608] sm:$0xf] }
 0x434   :  { %4531 = vmatpush.bf16.msrb.mxu3 %v7105_v42  ;;  %v6409_v42 = vor.u32 %v7683_v62, %v6406_v22  ;;  %v7889_v7 = vld [vmem:[%s11770_s6 + $0x7f4] sm:$0xf0]  ;;  %v6582_v55 = vld [vmem:[%s11770_s6 + $0x2f8] sm:$0xf0] }
 0x435   :  { %v4366_v38 = vpop.f32.mrf.mxu2  ;;  %4570 = vmatpush.bf16.msra.mxu2 %v6469_v20  ;;  %4649 = vmatmul.bf16.vlgmr.msrb.gmra.mxu0 %v9634_v37  ;;  %v7060_v37 = vld [vmem:[%s11770_s6 + $0x6a8] sm:$0xf]  ;;  %v6645_v20 = vor.u32 %v7745_v4, %v6644_v0  ;;  %v6342_v62 = vld [vmem:[%s11770_s6 + $0x118] sm:$0xf0]  ;;  %v6585_v22 = vor.u32 %v7727_v53, %v6582_v55 }
 0x436   :  { %4605 = vmatpush.bf16.msrb.mxu1 %v6917_v15  ;;  %v7797_v15 = vld [vmem:[%s11770_s6 + $0x514] sm:$0xf0]  ;;  %4693 = vmatpush.bf16.msra.mxu0 %v6841_v9  ;;  %v4379_v36 = vpop.f32.mrf.mxu3  ;;  %v7061_v24 = vor.u32 %v7849_v47, %v7060_v37  ;;  %v6777_v9 = vor.u32 %v7775_v54, %v6774_v61  ;;  %v7767_v38 = vld [vmem:[%s11770_s6 + $0x42c] sm:$0xf]  ;;  %v6613_v37 = vor.u32 %v7737_v50, %v6612_v40  ;;  %v6726_v47 = vld [vmem:[%s11770_s6 + $0x418] sm:$0xf0] }
 0x437   :  { %v6853_v35 = vor.u32 %v7797_v15, %v6852_v12  ;;  %4532 = vmatmul.bf16.vlgmr.msrb.gmra.mxu3 %v10960_v30  ;;  %v7771_v12 = vld [vmem:[%s11770_s6 + $0x44c] sm:$0xf]  ;;  %v6758_v15 = vld [vmem:[%s11770_s6 + $0x458] sm:$0xf0]  ;;  %v6729_v48 = vor.u32 %v7763_v33, %v6726_v47  ;;  %v7221_v54 = vor.u32 %v7889_v7, %v7220_v51  ;;  %v7204_v4 = vld [vmem:[%s11770_s6 + $0x7c8] sm:$0xf] }
 0x438   :  { %4576 = vmatpush.bf16.msra.mxu3 %v6709_v19  ;;  %4571 = vmatmul.bf16.vlgmr.msra.gmra.mxu2 %v10335_v28  ;;  %v7679_v19 = vld [vmem:[%s11770_s6 + $0x16c] sm:$0xf]  ;;  %v6742_v36 = vld [vmem:[%s11770_s6 + $0x438] sm:$0xf0]  ;;  %v7156_v33 = vld [vmem:[%s11770_s6 + $0x768] sm:$0xf] }
 0x439   :  { %4615 = vmatpush.bf16.msrb.mxu2 %v7093_v21  ;;  %v4392_v21 = vpop.f32.mrf.mxu0  ;;  %v6393_v59 = vor.u32 %v7679_v19, %v6390_v29  ;;  %v6745_v44 = vor.u32 %v7767_v38, %v6742_v36  ;;  %v7667_v61 = vld [vmem:[%s11770_s6 + $0x10c] sm:$0xf]  ;;  %v6966_v0 = vld [vmem:[%s11770_s6 + $0x5f8] sm:$0xf0]  ;;  %v7188_v29 = vld [vmem:[%s11770_s6 + $0x7a8] sm:$0xf] }
 0x43a   :  { %4606 = vmatpush.bf16.msrb.mxu1 %v6901_v39  ;;  %v6457_v39 = vor.u32 %v7695_v32, %v6454_v60  ;;  %4694 = vmatpush.bf16.msra.mxu0 %v6825_v18  ;;  %v6628_v32 = vld [vmem:[%s11770_s6 + $0x348] sm:$0xf]  ;;  %v7741_v60 = vld [vmem:[%s11770_s6 + $0x354] sm:$0xf0]  ;;  %v7675_v18 = vld [vmem:[%s11770_s6 + $0x14c] sm:$0xf] }
 0x43b   :  { %v6629_v2 = vor.u32 %v7741_v60, %v6628_v32  ;;  %v7819_v19 = vld [vmem:[%s11770_s6 + $0x5cc] sm:$0xf]  ;;  %v7881_v32 = vld [vmem:[%s11770_s6 + $0x7b4] sm:$0xf0]  ;;  %v7172_v38 = vld [vmem:[%s11770_s6 + $0x788] sm:$0xf] }
 0x43c   :  { %4577 = vmatpush.bf16.msra.mxu3 %v6693_v16  ;;  %v6374_v16 = vld [vmem:[%s11770_s6 + $0x158] sm:$0xf0]  ;;  %v7719_v60 = vld [vmem:[%s11770_s6 + $0x2ac] sm:$0xf]  ;;  %v7877_v36 = vld [vmem:[%s11770_s6 + $0x794] sm:$0xf0] }
 0x43d   :  { %4616 = vmatpush.bf16.msrb.mxu2 %v7077_v17  ;;  %v7833_v17 = vld [vmem:[%s11770_s6 + $0x634] sm:$0xf0]  ;;  %v6377_v43 = vor.u32 %v7675_v18, %v6374_v16  ;;  %v7715_v18 = vld [vmem:[%s11770_s6 + $0x28c] sm:$0xf]  ;;  %v6518_v47 = vld [vmem:[%s11770_s6 + $0x278] sm:$0xf0] }
 0x43e   :  { %4607 = vmatpush.bf16.msrb.mxu1 %v6885_v1  ;;  %v6790_v1 = vld [vmem:[%s11770_s6 + $0x498] sm:$0xf0]  ;;  %4695 = vmatpush.bf16.msra.mxu0 %v6809_v41  ;;  %v7671_v41 = vld [vmem:[%s11770_s6 + $0x12c] sm:$0xf] }
 0x43f   :  { %v6793_v56 = vor.u32 %v7779_v13, %v6790_v1  ;;  %v6997_v13 = vor.u32 %v7833_v17, %v6996_v14  ;;  %v6596_v1 = vld [vmem:[%s11770_s6 + $0x308] sm:$0xf]  ;;  %v7173_v14 = vor.u32 %v7877_v36, %v7172_v38  ;;  %v7707_v51 = vld [vmem:[%s11770_s6 + $0x24c] sm:$0xf]  ;;  %v6502_v7 = vld [vmem:[%s11770_s6 + $0x258] sm:$0xf0] }
 0x440   :  { %4578 = vmatpush.bf16.msra.mxu3 %v6677_v46 }
 0x441   :  { %4617 = vmatpush.bf16.msrb.mxu2 %v7061_v24  ;;  %v11313_v46 = vpop.f32.mrf.mxu0  ;;  %v7829_v24 = vld [vmem:[%s11770_s6 + $0x614] sm:$0xf0] }
 0x442   :  { %4608 = vmatpush.bf16.msrb.mxu1 %v6869_v8  ;;  %v7841_v8 = vld [vmem:[%s11770_s6 + $0x674] sm:$0xf0]  ;;  %4696 = vmatpush.bf16.msra.mxu0 %v6793_v56 }
 0x443   :  { %v7029_v25 = vor.u32 %v7841_v8, %v7028_v5  ;;  %v7885_v5 = vld [vmem:[%s11770_s6 + $0x7d4] sm:$0xf0]  ;;  %v7723_v8 = vld [vmem:[%s11770_s6 + $0x2cc] sm:$0xf] }
 0x444   :  { %4579 = vmatpush.bf16.msra.mxu3 %v6661_v58  ;;  %v6981_v58 = vor.u32 %v7829_v24, %v6980_v49  ;;  %v7140_v49 = vld [vmem:[%s11770_s6 + $0x748] sm:$0xf]  ;;  %v7869_v24 = vld [vmem:[%s11770_s6 + $0x754] sm:$0xf0] }
 0x445   :  { %4618 = vmatpush.bf16.msrb.mxu2 %v7045_v26  ;;  %v7823_v26 = vld [vmem:[%s11770_s6 + $0x5ec] sm:$0xf] }
 0x446   :  { %4609 = vmatpush.bf16.msrb.mxu1 %v6853_v35  ;;  %4697 = vmatpush.bf16.msra.mxu0 %v6777_v9  ;;  %v6761_v35 = vor.u32 %v7771_v12, %v6758_v15  ;;  %v6566_v9 = vld [vmem:[%s11770_s6 + $0x2d8] sm:$0xf0]  ;;  %v6969_v12 = vor.u32 %v7823_v26, %v6966_v0  ;;  %v7205_v15 = vor.u32 %v7885_v5, %v7204_v4  ;;  %v7865_v26 = vld [vmem:[%s11770_s6 + $0x734] sm:$0xf0]  ;;  %v3042_v4 = vperm.slane %v11000_v27, 1 }
 0x447   :  { %v6569_v21 = vor.u32 %v7723_v8, %v6566_v9  ;;  %v6486_v0 = vld [vmem:[%s11770_s6 + $0x238] sm:$0xf0]  ;;  %v7799_v9 = vld [vmem:[%s11770_s6 + $0x52c] sm:$0xf] }
 0x448   :  { %4580 = vmatpush.bf16.msra.mxu3 %v6645_v20 }
 0x449   :  { %4610 = vmatmul.bf16.vlgmr.msrb.gmra.mxu1 %v10642_v31  ;;  %4619 = vmatpush.bf16.msrb.mxu2 %v7029_v25  ;;  %v4444_v20 = vpop.f32.mrf.mxu0  ;;  %v6950_v25 = vld [vmem:[%s11770_s6 + $0x5d8] sm:$0xf0] }
 0x44a   :  { %4654 = vmatpush.bf16.msra.mxu1 %v6457_v39  ;;  %v7013_v39 = vor.u32 %v7837_v34, %v7012_v11  ;;  %4698 = vmatpush.bf16.msra.mxu0 %v6761_v35  ;;  %v6953_v11 = vor.u32 %v7819_v19, %v6950_v25  ;;  %v7189_v34 = vor.u32 %v7881_v32, %v7188_v29  ;;  %v7815_v35 = vld [vmem:[%s11770_s6 + $0x5ac] sm:$0xf]  ;;  %v7896_v20 = vld [vmem:[%s11772_s8 + $0x30] sm:$0xff]  ;;  %v7861_v19 = vld [vmem:[%s11770_s6 + $0x714] sm:$0xf0] }
 0x44b   :  { %v6470_v25 = vld [vmem:[%s11770_s6 + $0x218] sm:$0xf0]  ;;  %v7759_v29 = vld [vmem:[%s11770_s6 + $0x3ec] sm:$0xf] }
 0x44c   :  { %4581 = vmatpush.bf16.msra.mxu3 %v6629_v2  ;;  %v6934_v2 = vld [vmem:[%s11770_s6 + $0x5b8] sm:$0xf0] }
 0x44d   :  { %4620 = vmatpush.bf16.msrb.mxu2 %v7013_v39  ;;  %v6534_v39 = vld [vmem:[%s11770_s6 + $0x298] sm:$0xf0]  ;;  %v6937_v50 = vor.u32 %v7815_v35, %v6934_v2 }
 0x44e   :  { %4655 = vmatpush.bf16.msra.mxu1 %v6441_v45  ;;  %v6358_v45 = vld [vmem:[%s11770_s6 + $0x138] sm:$0xf0]  ;;  %4699 = vmatpush.bf16.msra.mxu0 %v6745_v44  ;;  %v6537_v17 = vor.u32 %v7715_v18, %v6534_v39  ;;  %v7795_v18 = vld [vmem:[%s11770_s6 + $0x50c] sm:$0xf] }
 0x44f   :  { %v6361_v56 = vor.u32 %v7671_v41, %v6358_v45  ;;  %v6918_v44 = vld [vmem:[%s11770_s6 + $0x598] sm:$0xf0] }
 0x450   :  { %4582 = vmatpush.bf16.msra.mxu3 %v6613_v37  ;;  %v7711_v37 = vld [vmem:[%s11770_s6 + $0x26c] sm:$0xf]  ;;  %v6710_v32 = vld [vmem:[%s11770_s6 + $0x3f8] sm:$0xf0] }
 0x451   :  { %4621 = vmatpush.bf16.msrb.mxu2 %v6997_v13  ;;  %v11405_v40 = vpop.f32.mrf.mxu0  ;;  %v7807_v13 = vld [vmem:[%s11770_s6 + $0x56c] sm:$0xf]  ;;  %v6713_v36 = vor.u32 %v7759_v29, %v6710_v32  ;;  %v6614_v29 = vld [vmem:[%s11770_s6 + $0x338] sm:$0xf0] }
 0x452   :  { %4656 = vmatpush.bf16.msra.mxu1 %v6425_v57  ;;  %v6597_v57 = vor.u32 %v7733_v23, %v6596_v1  ;;  %4700 = vmatpush.bf16.msra.mxu0 %v6729_v48  ;;  %v6521_v1 = vor.u32 %v7711_v37, %v6518_v47  ;;  %v6902_v23 = vld [vmem:[%s11770_s6 + $0x578] sm:$0xf0]  ;;  %v7831_v32 = vld [vmem:[%s11770_s6 + $0x62c] sm:$0xf] }
 0x453   :  { %v6905_v55 = vor.u32 %v7807_v13, %v6902_v23  ;;  %v7893_v13 = vld [vmem:[%s11772_s8 + $0x18] sm:$0xff] }
 0x454   :  { %4583 = vmatpush.bf16.msra.mxu3 %v6597_v57  ;;  %v11403_v16 = vpop.f32.mrf.mxu1  ;;  %v7803_v57 = vld [vmem:[%s11770_s6 + $0x54c] sm:$0xf]  ;;  %v7062_v23 = vld [vmem:[%s11770_s6 + $0x6b8] sm:$0xf0] }
 0x455   :  { %4622 = vmatpush.bf16.msrb.mxu2 %v6981_v58  ;;  %4701 = vmatmul.bf16.vlgmr.msra.gmra.mxu0 %v10429_v63  ;;  %v6550_v63 = vld [vmem:[%s11770_s6 + $0x2b8] sm:$0xf0] }
 0x456   :  { %4657 = vmatpush.bf16.msra.mxu1 %v6409_v42  ;;  %v6345_v42 = vor.u32 %v7667_v61, %v6342_v62  ;;  %v7897_v58 = vld [vmem:[%s11772_s8 + $0x38] sm:$0xff]  ;;  %v7124_v62 = vld [vmem:[%s11770_s6 + $0x728] sm:$0xf] }
 0x457   :  { %4584 = vmatmul.bf16.vlgmr.msra.gmra.mxu3 %v10337_v6  ;;  %v6886_v61 = vld [vmem:[%s11770_s6 + $0x558] sm:$0xf0]  ;;  %5013 = vmatpush.bf16.msrb.mxu0 %v7897_v58  ;;  %v7125_v8 = vor.u32 %v7865_v26, %v7124_v62  ;;  %v7891_v26 = vld [vmem:[%s11772_s8 + $0x8] sm:$0xff] }
 0x458   :  { %4628 = vmatpush.bf16.msrb.mxu3 %v7221_v54  ;;  %4623 = vmatmul.bf16.vlgmr.msrb.gmra.mxu2 %v10799_v3  ;;  %v6505_v54 = vor.u32 %v7707_v51, %v6502_v7  ;;  %v6889_v5 = vor.u32 %v7803_v57, %v6886_v61  ;;  %v7747_v7 = vld [vmem:[%s11770_s6 + $0x38c] sm:$0xf]  ;;  %v7030_v62 = vld [vmem:[%s11770_s6 + $0x678] sm:$0xf0] }
 0x459   :  { %4667 = vmatpush.bf16.msra.mxu2 %v6585_v22  ;;  %v4496_v53 = vpop.f32.mrf.mxu0  ;;  %v7703_v22 = vld [vmem:[%s11770_s6 + $0x22c] sm:$0xf] }
 0x45a   :  { %4658 = vmatpush.bf16.msra.mxu1 %v6393_v59  ;;  %v6553_v59 = vor.u32 %v7719_v60, %v6550_v63  ;;  %v7855_v60 = vld [vmem:[%s11770_s6 + $0x6ec] sm:$0xf]  ;;  %v7094_v63 = vld [vmem:[%s11770_s6 + $0x6f8] sm:$0xf0] }
 0x45b   :  { %5014 = vmatpush.bf16.msrb.mxu0 %v7896_v20  ;;  %v7046_v53 = vld [vmem:[%s11770_s6 + $0x698] sm:$0xf0]  ;;  %v7839_v61 = vld [vmem:[%s11770_s6 + $0x66c] sm:$0xf] }
 0x45c   :  { %4629 = vmatpush.bf16.msrb.mxu3 %v7205_v15  ;;  %v4405_v48 = vpop.f32.mrf.mxu1  ;;  %v7108_v15 = vld [vmem:[%s11770_s6 + $0x708] sm:$0xf]  ;;  %v7014_v20 = vld [vmem:[%s11770_s6 + $0x658] sm:$0xf0] }
 0x45d   :  { %4668 = vmatpush.bf16.msra.mxu2 %v6569_v21  ;;  %v7699_v21 = vld [vmem:[%s11770_s6 + $0x20c] sm:$0xf]  ;;  %v7109_v35 = vor.u32 %v7861_v19, %v7108_v15  ;;  %v6662_v48 = vld [vmem:[%s11770_s6 + $0x398] sm:$0xf0] }
 0x45e   :  { %4659 = vmatpush.bf16.msra.mxu1 %v6377_v43  ;;  %v7873_v43 = vld [vmem:[%s11770_s6 + $0x774] sm:$0xf0]  ;;  %v6473_v38 = vor.u32 %v7699_v21, %v6470_v25  ;;  %v6665_v57 = vor.u32 %v7747_v7, %v6662_v48  ;;  %v7735_v25 = vld [vmem:[%s11770_s6 + $0x32c] sm:$0xf] }
 0x45f   :  { %v7157_v45 = vor.u32 %v7873_v43, %v7156_v33  ;;  %v7894_v43 = vld [vmem:[%s11772_s8 + $0x20] sm:$0xff]  ;;  %v7871_v48 = vld [vmem:[%s11770_s6 + $0x76c] sm:$0xf] }
 0x460   :  { %4630 = vmatpush.bf16.msrb.mxu3 %v7189_v34 }
 0x461   :  { %4669 = vmatpush.bf16.msra.mxu2 %v6553_v59  ;;  %v7895_v59 = vld [vmem:[%s11772_s8 + $0x28] sm:$0xff] }
 0x462   :  { %4660 = vmatpush.bf16.msra.mxu1 %v6361_v56  ;;  %v7141_v56 = vor.u32 %v7869_v24, %v7140_v49  ;;  %5015 = vmatpush.bf16.msrb.mxu0 %v7895_v59  ;;  %v6598_v59 = vld [vmem:[%s11770_s6 + $0x318] sm:$0xf0] }
 0x464   :  { %4631 = vmatpush.bf16.msrb.mxu3 %v7173_v14  ;;  %v7755_v14 = vld [vmem:[%s11770_s6 + $0x3cc] sm:$0xf] }
 0x465   :  { %4670 = vmatpush.bf16.msra.mxu2 %v6537_v17  ;;  %v7851_v17 = vld [vmem:[%s11770_s6 + $0x6cc] sm:$0xf] }
 0x466   :  { %4661 = vmatpush.bf16.msra.mxu1 %v6345_v42  ;;  %v6870_v42 = vld [vmem:[%s11770_s6 + $0x538] sm:$0xf0]  ;;  %v4455_v2 = vpop.f32.mrf.mxu1  ;;  %5016 = vmatpush.bf16.msrb.mxu0 %v7894_v43 }
 0x467   :  { %v6873_v34 = vor.u32 %v7799_v9, %v6870_v42  ;;  %v7835_v42 = vld [vmem:[%s11770_s6 + $0x64c] sm:$0xf]  ;;  %v7206_v43 = vld [vmem:[%s11770_s6 + $0x7d8] sm:$0xf0] }
 0x468   :  { %4632 = vmatpush.bf16.msrb.mxu3 %v7157_v45  ;;  %v6678_v45 = vld [vmem:[%s11770_s6 + $0x3b8] sm:$0xf0]  ;;  %v7017_v21 = vor.u32 %v7835_v42, %v7014_v20  ;;  %v7898_v20 = vld [vmem:[%s11772_s8 + $0x40] sm:$0xff] }
 0x469   :  { %4662 = vmatmul.bf16.vlgmr.msra.gmra.mxu1 %v10333_v10  ;;  %v7811_v10 = vld [vmem:[%s11770_s6 + $0x58c] sm:$0xf]  ;;  %4671 = vmatpush.bf16.msra.mxu2 %v6521_v1 }
 0x46a   :  { %4706 = vmatpush.bf16.msrb.mxu1 %v6969_v12  ;;  %v6921_v41 = vor.u32 %v7811_v10, %v6918_v44  ;;  %v6489_v12 = vor.u32 %v7703_v22, %v6486_v0  ;;  %v6694_v10 = vld [vmem:[%s11770_s6 + $0x3d8] sm:$0xf0]  ;;  %v7847_v1 = vld [vmem:[%s11770_s6 + $0x6ac] sm:$0xf]  ;;  %5017 = vmatpush.bf16.msrb.mxu0 %v7893_v13  ;;  %v7033_v0 = vor.u32 %v7839_v61, %v7030_v62 }
 0x46b   :  { %v7078_v44 = vld [vmem:[%s11770_s6 + $0x6d8] sm:$0xf0]  ;;  %v6697_v37 = vor.u32 %v7755_v14, %v6694_v10  ;;  %v7065_v51 = vor.u32 %v7847_v1, %v7062_v23  ;;  %v7904_v14 = vld [vmem:[%s11772_s8 + $0x70] sm:$0xff]  ;;  %v7902_v1 = vld [vmem:[%s11772_s8 + $0x60] sm:$0xff] }
 0x46c   :  { %4633 = vmatpush.bf16.msrb.mxu3 %v7141_v56  ;;  %v7081_v47 = vor.u32 %v7851_v17, %v7078_v44  ;;  %v7190_v13 = vld [vmem:[%s11770_s6 + $0x7b8] sm:$0xf0] }
 0x46d   :  { %4672 = vmatpush.bf16.msra.mxu2 %v6505_v54  ;;  %v6646_v54 = vld [vmem:[%s11770_s6 + $0x378] sm:$0xf0] }
 0x46e   :  { %4707 = vmatpush.bf16.msrb.mxu1 %v6953_v11  ;;  %v4443_v11 = vadd.f32 %v11313_v46, %v3042_v4  ;;  %v6854_v46 = vld [vmem:[%s11770_s6 + $0x518] sm:$0xf0]  ;;  %v4457_v49 = vpop.f32.mrf.mxu1  ;;  %v7739_v4 = vld [vmem:[%s11770_s6 + $0x34c] sm:$0xf] }
 0x46f   :  { %v6857_v33 = vor.u32 %v7795_v18, %v6854_v46  ;;  %v6982_v18 = vld [vmem:[%s11770_s6 + $0x618] sm:$0xf0]  ;;  %v7887_v46 = vld [vmem:[%s11770_s6 + $0x7ec] sm:$0xf] }
 0x470   :  { %4634 = vmatpush.bf16.msrb.mxu3 %v7125_v8  ;;  %v11508_v39 = vadd.f32 %v4455_v2, %v4443_v11  ;;  %v6617_v11 = vor.u32 %v7735_v25, %v6614_v29  ;;  %v7827_v2 = vld [vmem:[%s11770_s6 + $0x60c] sm:$0xf]  ;;  %v7142_v61 = vld [vmem:[%s11770_s6 + $0x758] sm:$0xf0] }
 0x471   :  { %4673 = vmatpush.bf16.msra.mxu2 %v6489_v12  ;;  %v7890_v12 = vld [vmem:[%s11772_s8] sm:$0xff]  ;;  %v6985_v17 = vor.u32 %v7827_v2, %v6982_v18  ;;  %v7875_v49 = vld [vmem:[%s11770_s6 + $0x78c] sm:$0xf] }
 0x472   :  { %4708 = vmatpush.bf16.msrb.mxu1 %v6937_v50  ;;  %v7097_v50 = vor.u32 %v7855_v60, %v7094_v63  ;;  %v11558_v56 = vpop.f32.mrf.mxu0  ;;  %v6998_v60 = vld [vmem:[%s11770_s6 + $0x638] sm:$0xf0] }
 0x473   :  { %v7905_v63 = vld [vmem:[%s11772_s8 + $0x78] sm:$0xff] }
 0x474   :  { %4635 = vmatpush.bf16.msrb.mxu3 %v7109_v35  ;;  %v7731_v35 = vld [vmem:[%s11770_s6 + $0x30c] sm:$0xf] }
 0x475   :  { %4674 = vmatpush.bf16.msra.mxu2 %v6473_v38  ;;  %v6601_v10 = vor.u32 %v7731_v35, %v6598_v59 }
 0x476   :  { %4709 = vmatpush.bf16.msrb.mxu1 %v6921_v41  ;;  %v7751_v41 = vld [vmem:[%s11770_s6 + $0x3ac] sm:$0xf] }
 0x477   :  { %4636 = vmatmul.bf16.vlgmr.msrb.gmra.mxu3 %v10960_v30  ;;  %v6681_v24 = vor.u32 %v7751_v41, %v6678_v45  ;;  %v7879_v45 = vld [vmem:[%s11770_s6 + $0x7ac] sm:$0xf] }
 0x478   :  { %4680 = vmatpush.bf16.msra.mxu3 %v6713_v36  ;;  %4675 = vmatmul.bf16.vlgmr.msra.gmra.mxu2 %v10335_v28  ;;  %v7843_v28 = vld [vmem:[%s11770_s6 + $0x68c] sm:$0xf]  ;;  %v7193_v23 = vor.u32 %v7879_v45, %v7190_v13  ;;  %v7934_v45 = vld [vmem:[%s11771_s7] sm:$0xf] }
 0x479   :  { %4719 = vmatpush.bf16.msrb.mxu2 %v7097_v50  ;;  %v7049_v58 = vor.u32 %v7843_v28, %v7046_v53  ;;  %v7222_v50 = vld [vmem:[%s11770_s6 + $0x7f8] sm:$0xf0]  ;;  %v3044_v13 = vperm.slane %v7934_v45, 3 }
 0x47a   :  { %4710 = vmatpush.bf16.msrb.mxu1 %v6905_v55  ;;  %v7892_v55 = vld [vmem:[%s11772_s8 + $0x10] sm:$0xff]  ;;  %v11583_v9 = vpop.f32.mrf.mxu2  ;;  %v4548_v15 = vpop.f32.mrf.mxu0  ;;  %v7225_v44 = vor.u32 %v7887_v46, %v7222_v50  ;;  %v7158_v28 = vld [vmem:[%s11770_s6 + $0x778] sm:$0xf0] }
 0x47b   :  { %5018 = vmatpush.bf16.msrb.mxu0 %v7892_v55  ;;  %v7900_v55 = vld [vmem:[%s11772_s8 + $0x50] sm:$0xff] }
 0x47c   :  { %4681 = vmatpush.bf16.msra.mxu3 %v6697_v37  ;;  %v7903_v37 = vld [vmem:[%s11772_s8 + $0x68] sm:$0xff] }
 0x47d   :  { %4720 = vmatpush.bf16.msrb.mxu2 %v7081_v47 }
 0x47e   :  { %4711 = vmatpush.bf16.msrb.mxu1 %v6889_v5  ;;  %v6630_v5 = vld [vmem:[%s11770_s6 + $0x358] sm:$0xf0] }
 0x47f   :  { %5019 = vmatpush.bf16.msrb.mxu0 %v7891_v26  ;;  %v6633_v19 = vor.u32 %v7739_v4, %v6630_v5  ;;  %v7863_v4 = vld [vmem:[%s11770_s6 + $0x72c] sm:$0xf]  ;;  %v7126_v5 = vld [vmem:[%s11770_s6 + $0x738] sm:$0xf0] }
 0x480   :  { %4682 = vmatpush.bf16.msra.mxu3 %v6681_v24  ;;  %v7174_v24 = vld [vmem:[%s11770_s6 + $0x798] sm:$0xf0]  ;;  %v7129_v15 = vor.u32 %v7863_v4, %v7126_v5  ;;  %v7919_v5 = vld [vmem:[%s11772_s8 + $0xe8] sm:$0xff] }
 0x481   :  { %4721 = vmatpush.bf16.msrb.mxu2 %v7065_v51  ;;  %v7901_v51 = vld [vmem:[%s11772_s8 + $0x58] sm:$0xff]  ;;  %v7177_v7 = vor.u32 %v7875_v49, %v7174_v24 }
 0x482   :  { %4712 = vmatpush.bf16.msrb.mxu1 %v6873_v34  ;;  %v7001_v34 = vor.u32 %v7831_v32, %v6998_v60  ;;  %v4418_v36 = vpop.f32.mrf.mxu2 }
 0x483   :  { %5020 = vmatpush.bf16.msrb.mxu0 %v7890_v12 }
 0x484   :  { %4683 = vmatpush.bf16.msra.mxu3 %v6665_v57  ;;  %v4404_v57 = vadd.f32 %v11403_v16, %v11221_v52  ;;  %v7899_v52 = vld [vmem:[%s11772_s8 + $0x48] sm:$0xff] }
 0x485   :  { %4722 = vmatpush.bf16.msrb.mxu2 %v7049_v58 }
 0x486   :  { %4713 = vmatpush.bf16.msrb.mxu1 %v6857_v33  ;;  %v11581_v8 = vpop.f32.mrf.mxu1  ;;  %v7883_v33 = vld [vmem:[%s11770_s6 + $0x7cc] sm:$0xf] }
 0x487   :  { %v7209_v47 = vor.u32 %v7883_v33, %v7206_v43 }
 0x489   :  { %4714 = vmatmul.bf16.vlgmr.msrb.gmra.mxu1 %v10642_v31  ;;  %v7743_v31 = vld [vmem:[%s11770_s6 + $0x36c] sm:$0xf]  ;;  %4723 = vmatpush.bf16.msrb.mxu2 %v7033_v0 }
 0x48a   :  { %v6649_v22 = vor.u32 %v7743_v31, %v6646_v54  ;;  %5026 = vmatpush.bf16.msra.mxu1 %v7905_v63  ;;  %v4468_v41 = vpop.f32.mrf.mxu2  ;;  %v4417_v31 = vadd.f32 %v11583_v9, %v4404_v57  ;;  %v7867_v54 = vld [vmem:[%s11770_s6 + $0x74c] sm:$0xf] }
 0x48c   :  { %4684 = vmatpush.bf16.msra.mxu3 %v6649_v22  ;;  %v7145_v22 = vor.u32 %v7867_v54, %v7142_v61 }
 0x48d   :  { %4724 = vmatpush.bf16.msrb.mxu2 %v7017_v21  ;;  %v7110_v21 = vld [vmem:[%s11770_s6 + $0x718] sm:$0xf0] }
 0x48e   :  { %v4509_v38 = vpop.f32.mrf.mxu1  ;;  %5027 = vmatpush.bf16.msra.mxu1 %v7904_v14 }
 0x490   :  { %4685 = vmatpush.bf16.msra.mxu3 %v6633_v19  ;;  %v7859_v19 = vld [vmem:[%s11770_s6 + $0x70c] sm:$0xf] }
 0x491   :  { %4725 = vmatpush.bf16.msrb.mxu2 %v7001_v34  ;;  %v7113_v32 = vor.u32 %v7859_v19, %v7110_v21  ;;  %v7915_v19 = vld [vmem:[%s11772_s8 + $0xc8] sm:$0xff] }
 0x492   :  { %5028 = vmatpush.bf16.msra.mxu1 %v7903_v37  ;;  %v11666_v53 = vpop.f32.mrf.mxu0  ;;  %v7910_v37 = vld [vmem:[%s11772_s8 + $0xa0] sm:$0xff] }
 0x494   :  { %4686 = vmatpush.bf16.msra.mxu3 %v6617_v11  ;;  %v4469_v11 = vadd.f32 %v4468_v41, %v11508_v39  ;;  %v7908_v41 = vld [vmem:[%s11772_s8 + $0x90] sm:$0xff] }
 0x495   :  { %4726 = vmatpush.bf16.msrb.mxu2 %v6985_v17 }
 0x496   :  { %5029 = vmatpush.bf16.msra.mxu1 %v7902_v1 }
 0x498   :  { %4687 = vmatpush.bf16.msra.mxu3 %v6601_v10  ;;  %4727 = vmatmul.bf16.vlgmr.msrb.gmra.mxu2 %v10799_v3  ;;  %v4470_v3 = vpop.f32.mrf.mxu2  ;;  %v7913_v10 = vld [vmem:[%s11772_s8 + $0xb8] sm:$0xff] }
 0x499   :  { %5039 = vmatpush.bf16.msra.mxu2 %v7913_v10  ;;  %v7906_v3 = vld [vmem:[%s11772_s8 + $0x80] sm:$0xff] }
 0x49a   :  { %5030 = vmatpush.bf16.msra.mxu1 %v7901_v51  ;;  %v4429_v26 = vpop.f32.mrf.mxu3  ;;  %v4600_v9 = vpop.f32.mrf.mxu0  ;;  %v7932_v10 = vld [vmem:[%s11773_s9] ss:$0 sm:$0xff] }
 0x49b   :  { %4688 = vmatmul.bf16.vlgmr.msra.gmra.mxu3 %v10337_v6  ;;  %v3043_v6 = vperm.slane %v11000_v27, 2  ;;  %v7161_v27 = vor.u32 %v7871_v48, %v7158_v28 }
 0x49c   :  { %4732 = vmatpush.bf16.msrb.mxu3 %v7225_v44 }
 0x49d   :  { %v4547_v58 = vadd.f32 %v11558_v56, %v3043_v6  ;;  %v4430_v56 = vadd.f32 %v4429_v26, %v4417_v31 }
 0x49e   :  { %5031 = vmatpush.bf16.msra.mxu1 %v7900_v55 }
 0x49f   :  { %v4745_v0 = vmax.f32 %v4430_v56, 0.0  ;;  %v7921_v56 = vld [vmem:[%s11772_s8 + $0xf8] sm:$0xff] }
 0x4a0   :  { %4733 = vmatpush.bf16.msrb.mxu3 %v7209_v47  ;;  %v4520_v42 = vpop.f32.mrf.mxu2  ;;  %v7909_v47 = vld [vmem:[%s11772_s8 + $0x98] sm:$0xff] }
 0x4a1   :  { %v4749_v12 = vpack.c.bf16 %v4745_v0, %v4745_v0 }
 0x4a2   :  { %5032 = vmatpush.bf16.msra.mxu1 %v7899_v52  ;;  %v4431_v29 = vpop.f32.mrf.mxu3 }
 0x4a3   :  { %5021 = vmatmul.bf16.vlgmr.msrb.gmra.mxu0 %v4749_v12  ;;  %v7917_v12 = vld [vmem:[%s11772_s8 + $0xd8] sm:$0xff]  ;;  %v7914_v29 = vld [vmem:[%s11772_s8 + $0xc0] sm:$0xff] }
 0x4a4   :  { %4734 = vmatpush.bf16.msrb.mxu3 %v7193_v23  ;;  %v7907_v23 = vld [vmem:[%s11772_s8 + $0x88] sm:$0xff] }
 0x4a6   :  { %v4559_v62 = vpop.f32.mrf.mxu1  ;;  %5033 = vmatpush.bf16.msra.mxu1 %v7898_v20  ;;  %v7918_v20 = vld [vmem:[%s11772_s8 + $0xe0] sm:$0xff] }
 0x4a7   :  { %v11684_v16 = vadd.f32 %v4559_v62, %v4547_v58 }
 0x4a8   :  { %4735 = vmatpush.bf16.msrb.mxu3 %v7177_v7  ;;  %v4522_v60 = vpop.f32.mrf.mxu2 }
 0x4aa   :  { %v4481_v63 = vpop.f32.mrf.mxu3 }
 0x4ab   :  { %v4482_v34 = vadd.f32 %v4481_v63, %v4469_v11 }
 0x4ac   :  { %4736 = vmatpush.bf16.msrb.mxu3 %v7161_v27 }
 0x4ad   :  { %v4495_v35 = vadd.f32 %v11405_v40, %v4482_v34  ;;  %v7912_v40 = vld [vmem:[%s11772_s8 + $0xb0] sm:$0xff] }
 0x4ae   :  { %v4561_v25 = vpop.f32.mrf.mxu1  ;;  %5040 = vmatpush.bf16.msra.mxu2 %v7912_v40 }
 0x4af   :  { %v4508_v38 = vadd.f32 %v11581_v8, %v4495_v35  ;;  %v7911_v8 = vld [vmem:[%s11772_s8 + $0xa8] sm:$0xff] }
 0x4b0   :  { %4737 = vmatpush.bf16.msrb.mxu3 %v7145_v22 }
 0x4b1   :  { %v4521_v46 = vadd.f32 %v4520_v42, %v4508_v38 }
 0x4b2   :  { %v4483_v59 = vpop.f32.mrf.mxu3  ;;  %v4650_v2 = vpop.f32.mrf.mxu0  ;;  %5041 = vmatpush.bf16.msra.mxu2 %v7911_v8 }
 0x4b3   :  { %v4651_v49 = vadd.f32 %v4650_v2, %v3044_v13 }
 0x4b4   :  { %4738 = vmatpush.bf16.msrb.mxu3 %v7129_v15  ;;  %v7916_v15 = vld [vmem:[%s11772_s8 + $0xd0] sm:$0xff] }
 0x4b6   :  { %5042 = vmatpush.bf16.msra.mxu2 %v7910_v37 }
 0x4b8   :  { %4739 = vmatpush.bf16.msrb.mxu3 %v7113_v32 }
 0x4ba   :  { %v4652_v50 = vpop.f32.mrf.mxu0  ;;  %v4533_v14 = vpop.f32.mrf.mxu3  ;;  %5043 = vmatpush.bf16.msra.mxu2 %v7909_v47 }
 0x4bb   :  { %4740 = vmatmul.bf16.vlgmr.msrb.gmra.mxu3 %v10960_v30  ;;  %v4572_v18 = vpop.f32.mrf.mxu2  ;;  %v4534_v17 = vadd.f32 %v4533_v14, %v4521_v46 }
 0x4bc   :  { %v4573_v51 = vadd.f32 %v4572_v18, %v11684_v16  ;;  %5052 = vmatpush.bf16.msra.mxu3 %v7921_v56 }
 0x4bd   :  { %v4746_v30 = vmax.f32 %v4534_v17, 0.0 }
 0x4be   :  { %5044 = vmatpush.bf16.msra.mxu2 %v7908_v41 }
 0x4bf   :  { %v4750_v44 = vpack.c.bf16 %v4746_v30, %v4746_v30 }
 0x4c1   :  { %5034 = vmatmul.bf16.vlgmr.msra.gmra.mxu1 %v4750_v44 }
 0x4c2   :  { %v4535_v43 = vpop.f32.mrf.mxu3  ;;  %5045 = vmatpush.bf16.msra.mxu2 %v7907_v23 }
 0x4c3   :  { %v4574_v33 = vpop.f32.mrf.mxu2 }
 0x4c6   :  { %v4611_v36 = vpop.f32.mrf.mxu1  ;;  %5046 = vmatpush.bf16.msra.mxu2 %v7906_v3 }
 0x4ce   :  { %v4613_v39 = vpop.f32.mrf.mxu1 }
 0x4d2   :  { %v4702_v1 = vpop.f32.mrf.mxu0 }
 0x4da   :  { %v4585_v6 = vpop.f32.mrf.mxu3  ;;  %v4704_v55 = vpop.f32.mrf.mxu0 }
 0x4db   :  { %v4586_v48 = vadd.f32 %v4585_v6, %v4573_v51  ;;  %v4624_v28 = vpop.f32.mrf.mxu2 }
 0x4dd   :  { %v4599_v57 = vadd.f32 %v11666_v53, %v4586_v48  ;;  %v7920_v53 = vld [vmem:[%s11772_s8 + $0xf0] sm:$0xff]  ;;  %s7969_s8 = smov [#allocation3]  }
 0x4de   :  { %5053 = vmatpush.bf16.msra.mxu3 %v7920_v53  ;;  %s5071_s12 = sshll.u32 %s7969_s8, 4  ;;  %s5072_s12 = int_to_ptr.vmem [resolvable:$true] %s5071_s12 }
 0x4df   :  { %v4612_v54 = vadd.f32 %v4611_v36, %v4599_v57 }
 0x4e1   :  { %v4625_v62 = vadd.f32 %v4624_v28, %v4612_v54 }
 0x4e2   :  { %v4587_v58 = vpop.f32.mrf.mxu3  ;;  %5054 = vmatpush.bf16.msra.mxu3 %v7919_v5 }
 0x4e3   :  { %v4626_v31 = vpop.f32.mrf.mxu2 }
 0x4e6   :  { %v4663_v24 = vpop.f32.mrf.mxu1  ;;  %5055 = vmatpush.bf16.msra.mxu3 %v7918_v20 }
 0x4e7   :  { %v4664_v7 = vadd.f32 %v4663_v24, %v4651_v49 }
 0x4ea   :  { %5056 = vmatpush.bf16.msra.mxu3 %v7917_v12 }
 0x4ee   :  { %v4665_v27 = vpop.f32.mrf.mxu1  ;;  %5057 = vmatpush.bf16.msra.mxu3 %v7916_v15 }
 0x4f2   :  { %5058 = vmatpush.bf16.msra.mxu3 %v7915_v19 }
 0x4f6   :  { %5059 = vmatpush.bf16.msra.mxu3 %v7914_v29 }
 0x4fa   :  { %v4637_v26 = vpop.f32.mrf.mxu3 }
 0x4fb   :  { %v4638_v52 = vadd.f32 %v4637_v26, %v4625_v62  ;;  %v4676_v16 = vpop.f32.mrf.mxu2 }
 0x4fc   :  { %v4677_v21 = vadd.f32 %v4676_v16, %v4664_v7 }
 0x4fd   :  { %v4747_v22 = vmax.f32 %v4638_v52, 0.0 }
 0x4ff   :  { %v4751_v0 = vpack.c.bf16 %v4747_v22, %v4747_v22 }
 0x501   :  { %5047 = vmatmul.bf16.vlgmr.msra.gmra.mxu2 %v4751_v0 }
 0x502   :  { %v4639_v9 = vpop.f32.mrf.mxu3 }
 0x503   :  { %v4678_v42 = vpop.f32.mrf.mxu2 }
 0x506   :  { %v4715_v61 = vpop.f32.mrf.mxu1 }
 0x50e   :  { %v4717_v4 = vpop.f32.mrf.mxu1 }
 0x51b   :  { %v4728_v60 = vpop.f32.mrf.mxu2 }
 0x51e   :  { %v4689_v25 = vpop.f32.mrf.mxu3 }
 0x51f   :  { %v4690_v32 = vadd.f32 %v4689_v25, %v4677_v21 }
 0x520   :  { %v5022_v35 = vpop.f32.mrf.mxu0 }
 0x521   :  { %v4703_v63 = vadd.f32 %v4702_v1, %v4690_v32  ;;  %v5023_v17 = vadd.f32 %v7932_v10, %v5022_v35 }
 0x523   :  { %v4730_v34 = vpop.f32.mrf.mxu2  ;;  %v4716_v2 = vadd.f32 %v4715_v61, %v4703_v63 }
 0x525   :  { %v4729_v38 = vadd.f32 %v4728_v60, %v4716_v2 }
 0x526   :  { %v4691_v11 = vpop.f32.mrf.mxu3 }
 0x528   :  { %v5024_v59 = vpop.f32.mrf.mxu0 }
 0x53e   :  { %v4741_v36 = vpop.f32.mrf.mxu3  ;;  %v5035_v30 = vpop.f32.mrf.mxu1 }
 0x53f   :  { %v4742_v18 = vadd.f32 %v4741_v36, %v4729_v38  ;;  %v5036_v39 = vadd.f32 %v5035_v30, %v5023_v17 }
 0x541   :  { %v4748_v46 = vmax.f32 %v4742_v18, 0.0 }
 0x543   :  { %v4752_v50 = vpack.c.bf16 %v4748_v46, %v4748_v46 }
 0x545   :  { %5060 = vmatmul.bf16.vlgmr.msra.gmra.mxu3 %v4752_v50 }
 0x546   :  { %v4743_v14 = vpop.f32.mrf.mxu3  ;;  %v5037_v40 = vpop.f32.mrf.mxu1 }
 0x584   :  { %v5048_v44 = vpop.f32.mrf.mxu2 }
 0x585   :  { %v5049_v33 = vadd.f32 %v5048_v44, %v5036_v39 }
 0x58c   :  { %v5050_v8 = vpop.f32.mrf.mxu2 }
 0x5c8   :  { %v5061_v43 = vpop.f32.mrf.mxu3 }
 0x5c9   :  { %v5062_v37 = vadd.f32 %v5061_v43, %v5049_v33 }
 0x5cb   :  { %5065 = vst [vmem:[#allocation3] sm:$0x3] %v5062_v37 }
 0x5cc   :  { %5076 = dma.vmem_to_hbm [thread:$0]  %s5072_s12, 32, %s5074_s15, [#allocation4]  }
 0x5d0   :  { %v5063_v47 = vpop.f32.mrf.mxu3 }
 0x5d1   :  { %7959 = dma.done.wait [#allocation4], 32  }
 0x5d2   :  { %7960 = vsyncadd [#allocation4], 4294967264 }
 0x5d3   :  { %5081 = vsyncpa [#allocation4], 1 }

</bundles_post_ra>
